<compile_context>
chip_gen: v5e
topology: v5e:2x2
jax: 0.10.0
libtpu: 0.0.40
codegen_flags: <defaults>
</compile_context>

<pallas_src>
import functools
import math

import jax
import jax.numpy as jnp
from jax import lax
from jax.experimental import pallas as pl
from jax.experimental.pallas import tpu as pltpu

LANE = 128        # TPU vreg lane width
NUM_LAYERS = 6


def _round_up(n, m):
    return ((n + m - 1) // m) * m


def _gelu_exact(x):
    # nn.GELU() default: exact erf-based GELU (module semantics).
    return 0.5 * x * (1.0 + lax.erf(x * (1.0 / math.sqrt(2.0))))


def _gelu_tanh(x):
    # tanh approximation -> transcendental runs on the EUP slot (VALU stays free).
    c = math.sqrt(2.0 / math.pi)
    return 0.5 * x * (1.0 + jnp.tanh(c * (x + 0.044715 * (x * x * x))))


def mlp_kernel(x_ref, w_ref, b_ref, o_ref, *, approximate_gelu):
    """One batch tile: 6 matmuls + biases + 5 GELUs fully fused in VMEM.

    x_ref: (tile, Dp) in the MXU input dtype (bf16 fast path / f32 exact path).
    w_ref: (6, Dp, Dp) stacked weights (MXU dtype), b_ref: (6, 1, Dp) f32 biases.
    """
    gelu = _gelu_tanh if approximate_gelu else _gelu_exact
    mxu_dtype = w_ref.dtype

    h = x_ref[...]                              # already mxu_dtype for layer 0
    for i in range(NUM_LAYERS):                 # static unroll; w_ref[i] is static
        a = h if h.dtype == mxu_dtype else h.astype(mxu_dtype)
        h = jnp.dot(a, w_ref[i], preferred_element_type=jnp.float32) + b_ref[i]
        if i < NUM_LAYERS - 1:
            h = gelu(h)                         # f32 elementwise (v5e-safe)
    o_ref[...] = h.astype(o_ref.dtype)


def _choose_batch_tile(N):
    if N <= 16:
        return 16                               # bf16 packs 16 rows per vreg
    if N <= 128:
        return _round_up(N, 16)                 # single grid step, full vregs
    # Large N: 128-row multiples in the 128-512 range, >=2 steps (v7x: 2 TCs).
    return max(128, min(512, _round_up(pl.cdiv(N, 2), 128)))


def mlp_forward(x, params, *, batch_tile=None, mxu_dtype=jnp.bfloat16,
                approximate_gelu=None):
    """x: (N, D_in) f32. params: list of (W, b), W: (in, out), b: (1, out).

    mxu_dtype=jnp.bfloat16 -> fast path (tanh GELU, bf16 MXU, f32 accumulation).
    mxu_dtype=jnp.float32  -> exact validation path (erf GELU).
    """
    assert len(params) == NUM_LAYERS
    if approximate_gelu is None:
        approximate_gelu = (mxu_dtype == jnp.bfloat16)

    N, D_in = x.shape
    D_out = params[-1][0].shape[1]

    # Uniform padded feature width so all layers stack into one operand.
    dims = [D_in] + [W.shape[1] for (W, _) in params]
    Dp = max(_round_up(d, LANE) for d in dims)

    if batch_tile is None:
        batch_tile = _choose_batch_tile(N)
    N_pad = _round_up(N, batch_tile)

    # Pre-cast the input to the MXU dtype (halves input HBM traffic on fast path).
    x_p = jnp.pad(x, ((0, N_pad - N), (0, Dp - D_in))).astype(mxu_dtype)

    w_list, b_list = [], []
    for (W, b) in params:
        fi, fo = W.shape
        w_list.append(jnp.pad(W, ((0, Dp - fi), (0, Dp - fo))).astype(mxu_dtype))
        b_list.append(jnp.pad(b.reshape(1, -1), ((0, 0), (0, Dp - fo)))
                      .astype(jnp.float32))
    W_stack = jnp.stack(w_list)                 # (6, Dp, Dp)
    B_stack = jnp.stack(b_list)                 # (6, 1, Dp)

    in_specs = [
        pl.BlockSpec((batch_tile, Dp), lambda i: (i, 0)),
        # Full-array blocks, constant index_map -> weights/biases resident in VMEM.
        pl.BlockSpec(W_stack.shape, lambda i: (0, 0, 0)),
        pl.BlockSpec(B_stack.shape, lambda i: (0, 0, 0)),
    ]
    out_spec = pl.BlockSpec((batch_tile, Dp), lambda i: (i, 0))

    # VMEM budget: count double-buffering of all operands + headroom, cap at the
    # device's VMEM capacity (64 MiB on v7x, 128 MiB on v5e/v6e).
    w_bytes = int(W_stack.size) * W_stack.dtype.itemsize
    b_bytes = int(B_stack.size) * B_stack.dtype.itemsize
    io_bytes = batch_tile * Dp * (x_p.dtype.itemsize + 4)   # in tile + f32 out tile
    needed = 2 * (w_bytes + b_bytes + io_bytes) + (8 << 20)
    try:
        vmem_cap = int(pltpu.get_tpu_info().vmem_capacity_bytes)
    except Exception:
        vmem_cap = 64 << 20                     # safe floor (v7x per-TC VMEM)
    vmem_limit = int(min(vmem_cap, max(needed, 16 << 20)))

    kernel = functools.partial(mlp_kernel, approximate_gelu=approximate_gelu)

    out_p = pl.pallas_call(
        kernel,
        out_shape=jax.ShapeDtypeStruct((N_pad, Dp), jnp.float32),
        grid_spec=pltpu.PrefetchScalarGridSpec(
            num_scalar_prefetch=0,
            grid=(N_pad // batch_tile,),
            in_specs=in_specs,
            out_specs=out_spec,
        ),
        compiler_params=pltpu.CompilerParams(
            dimension_semantics=("parallel",),
            vmem_limit_bytes=vmem_limit),
    )(x_p, W_stack, B_stack)

    return out_p[:N, :D_out]


def init_linear(key, fan_in, fan_out):
    # Mimics nn.Linear's Kaiming-uniform init (bound = 1/sqrt(fan_in)).
    kw, kb = jax.random.split(key)
    bound = 1.0 / math.sqrt(fan_in)
    W = jax.random.uniform(kw, (fan_in, fan_out), jnp.float32, -bound, bound)
    b = jax.random.uniform(kb, (1, fan_out), jnp.float32, -bound, bound)
    return W, b


def reference_mlp(x, params):
    h = x
    for i, (W, b) in enumerate(params):
        h = h @ W + b
        if i < len(params) - 1:
            h = _gelu_exact(h)
    return h


if __name__ == "__main__":
    # MLP(D_in=32, H1=64, H2=48, H3=32, D_out=16); N=256 -> 2 grid steps of 128 rows.
    D_in, H1, H2, H3, D_out = 32, 64, 48, 32, 16
    N = 256

    key = jax.random.PRNGKey(0)
    keys = jax.random.split(key, 7)
    x = jax.random.normal(keys[0], (N, D_in), jnp.float32)

    layer_dims = [(D_in, H1), (H1, H1), (H1, H2), (H2, H2), (H2, H3), (H3, D_out)]
    params = [init_linear(keys[i + 1], fi, fo)
              for i, (fi, fo) in enumerate(layer_dims)]

    y_ref = reference_mlp(x, params)

    # Exact path: f32 MXU inputs + erf GELU -> tracks the reference tightly.
    y_f32 = jax.block_until_ready(mlp_forward(x, params, mxu_dtype=jnp.float32))
    assert y_f32.shape == (N, D_out)
    assert jnp.allclose(y_f32, y_ref, atol=1e-4, rtol=1e-4), "f32 mismatch vs reference"

    # Fast path: bf16 MXU inputs (f32 accumulation) + tanh GELU; relative-error check.
    y_bf16 = jax.block_until_ready(mlp_forward(x, params))
    assert y_bf16.shape == (N, D_out)
    max_err = float(jnp.max(jnp.abs(y_bf16 - y_ref)))
    scale = float(jnp.max(jnp.abs(y_ref)))
    assert max_err <= 5e-2 * scale + 1e-3, \
        f"bf16 path error too large: {max_err} (scale {scale})"

    print("KERNEL_OK")
</pallas_src>

<mosaic_0001>
module attributes {stable_mosaic.version = 11 : i64} {
  func.func @mlp_kernel(%arg0: i32, %arg1: memref<128x128xf32, #tpu.memory_space<vmem>>, %arg2: memref<6x128x128xf32, #tpu.memory_space<vmem>>, %arg3: memref<6x1x128xf32, #tpu.memory_space<vmem>>, %arg4: memref<128x128xf32, #tpu.memory_space<vmem>>) attributes {dimension_semantics = [#tpu.dimension_semantics<parallel>], iteration_bounds = array<i64: 2>, scalar_prefetch = 0 : i64, scratch_operands = 0 : i64, tpu.core_type = #tpu.core_type<tc>, window_params = [{transform_indices = @transform_0, window_bounds = array<i64: 128, 128>}, {pipeline_mode = #tpu.pipeline_mode<synchronous>, transform_indices = @transform_1, window_bounds = array<i64: 6, 128, 128>}, {pipeline_mode = #tpu.pipeline_mode<synchronous>, transform_indices = @transform_2, window_bounds = array<i64: 6, 1, 128>}, {transform_indices = @transform_3, window_bounds = array<i64: 128, 128>}]} {
    %c0 = arith.constant 0 : index
    %c0_0 = arith.constant 0 : index
    %0 = vector.load %arg1[%c0, %c0_0] : memref<128x128xf32, #tpu.memory_space<vmem>>, vector<128x128xf32>
    %c0_1 = arith.constant 0 : index
    %c0_2 = arith.constant 0 : index
    %c0_3 = arith.constant 0 : index
    %1 = vector.load %arg2[%c0_1, %c0_2, %c0_3] : memref<6x128x128xf32, #tpu.memory_space<vmem>>, vector<1x128x128xf32>
    %2 = vector.shape_cast %1 : vector<1x128x128xf32> to vector<128x128xf32>
    %cst = arith.constant dense<0.000000e+00> : vector<128x128xf32>
    %3 = tpu.matmul %0, %2, %cst {dimension_numbers = #tpu.dot_dimension_numbers<[1], [0], [0], [1], [0, 0, 1, 1], [], []>} : vector<128x128xf32>, vector<128x128xf32>, vector<128x128xf32> -> vector<128x128xf32>
    %c0_4 = arith.constant 0 : index
    %c0_5 = arith.constant 0 : index
    %c0_6 = arith.constant 0 : index
    %4 = vector.load %arg3[%c0_4, %c0_5, %c0_6] : memref<6x1x128xf32, #tpu.memory_space<vmem>>, vector<1x1x128xf32>
    %5 = vector.shape_cast %4 : vector<1x1x128xf32> to vector<1x128xf32>
    %6 = vector.broadcast %5 : vector<1x128xf32> to vector<128x128xf32>
    %7 = arith.addf %3, %6 : vector<128x128xf32>
    %cst_7 = arith.constant 5.000000e-01 : f32
    %8 = vector.broadcast %cst_7 : f32 to vector<128x128xf32>
    %9 = arith.mulf %8, %7 : vector<128x128xf32>
    %cst_8 = arith.constant 0.707106769 : f32
    %10 = vector.broadcast %cst_8 : f32 to vector<128x128xf32>
    %11 = arith.mulf %7, %10 : vector<128x128xf32>
    %12 = math.erf %11 : vector<128x128xf32>
    %cst_9 = arith.constant 1.000000e+00 : f32
    %13 = vector.broadcast %cst_9 : f32 to vector<128x128xf32>
    %14 = arith.addf %13, %12 : vector<128x128xf32>
    %15 = arith.mulf %9, %14 : vector<128x128xf32>
    %c1 = arith.constant 1 : index
    %c0_10 = arith.constant 0 : index
    %c0_11 = arith.constant 0 : index
    %16 = vector.load %arg2[%c1, %c0_10, %c0_11] : memref<6x128x128xf32, #tpu.memory_space<vmem>>, vector<1x128x128xf32>
    %17 = vector.shape_cast %16 : vector<1x128x128xf32> to vector<128x128xf32>
    %cst_12 = arith.constant dense<0.000000e+00> : vector<128x128xf32>
    %18 = tpu.matmul %15, %17, %cst_12 {dimension_numbers = #tpu.dot_dimension_numbers<[1], [0], [0], [1], [0, 0, 1, 1], [], []>} : vector<128x128xf32>, vector<128x128xf32>, vector<128x128xf32> -> vector<128x128xf32>
    %c1_13 = arith.constant 1 : index
    %c0_14 = arith.constant 0 : index
    %c0_15 = arith.constant 0 : index
    %19 = vector.load %arg3[%c1_13, %c0_14, %c0_15] : memref<6x1x128xf32, #tpu.memory_space<vmem>>, vector<1x1x128xf32>
    %20 = vector.shape_cast %19 : vector<1x1x128xf32> to vector<1x128xf32>
    %21 = vector.broadcast %20 : vector<1x128xf32> to vector<128x128xf32>
    %22 = arith.addf %18, %21 : vector<128x128xf32>
    %cst_16 = arith.constant 5.000000e-01 : f32
    %23 = vector.broadcast %cst_16 : f32 to vector<128x128xf32>
    %24 = arith.mulf %23, %22 : vector<128x128xf32>
    %cst_17 = arith.constant 0.707106769 : f32
    %25 = vector.broadcast %cst_17 : f32 to vector<128x128xf32>
    %26 = arith.mulf %22, %25 : vector<128x128xf32>
    %27 = math.erf %26 : vector<128x128xf32>
    %cst_18 = arith.constant 1.000000e+00 : f32
    %28 = vector.broadcast %cst_18 : f32 to vector<128x128xf32>
    %29 = arith.addf %28, %27 : vector<128x128xf32>
    %30 = arith.mulf %24, %29 : vector<128x128xf32>
    %c2 = arith.constant 2 : index
    %c0_19 = arith.constant 0 : index
    %c0_20 = arith.constant 0 : index
    %31 = vector.load %arg2[%c2, %c0_19, %c0_20] : memref<6x128x128xf32, #tpu.memory_space<vmem>>, vector<1x128x128xf32>
    %32 = vector.shape_cast %31 : vector<1x128x128xf32> to vector<128x128xf32>
    %cst_21 = arith.constant dense<0.000000e+00> : vector<128x128xf32>
    %33 = tpu.matmul %30, %32, %cst_21 {dimension_numbers = #tpu.dot_dimension_numbers<[1], [0], [0], [1], [0, 0, 1, 1], [], []>} : vector<128x128xf32>, vector<128x128xf32>, vector<128x128xf32> -> vector<128x128xf32>
    %c2_22 = arith.constant 2 : index
    %c0_23 = arith.constant 0 : index
    %c0_24 = arith.constant 0 : index
    %34 = vector.load %arg3[%c2_22, %c0_23, %c0_24] : memref<6x1x128xf32, #tpu.memory_space<vmem>>, vector<1x1x128xf32>
    %35 = vector.shape_cast %34 : vector<1x1x128xf32> to vector<1x128xf32>
    %36 = vector.broadcast %35 : vector<1x128xf32> to vector<128x128xf32>
    %37 = arith.addf %33, %36 : vector<128x128xf32>
    %cst_25 = arith.constant 5.000000e-01 : f32
    %38 = vector.broadcast %cst_25 : f32 to vector<128x128xf32>
    %39 = arith.mulf %38, %37 : vector<128x128xf32>
    %cst_26 = arith.constant 0.707106769 : f32
    %40 = vector.broadcast %cst_26 : f32 to vector<128x128xf32>
    %41 = arith.mulf %37, %40 : vector<128x128xf32>
    %42 = math.erf %41 : vector<128x128xf32>
    %cst_27 = arith.constant 1.000000e+00 : f32
    %43 = vector.broadcast %cst_27 : f32 to vector<128x128xf32>
    %44 = arith.addf %43, %42 : vector<128x128xf32>
    %45 = arith.mulf %39, %44 : vector<128x128xf32>
    %c3 = arith.constant 3 : index
    %c0_28 = arith.constant 0 : index
    %c0_29 = arith.constant 0 : index
    %46 = vector.load %arg2[%c3, %c0_28, %c0_29] : memref<6x128x128xf32, #tpu.memory_space<vmem>>, vector<1x128x128xf32>
    %47 = vector.shape_cast %46 : vector<1x128x128xf32> to vector<128x128xf32>
    %cst_30 = arith.constant dense<0.000000e+00> : vector<128x128xf32>
    %48 = tpu.matmul %45, %47, %cst_30 {dimension_numbers = #tpu.dot_dimension_numbers<[1], [0], [0], [1], [0, 0, 1, 1], [], []>} : vector<128x128xf32>, vector<128x128xf32>, vector<128x128xf32> -> vector<128x128xf32>
    %c3_31 = arith.constant 3 : index
    %c0_32 = arith.constant 0 : index
    %c0_33 = arith.constant 0 : index
    %49 = vector.load %arg3[%c3_31, %c0_32, %c0_33] : memref<6x1x128xf32, #tpu.memory_space<vmem>>, vector<1x1x128xf32>
    %50 = vector.shape_cast %49 : vector<1x1x128xf32> to vector<1x128xf32>
    %51 = vector.broadcast %50 : vector<1x128xf32> to vector<128x128xf32>
    %52 = arith.addf %48, %51 : vector<128x128xf32>
    %cst_34 = arith.constant 5.000000e-01 : f32
    %53 = vector.broadcast %cst_34 : f32 to vector<128x128xf32>
    %54 = arith.mulf %53, %52 : vector<128x128xf32>
    %cst_35 = arith.constant 0.707106769 : f32
    %55 = vector.broadcast %cst_35 : f32 to vector<128x128xf32>
    %56 = arith.mulf %52, %55 : vector<128x128xf32>
    %57 = math.erf %56 : vector<128x128xf32>
    %cst_36 = arith.constant 1.000000e+00 : f32
    %58 = vector.broadcast %cst_36 : f32 to vector<128x128xf32>
    %59 = arith.addf %58, %57 : vector<128x128xf32>
    %60 = arith.mulf %54, %59 : vector<128x128xf32>
    %c4 = arith.constant 4 : index
    %c0_37 = arith.constant 0 : index
    %c0_38 = arith.constant 0 : index
    %61 = vector.load %arg2[%c4, %c0_37, %c0_38] : memref<6x128x128xf32, #tpu.memory_space<vmem>>, vector<1x128x128xf32>
    %62 = vector.shape_cast %61 : vector<1x128x128xf32> to vector<128x128xf32>
    %cst_39 = arith.constant dense<0.000000e+00> : vector<128x128xf32>
    %63 = tpu.matmul %60, %62, %cst_39 {dimension_numbers = #tpu.dot_dimension_numbers<[1], [0], [0], [1], [0, 0, 1, 1], [], []>} : vector<128x128xf32>, vector<128x128xf32>, vector<128x128xf32> -> vector<128x128xf32>
    %c4_40 = arith.constant 4 : index
    %c0_41 = arith.constant 0 : index
    %c0_42 = arith.constant 0 : index
    %64 = vector.load %arg3[%c4_40, %c0_41, %c0_42] : memref<6x1x128xf32, #tpu.memory_space<vmem>>, vector<1x1x128xf32>
    %65 = vector.shape_cast %64 : vector<1x1x128xf32> to vector<1x128xf32>
    %66 = vector.broadcast %65 : vector<1x128xf32> to vector<128x128xf32>
    %67 = arith.addf %63, %66 : vector<128x128xf32>
    %cst_43 = arith.constant 5.000000e-01 : f32
    %68 = vector.broadcast %cst_43 : f32 to vector<128x128xf32>
    %69 = arith.mulf %68, %67 : vector<128x128xf32>
    %cst_44 = arith.constant 0.707106769 : f32
    %70 = vector.broadcast %cst_44 : f32 to vector<128x128xf32>
    %71 = arith.mulf %67, %70 : vector<128x128xf32>
    %72 = math.erf %71 : vector<128x128xf32>
    %cst_45 = arith.constant 1.000000e+00 : f32
    %73 = vector.broadcast %cst_45 : f32 to vector<128x128xf32>
    %74 = arith.addf %73, %72 : vector<128x128xf32>
    %75 = arith.mulf %69, %74 : vector<128x128xf32>
    %c5 = arith.constant 5 : index
    %c0_46 = arith.constant 0 : index
    %c0_47 = arith.constant 0 : index
    %76 = vector.load %arg2[%c5, %c0_46, %c0_47] : memref<6x128x128xf32, #tpu.memory_space<vmem>>, vector<1x128x128xf32>
    %77 = vector.shape_cast %76 : vector<1x128x128xf32> to vector<128x128xf32>
    %cst_48 = arith.constant dense<0.000000e+00> : vector<128x128xf32>
    %78 = tpu.matmul %75, %77, %cst_48 {dimension_numbers = #tpu.dot_dimension_numbers<[1], [0], [0], [1], [0, 0, 1, 1], [], []>} : vector<128x128xf32>, vector<128x128xf32>, vector<128x128xf32> -> vector<128x128xf32>
    %c5_49 = arith.constant 5 : index
    %c0_50 = arith.constant 0 : index
    %c0_51 = arith.constant 0 : index
    %79 = vector.load %arg3[%c5_49, %c0_50, %c0_51] : memref<6x1x128xf32, #tpu.memory_space<vmem>>, vector<1x1x128xf32>
    %80 = vector.shape_cast %79 : vector<1x1x128xf32> to vector<1x128xf32>
    %81 = vector.broadcast %80 : vector<1x128xf32> to vector<128x128xf32>
    %82 = arith.addf %78, %81 : vector<128x128xf32>
    %c0_52 = arith.constant 0 : index
    %c0_53 = arith.constant 0 : index
    %83 = vector.load %arg4[%c0_52, %c0_53] : memref<128x128xf32, #tpu.memory_space<vmem>>, vector<128x128xf32>
    tpu.vector_store %arg4[%c0_52, %c0_53], %82 {strides = array<i32>} : memref<128x128xf32, #tpu.memory_space<vmem>>, vector<128x128xf32>,
    return
  }
  func.func @transform_0(%arg0: i32) -> (i32, i32) {
    %c0_i32 = arith.constant 0 : i32
    %c0_i32_0 = arith.constant 0 : i32
    return %arg0, %c0_i32 : i32, i32
  }
  func.func @transform_1(%arg0: i32) -> (i32, i32, i32) {
    %c0_i32 = arith.constant 0 : i32
    %c0_i32_0 = arith.constant 0 : i32
    %c0_i32_1 = arith.constant 0 : i32
    %c0_i32_2 = arith.constant 0 : i32
    return %c0_i32, %c0_i32_0, %c0_i32_1 : i32, i32, i32
  }
  func.func @transform_2(%arg0: i32) -> (i32, i32, i32) {
    %c0_i32 = arith.constant 0 : i32
    %c0_i32_0 = arith.constant 0 : i32
    %c0_i32_1 = arith.constant 0 : i32
    %c0_i32_2 = arith.constant 0 : i32
    return %c0_i32, %c0_i32_0, %c0_i32_1 : i32, i32, i32
  }
  func.func @transform_3(%arg0: i32) -> (i32, i32) {
    %c0_i32 = arith.constant 0 : i32
    %c0_i32_0 = arith.constant 0 : i32
    return %arg0, %c0_i32 : i32, i32
  }
}

</mosaic_0001>

<bundles_post_ra>
// kernel: tpu_custom_call.1
= control target key start
LH: loop header
LB: loop body
LE: loop exit
PB: predicated region body
PF: predicated region fallthrough
CT: control target
= control target key end

     0   :  { %8 = vsyncpa [#allocation3], 0  ;;  %s7904_s0 = inlined_call_operand.hbm [shape: f32[256,128], index: 0, kind: input, shape index: {}]   ;;  %s7905_s1 = inlined_call_operand.hbm [shape: f32[6,128,128], index: 1, kind: input, shape index: {}]   ;;  %s7906_s2 = inlined_call_operand.hbm [shape: f32[6,1,128], index: 2, kind: input, shape index: {}]   ;;  %s7907_s3 = inlined_call_operand.hbm [shape: f32[256,128], index: 3, kind: output, shape index: {}]  }
   0x1   :  { %10 = vsyncpa [#allocation3 + $0x1], 0 }
   0x2   :  { %11 = vsyncpa [#allocation6], 0 }
   0x3   :  { %12 = vsyncpa [#allocation4], 0 }
   0x4   :  { %14 = vsyncpa [#allocation4 + $0x1], 0  ;;  %s4970_s12 = smov 0   ;;  %s4972_s13 = smov 0  }
   0x5   :  { %s4974_s14 = smov 0   ;;  %s4976_s15 = smov 0  }
   0x6 LB: > { %s4991_s16 = sadd.s32 4294967295, %s4940_s15   ;;  %s4406_s17 = sadd.s32 4294967294, %s4940_s15   ;;  %s4940_s15 = sphi %s4976_s15, %s7994_s15   ;;  %s4936_s14 = sphi %s4974_s14, %s7993_s14   ;;  %s4932_s13 = sphi %s4972_s13, %s7992_s13   ;;  %s4928_s12 = sphi %s4970_s12, %s7991_s12  }
   0x7   : > { %p40_p0 = scmp.ne.s32.totalorder %s4932_s13, %s4928_s12  ;;  %p41_p1 = scmp.eq.s32.totalorder %s4991_s16, 0 }
   0x8   : > { %p106_p2 = scmp.eq.s32.totalorder %s4991_s16, 1  ;;  %p112_p3 = scmp.eq.s32.totalorder %s4406_s17, 1 }
   0x9   : > { %p5000_p4 = por %p41_p1, %p40_p0  ;;  %p4407_p5 = scmp.ge.s32.totalorder %s4940_s15, 1 }
   0xa   : > { %p5005_p6 = por %p112_p3, %p40_p0  ;;  %p119_p7 = scmp.lt.s32.totalorder %s4940_s15, 3 }
   0xb   : > { %s130_s22 = sshll.u32 %s7905_s1, 4  ;;  %s4942_s24 = smov [#allocation5]   ;;  %s131_s22 = int_to_ptr.hbm [resolvable:$true] %s130_s22 }
   0xc   : > { %p5013_p8 = pnand %p4407_p5, %p119_p7  ;;  %s132_s25 = sshll.u32 %s4942_s24, 4  ;;  %s133_s25 = int_to_ptr.vmem [resolvable:$true] %s132_s25 }
   0xd   : > { %s144_s28 = sshll.u32 %s7906_s2, 4  ;;  %s4943_s29 = smov 128   ;;  %s145_s28 = int_to_ptr.hbm [resolvable:$true] %s144_s28 }
   0xe   : > { %p4550_p9 = pneg %p5013_p8  ;;  %s4944_s30 = smov 8  }
   0xf   : > { %s4945_s4 = smov [#allocation7]   ;;  %s4946_s6 = smov 16  }
  0x10   : > { %p4551_p10 = pnand %p4550_p9, %p41_p1  ;;  %s146_s5 = sshll.u32 %s4945_s4, 4  ;;  %s147_s5 = int_to_ptr.vmem [resolvable:$true] %s146_s5 }
  0x11   : > { %s4947_s7 = smov 1   ;;  %s5029_s8 = sadd.s32 1, %s4940_s15  }
  0x12   : > { %4553 = dma.hbm_to_vmem [thread:$0]  (!%p4551_p10), %s131_s22, 12288, %s133_s25, [#allocation6], %s4943_s29, %s4943_s29, %s4944_s30  }
  0x13   : > { %4556 = dma.hbm_to_vmem [thread:$0]  (!%p4551_p10), %s145_s28, 96, %s147_s5, [#allocation6], %s4946_s6, %s4946_s6, %s4947_s7  }
  0x14   : > { %s24_s9 = ssub.s32 %s4940_s15, %s5029_s8  ;;  %s27_s10 = sadd.s32 1, %s4936_s14 }
  0x15   : > { %p25_p12 = scmp.eq.s32.totalorder %s24_s9, 0  ;;  %p34_p13 = scmp.ne.s32.totalorder %s4936_s14, %s4932_s13 }
  0x16   : > { %p35_p0 = scmp.eq.s32.totalorder %s4940_s15, 0  ;;  %p4567_p7 = scmp.lt.s32.totalorder %s4940_s15, 2 }
  0x17   : > { %s5038_s11 = scalar_select %p25_p12, %s4936_s14, %s27_s10  }
  0x18   : > { %p36_p3 = por %p35_p0, %p34_p13  ;;  %p5042_p5 = por %p106_p2, %p34_p13 }
  0x19   : > { %s160_s20 = sand.u32 1, %s4936_s14   ;;  %s4504_s22 = sshll.u32 %s4940_s15, 7 }
  0x1a   : > { %s4411_s21 = sshll.u32 %s160_s20, 7  ;;  %s169_s26 = scalar_lea.hbm %s7904_s0, %s4504_s22 }
  0x1b   : > { %s164_s27 = scalar_lea.vmem [#allocation2], %s4411_s21  ;;  %s170_s4 = sshll.u32 %s169_s26, 4  ;;  %s171_s4 = int_to_ptr.hbm [resolvable:$true] %s170_s4 }
  0x1c   : > { %s172_s28 = sshll.u32 %s164_s27, 4  ;;  %p5052_p9 = pnand %p4567_p7, %p36_p3  ;;  %s173_s28 = int_to_ptr.vmem [resolvable:$true] %s172_s28 }
  0x1d   : > { %s161_s6 = scalar_lea.sflag [#allocation3], %s160_s20  ;;  %s4840_s7 = sshra.s32 %s171_s4, 4  ;;  %s4841_s7 = int_to_ptr.hbm [resolvable:$true] %s4840_s7 }
  0x1e   : > { %s4842_s9 = scalar_lea.hbm %s4841_s7, 128  ;;  %p4844_p10 = pneg %p5052_p9 }
  0x1f   : > { %p4843_p2 = scmp.ne.s32.totalorder %s4841_s7, %s4842_s9  ;;  %s4847_s22 = scalar_lea.hbm %s7904_s0, 256 }
  0x20   : > { %p4848_p0 = scmp.lt.s32.totalorder %s4841_s7, %s7904_s0  ;;  %p4849_p3 = scmp.lt.s32.totalorder %s4847_s22, %s4842_s9 }
  0x21   : > { %p4845_p12 = pnand %p4844_p10, %p4843_p2 }
  0x22   : > { %p4850_p7 = por %p4849_p3, %p4848_p0 }
  0x23   : > { %p4846_p13 = pneg %p4845_p12 }
  0x25   : > { %p4851_p11 = pnand %p4850_p7, %p4846_p13 }
  0x27   : > { %4854 = shalt.err (!%p4851_p11)
}
  0x28   : > { %4560 = dma.hbm_to_vmem [thread:$0]  (!%p5052_p9), %s171_s4, 2048, %s173_s28, %s161_s6, %s4943_s29, %s4943_s29, %s4944_s30  }
  0x29   : > { %184 = sbr.rel (%p5013_p8) target bundleno = 1387 (0x56b), region = 32 }
  0x2e   : > { %s5072_s20 = sand.u32 1, %s4932_s13  }
  0x2f   : > { %s4415_s26 = sshll.u32 %s5072_s20, 7  ;;  %s187_s27 = scalar_lea.sflag [#allocation3], %s5072_s20 }
  0x30   : > { %s5078_s7 = scalar_lea.vmem [#allocation2], %s4415_s26 }
  0x31   : > { %4915 = dma.done.wait (%p5000_p4), %s187_s27, 2048  }
  0x32   : > { %4917 = vsyncadd (%p5000_p4), %s187_s27, 4294965248 }
  0x33   : > { %4919 = dma.done.wait (%p41_p1), [#allocation6], 12384  }
  0x34   : > { %4921 = vsyncadd (%p41_p1), [#allocation6], 4294954912  ;;  %v257_v0 = vld [vmem:[#allocation5 + $0x78] sm:$0xff]  ;;  %v256_v1 = vld [vmem:[#allocation5 + $0x70] sm:$0xff]  ;;  %s7821_s18 = scalar_lea.vmem [#allocation8], %s4415_s26  ;;  %s4505_s23 = sshll.u32 %s4991_s16, 7 }
  0x35   : > { %262 = vmatpush.msra.mxu0 %v257_v0  ;;  %4506 = vmatpush.msra.mxu2 %v257_v0  ;;  %v255_v2 = vld [vmem:[#allocation5 + $0x68] sm:$0xff]  ;;  %v254_v3 = vld [vmem:[#allocation5 + $0x60] sm:$0xff]  ;;  %v253_v4 = vld [vmem:[#allocation5 + $0x58] sm:$0xff]  ;;  %s4310_s28 = scalar_lea.hbm %s7907_s3, %s4505_s23  ;;  %s4311_s4 = sshll.u32 %s7821_s18, 4  ;;  %s4312_s4 = int_to_ptr.vmem [resolvable:$true] %s4311_s4 }
  0x36   : > { %v252_v5 = vld [vmem:[#allocation5 + $0x50] sm:$0xff]  ;;  %v251_v6 = vld [vmem:[#allocation5 + $0x48] sm:$0xff]  ;;  %v250_v7 = vld [vmem:[#allocation5 + $0x40] sm:$0xff]  ;;  %s4313_s5 = sshll.u32 %s4310_s28, 4  ;;  %s4299_s6 = scalar_lea.sflag [#allocation4], %s5072_s20  ;;  %s4314_s5 = int_to_ptr.hbm [resolvable:$true] %s4313_s5 }
  0x37   : > { %263 = vmatpush.msra.mxu0 %v256_v1  ;;  %4507 = vmatpush.msra.mxu2 %v256_v1  ;;  %v249_v8 = vld [vmem:[#allocation5 + $0x38] sm:$0xff]  ;;  %v248_v9 = vld [vmem:[#allocation5 + $0x30] sm:$0xff]  ;;  %v247_v10 = vld [vmem:[#allocation5 + $0x28] sm:$0xff]  ;;  %s4884_s9 = sshra.s32 %s4314_s5, 4  ;;  %s4890_s22 = scalar_lea.hbm %s7907_s3, 256  ;;  %s4885_s9 = int_to_ptr.hbm [resolvable:$true] %s4884_s9 }
  0x38   : > { %v246_v11 = vld [vmem:[#allocation5 + $0x20] sm:$0xff]  ;;  %v245_v12 = vld [vmem:[#allocation5 + $0x18] sm:$0xff]  ;;  %v244_v13 = vld [vmem:[#allocation5 + $0x10] sm:$0xff]  ;;  %s4886_s16 = scalar_lea.hbm %s4885_s9, 128  ;;  %p4891_p11 = scmp.lt.s32.totalorder %s4885_s9, %s7907_s3 }
  0x39   : > { %264 = vmatpush.msra.mxu0 %v255_v2  ;;  %4508 = vmatpush.msra.mxu2 %v255_v2  ;;  %v243_v14 = vld [vmem:[#allocation5 + $0x8] sm:$0xff]  ;;  %v242_v15 = vld [vmem:[#allocation5] sm:$0xff]  ;;  %v228_v20 = vld [vmem:[%s5078_s7 + $0x10] sm:$0xff]  ;;  %p4887_p1 = scmp.ne.s32.totalorder %s4885_s9, %s4886_s16  ;;  %p4892_p9 = scmp.lt.s32.totalorder %s4890_s22, %s4886_s16 }
  0x3a   : > { %v226_v16 = vld [vmem:[%s5078_s7] sm:$0xff]  ;;  %v227_v18 = vld [vmem:[%s5078_s7 + $0x8] sm:$0xff]  ;;  %v236_v21 = vld [vmem:[%s5078_s7 + $0x50] sm:$0xff] }
  0x3b   : > { %265 = vmatpush.msra.mxu0 %v254_v3  ;;  %4509 = vmatpush.msra.mxu2 %v254_v3  ;;  %v234_v17 = vld [vmem:[%s5078_s7 + $0x40] sm:$0xff]  ;;  %v235_v19 = vld [vmem:[%s5078_s7 + $0x48] sm:$0xff]  ;;  %v229_v22 = vld [vmem:[%s5078_s7 + $0x18] sm:$0xff]  ;;  %p4888_p4 = pnand %p4887_p1, %p5042_p5  ;;  %p4893_p2 = por %p4892_p9, %p4891_p11 }
  0x3c   : > { %v237_v23 = vld [vmem:[%s5078_s7 + $0x58] sm:$0xff]  ;;  %v230_v24 = vld [vmem:[%s5078_s7 + $0x20] sm:$0xff]  ;;  %v231_v26 = vld [vmem:[%s5078_s7 + $0x28] sm:$0xff] }
  0x3d   : > { %266 = vmatpush.msra.mxu0 %v253_v4  ;;  %4510 = vmatpush.msra.mxu2 %v253_v4  ;;  %v238_v25 = vld [vmem:[%s5078_s7 + $0x60] sm:$0xff]  ;;  %v239_v27 = vld [vmem:[%s5078_s7 + $0x68] sm:$0xff]  ;;  %v232_v28 = vld [vmem:[%s5078_s7 + $0x30] sm:$0xff]  ;;  %p4889_p8 = pneg %p4888_p4 }
  0x3e   : > { %v240_v29 = vld [vmem:[%s5078_s7 + $0x70] sm:$0xff]  ;;  %v233_v30 = vld [vmem:[%s5078_s7 + $0x38] sm:$0xff]  ;;  %v1045_v34 = vld [vmem:[#allocation5 + $0xe8] sm:$0xff] }
  0x3f   : > { %267 = vmatpush.msra.mxu0 %v252_v5  ;;  %4511 = vmatpush.msra.mxu2 %v252_v5  ;;  %v241_v31 = vld [vmem:[%s5078_s7 + $0x78] sm:$0xff]  ;;  %v1046_v33 = vld [vmem:[#allocation5 + $0xf0] sm:$0xff]  ;;  %v5104_v35 = vld [vmem:[#allocation7] ss:$0 sm:$0xff]  ;;  %p4894_p10 = pnand %p4893_p2, %p4889_p8 }
  0x40   : > { %v1047_v32 = vld [vmem:[#allocation5 + $0xf8] sm:$0xff]  ;;  %v1044_v36 = vld [vmem:[#allocation5 + $0xe0] sm:$0xff]  ;;  %v1042_v40 = vld [vmem:[#allocation5 + $0xd0] sm:$0xff] }
  0x41   : > { %268 = vmatpush.msra.mxu0 %v251_v6  ;;  %4512 = vmatpush.msra.mxu2 %v251_v6  ;;  %v1043_v38 = vld [vmem:[#allocation5 + $0xd8] sm:$0xff]  ;;  %v1041_v42 = vld [vmem:[#allocation5 + $0xc8] sm:$0xff]  ;;  %v1040_v45 = vld [vmem:[#allocation5 + $0xc0] sm:$0xff] }
  0x42   : > { %1053 = vmatpush.msra.mxu1 %v1047_v32  ;;  %4522 = vmatpush.msra.mxu3 %v1047_v32  ;;  %v1039_v49 = vld [vmem:[#allocation5 + $0xb8] sm:$0xff]  ;;  %v1038_v56 = vld [vmem:[#allocation5 + $0xb0] sm:$0xff]  ;;  %v1037_v61 = vld [vmem:[#allocation5 + $0xa8] sm:$0xff] }
  0x43   : > { %269 = vmatpush.msra.mxu0 %v250_v7  ;;  %4513 = vmatpush.msra.mxu2 %v250_v7  ;;  %v1036_v3 = vld [vmem:[#allocation5 + $0xa0] sm:$0xff] }
  0x44   : > { %1054 = vmatpush.msra.mxu1 %v1046_v33  ;;  %4523 = vmatpush.msra.mxu3 %v1046_v33 }
  0x45   : > { %270 = vmatpush.msra.mxu0 %v249_v8  ;;  %4514 = vmatpush.msra.mxu2 %v249_v8 }
  0x46   : > { %1055 = vmatpush.msra.mxu1 %v1045_v34  ;;  %4524 = vmatpush.msra.mxu3 %v1045_v34 }
  0x47   : > { %271 = vmatpush.msra.mxu0 %v248_v9  ;;  %4515 = vmatpush.msra.mxu2 %v248_v9  ;;  %v1035_v9 = vld [vmem:[#allocation5 + $0x98] sm:$0xff] }
  0x48   : > { %1056 = vmatpush.msra.mxu1 %v1044_v36  ;;  %4525 = vmatpush.msra.mxu3 %v1044_v36 }
  0x49   : > { %272 = vmatpush.msra.mxu0 %v247_v10  ;;  %4516 = vmatpush.msra.mxu2 %v247_v10 }
  0x4a   : > { %1057 = vmatpush.msra.mxu1 %v1043_v38  ;;  %4526 = vmatpush.msra.mxu3 %v1043_v38 }
  0x4b   : > { %273 = vmatpush.msra.mxu0 %v246_v11  ;;  %4517 = vmatpush.msra.mxu2 %v246_v11 }
  0x4c   : > { %1058 = vmatpush.msra.mxu1 %v1042_v40  ;;  %4527 = vmatpush.msra.mxu3 %v1042_v40 }
  0x4d   : > { %274 = vmatpush.msra.mxu0 %v245_v12  ;;  %4518 = vmatpush.msra.mxu2 %v245_v12 }
  0x4e   : > { %1059 = vmatpush.msra.mxu1 %v1041_v42  ;;  %4528 = vmatpush.msra.mxu3 %v1041_v42 }
  0x4f   : > { %275 = vmatpush.msra.mxu0 %v244_v13  ;;  %4519 = vmatpush.msra.mxu2 %v244_v13 }
  0x50   : > { %1060 = vmatpush.msra.mxu1 %v1040_v45  ;;  %4529 = vmatpush.msra.mxu3 %v1040_v45 }
  0x51   : > { %276 = vmatpush.msra.mxu0 %v243_v14  ;;  %4520 = vmatpush.msra.mxu2 %v243_v14  ;;  %v1034_v14 = vld [vmem:[#allocation5 + $0x90] sm:$0xff] }
  0x52   : > { %1061 = vmatpush.msra.mxu1 %v1039_v49  ;;  %4530 = vmatpush.msra.mxu3 %v1039_v49 }
  0x53   : > { %277 = vmatpush.msra.mxu0 %v242_v15  ;;  %4521 = vmatpush.msra.mxu2 %v242_v15 }
  0x54   : > { %278 = vmatmul.f32.vlgmr.msra.gmra.mxu0 %v226_v16  ;;  %302 = vmatmul.f32.vlgmr.msra.gmra.mxu2 %v234_v17 }
  0x55   : > { %1062 = vmatpush.msra.mxu1 %v1038_v56  ;;  %4531 = vmatpush.msra.mxu3 %v1038_v56 }
  0x57   : > { %1063 = vmatpush.msra.mxu1 %v1037_v61  ;;  %4532 = vmatpush.msra.mxu3 %v1037_v61 }
  0x59   : > { %1064 = vmatpush.msra.mxu1 %v1036_v3  ;;  %4533 = vmatpush.msra.mxu3 %v1036_v3 }
  0x5b   : > { %1065 = vmatpush.msra.mxu1 %v1035_v9  ;;  %4534 = vmatpush.msra.mxu3 %v1035_v9 }
  0x5c   : > { %281 = vmatmul.f32.gmra.mxu0 %v227_v18  ;;  %305 = vmatmul.f32.gmra.mxu2 %v235_v19  ;;  %v1033_v19 = vld [vmem:[#allocation5 + $0x88] sm:$0xff] }
  0x5d   : > { %1066 = vmatpush.msra.mxu1 %v1034_v14  ;;  %4535 = vmatpush.msra.mxu3 %v1034_v14 }
  0x5f   : > { %1067 = vmatpush.msra.mxu1 %v1033_v19  ;;  %4536 = vmatpush.msra.mxu3 %v1033_v19 }
  0x64   : > { %284 = vmatmul.f32.gmra.mxu0 %v228_v20  ;;  %308 = vmatmul.f32.gmra.mxu2 %v236_v21 }
  0x6c   : > { %287 = vmatmul.f32.gmra.mxu0 %v229_v22  ;;  %311 = vmatmul.f32.gmra.mxu2 %v237_v23 }
  0x74   : > { %290 = vmatmul.f32.gmra.mxu0 %v230_v24  ;;  %314 = vmatmul.f32.gmra.mxu2 %v238_v25 }
  0x7c   : > { %293 = vmatmul.f32.gmra.mxu0 %v231_v26  ;;  %317 = vmatmul.f32.gmra.mxu2 %v239_v27  ;;  %v1032_v26 = vld [vmem:[#allocation5 + $0x80] sm:$0xff] }
  0x7d   : > { %1068 = vmatpush.msra.mxu1 %v1032_v26  ;;  %4537 = vmatpush.msra.mxu3 %v1032_v26 }
  0x84   : > { %296 = vmatmul.f32.gmra.mxu0 %v232_v28  ;;  %320 = vmatmul.f32.gmra.mxu2 %v240_v29 }
  0x8c   : > { %299 = vmatmul.f32.gmra.mxu0 %v233_v30  ;;  %323 = vmatmul.f32.gmra.mxu2 %v241_v31 }
  0xd1   : > { %v279_v37 = vpop.f32.mrf.mxu0 }
  0xd2   : > { %v5107_v39 = vadd.f32 %v5104_v35, %v279_v37 }
  0xd4   : > { %v5110_v41 = vmul.f32 0.70710677, %v5107_v39  ;;  %v5209_v14 = vmul.f32 0.5, %v5107_v39 }
  0xd6   : > { %v359_v43 = vmul.f32 %v5110_v41, %v5110_v41 }
  0xd7   : > { %v303_v44 = vpop.f32.mrf.mxu2 }
  0xd8   : > { %v5114_v46 = vmin.f32 %v359_v43, 16.0  ;;  %v5117_v47 = vadd.f32 %v5104_v35, %v303_v44 }
  0xd9   : > { %v282_v48 = vpop.f32.mrf.mxu0 }
  0xda   : > { %v361_v50 = vmul.f32 2.1237322e-06, %v5114_v46  ;;  %v5121_v51 = vmul.f32 0.70710677, %v5117_v47  ;;  %v5124_v52 = vadd.f32 %v5104_v35, %v282_v48  ;;  %v372_v53 = vmul.f32 3.8918573e-05, %v5114_v46 }
  0xdc   : > { %v679_v54 = vmul.f32 %v5121_v51, %v5121_v51  ;;  %v5130_v55 = vmul.f32 0.70710677, %v5124_v52  ;;  %v362_v57 = vadd.f32 0.00028619796, %v361_v50  ;;  %v373_v58 = vadd.f32 0.001143296, %v372_v53 }
  0xde   : > { %v5132_v59 = vmin.f32 %v679_v54, 16.0  ;;  %v399_v60 = vmul.f32 %v5130_v55, %v5130_v55  ;;  %v374_v63 = vmul.f32 %v373_v58, %v5114_v46  ;;  %v363_v4 = vmul.f32 %v362_v57, %v5114_v46 }
  0xdf   : > { %v306_v62 = vpop.f32.mrf.mxu2 }
  0xe0   : > { %v681_v0 = vmul.f32 2.1237322e-06, %v5132_v59  ;;  %v5138_v1 = vmin.f32 %v399_v60, 16.0  ;;  %v5141_v2 = vadd.f32 %v5104_v35, %v306_v62  ;;  %v375_v6 = vadd.f32 0.014752088, %v374_v63 }
  0xe1   : > { %v285_v5 = vpop.f32.mrf.mxu0  ;;  %v364_v15 = vadd.f32 0.0036580483, %v363_v4 }
  0xe2   : > { %v682_v7 = vadd.f32 0.00028619796, %v681_v0  ;;  %v401_v8 = vmul.f32 2.1237322e-06, %v5138_v1  ;;  %v5146_v10 = vmul.f32 0.70710677, %v5141_v2  ;;  %v5149_v11 = vadd.f32 %v5104_v35, %v285_v5 }
  0xe3   : > { %v376_v12 = vmul.f32 %v375_v6, %v5114_v46  ;;  %v365_v27 = vmul.f32 %v364_v15, %v5114_v46 }
  0xe4   : > { %v402_v13 = vadd.f32 0.00028619796, %v401_v8  ;;  %v719_v16 = vmul.f32 %v5146_v10, %v5146_v10  ;;  %v5155_v17 = vmul.f32 0.70710677, %v5149_v11  ;;  %v683_v18 = vmul.f32 %v682_v7, %v5132_v59 }
  0xe5   : > { %v377_v20 = vadd.f32 0.112945676, %v376_v12  ;;  %v366_v40 = vadd.f32 0.05243302, %v365_v27 }
  0xe6   : > { %v403_v21 = vmul.f32 %v402_v13, %v5138_v1  ;;  %v5159_v22 = vmin.f32 %v719_v16, 16.0  ;;  %v439_v23 = vmul.f32 %v5155_v17, %v5155_v17  ;;  %v684_v31 = vadd.f32 0.0036580483, %v683_v18 }
  0xe7   : > { %v309_v24 = vpop.f32.mrf.mxu2  ;;  %v378_v32 = vmul.f32 %v377_v20, %v5114_v46  ;;  %v367_v58 = vmul.f32 %v366_v40, %v5114_v46  ;;  %v5217_v18 = vmul.f32 0.5, %v5117_v47  ;;  %v5231_v47 = vmul.f32 0.5, %v5124_v52 }
  0xe8   : > { %v5164_v25 = vadd.f32 %v5104_v35, %v309_v24  ;;  %v721_v28 = vmul.f32 2.1237322e-06, %v5159_v22  ;;  %v5168_v29 = vmin.f32 %v439_v23, 16.0  ;;  %v404_v33 = vadd.f32 0.0036580483, %v403_v21 }
  0xe9   : > { %v288_v30 = vpop.f32.mrf.mxu0  ;;  %v685_v43 = vmul.f32 %v684_v31, %v5132_v59  ;;  %v379_v45 = vadd.f32 0.4994258, %v378_v32  ;;  %v368_v8 = vadd.f32 0.18741608, %v367_v58  ;;  %v5245_v52 = vmul.f32 0.5, %v5149_v11 }
  0xea   : > { %v722_v34 = vadd.f32 0.00028619796, %v721_v28  ;;  %v5172_v36 = vmul.f32 0.70710677, %v5164_v25  ;;  %v5175_v37 = vadd.f32 %v5104_v35, %v288_v30  ;;  %v441_v38 = vmul.f32 2.1237322e-06, %v5168_v29 }
  0xeb   : > { %v405_v48 = vmul.f32 %v404_v33, %v5138_v1  ;;  %v686_v62 = vadd.f32 0.05243302, %v685_v43  ;;  %v380_v0 = vmul.f32 %v379_v45, %v5114_v46  ;;  %v369_v28 = vmul.f32 %v368_v8, %v5114_v46 }
  0xec   : > { %v759_v42 = vmul.f32 %v5172_v36, %v5172_v36  ;;  %v5182_v44 = vmul.f32 0.70710677, %v5175_v37  ;;  %v723_v49 = vmul.f32 %v722_v34, %v5159_v22  ;;  %v442_v54 = vadd.f32 0.00028619796, %v441_v38 }
  0xed   : > { %v406_v3 = vadd.f32 0.05243302, %v405_v48  ;;  %v5214_v16 = vadd.f32 1.0, %v380_v0  ;;  %v687_v19 = vmul.f32 %v686_v62, %v5132_v59  ;;  %v5263_v0 = vmul.f32 0.5, %v5164_v25 }
  0xee   : > { %v5186_v50 = vmin.f32 %v759_v42, 16.0  ;;  %v479_v56 = vmul.f32 %v5182_v44, %v5182_v44  ;;  %v724_v4 = vadd.f32 0.0036580483, %v723_v49  ;;  %v443_v6 = vmul.f32 %v442_v54, %v5168_v29 }
  0xef   : > { %v312_v53 = vpop.f32.mrf.mxu2  ;;  %v407_v20 = vmul.f32 %v406_v3, %v5138_v1  ;;  %4617 = vrcp.f32 %v5214_v16  ;;  %v688_v40 = vadd.f32 0.18741608, %v687_v19  ;;  %v5242_v42 = vmul.f32 0.5, %v5141_v2 }
  0xf0   : > { %v5191_v57 = vadd.f32 %v5104_v35, %v312_v53  ;;  %v761_v60 = vmul.f32 2.1237322e-06, %v5186_v50  ;;  %v5195_v63 = vmin.f32 %v479_v56, 16.0  ;;  %v725_v21 = vmul.f32 %v724_v4, %v5159_v22 }
  0xf1   : > { %v291_v61 = vpop.f32.mrf.mxu0  ;;  %v444_v24 = vadd.f32 0.0036580483, %v443_v6  ;;  %v408_v43 = vadd.f32 0.18741608, %v407_v20  ;;  %v5255_v56 = vmul.f32 3.8918573e-05, %v5132_v59  ;;  %vm387_vm1 = vweird.f32 %v5214_v16 }
  0xf2   : > { %v5199_v5 = vmul.f32 0.70710677, %v5191_v57  ;;  %v5203_v7 = vadd.f32 %v5104_v35, %v291_v61  ;;  %v762_v9 = vadd.f32 0.00028619796, %v761_v60  ;;  %v481_v12 = vmul.f32 2.1237322e-06, %v5195_v63 }
  0xf3   : > { %v726_v46 = vadd.f32 0.05243302, %v725_v21  ;;  %v445_v45 = vmul.f32 %v444_v24, %v5168_v29  ;;  %v370_v2 = vadd.f32 1.1283791, %v369_v28  ;;  %v689_v61 = vmul.f32 %v688_v40, %v5132_v59 }
  0xf4   : > { %v799_v13 = vmul.f32 %v5199_v5, %v5199_v5  ;;  %v5212_v15 = vmul.f32 0.70710677, %v5203_v7  ;;  %v763_v30 = vmul.f32 %v762_v9, %v5186_v50  ;;  %v482_v31 = vadd.f32 0.00028619796, %v481_v12 }
  0xf5   : > { %v727_v62 = vmul.f32 %v726_v46, %v5159_v22  ;;  %v5268_v6 = vpop.eup %4617  ;;  %v409_v8 = vmul.f32 %v408_v43, %v5138_v1  ;;  %v446_v9 = vadd.f32 0.05243302, %v445_v45  ;;  %v5277_v20 = vmul.f32 0.5, %v5175_v37 }
  0xf6   : > { %v5222_v26 = vmin.f32 %v799_v13, 16.0  ;;  %v519_v39 = vmul.f32 %v5212_v15, %v5212_v15  ;;  %v764_v53 = vadd.f32 0.0036580483, %v763_v30  ;;  %v483_v58 = vmul.f32 %v482_v31, %v5195_v63 }
  0xf7   : > { %v315_v23 = vpop.f32.mrf.mxu2  ;;  %v5282_v24 = vmul.f32 %v370_v2, %v5110_v41  ;;  %v728_v31 = vadd.f32 0.18741608, %v727_v62  ;;  %v383_v37 = vmul.f32 %v5268_v6, %v5214_v16  ;;  %v690_v40 = vadd.f32 1.1283791, %v689_v61 }
  0xf8   : > { %v5227_v27 = vadd.f32 %v5104_v35, %v315_v23  ;;  %v801_v33 = vmul.f32 2.1237322e-06, %v5222_v26  ;;  %v5235_v34 = vmin.f32 %v519_v39, 16.0  ;;  %v765_v19 = vmul.f32 %v764_v53, %v5186_v50 }
  0xf9   : > { %v294_v32 = vpop.f32.mrf.mxu0  ;;  %v484_v39 = vadd.f32 0.0036580483, %v483_v58  ;;  %v410_v46 = vadd.f32 1.1283791, %v409_v8  ;;  %v447_v43 = vmul.f32 %v446_v9, %v5168_v29  ;;  %v729_v62 = vmul.f32 %v728_v31, %v5159_v22 }
  0xfa   : > { %v5238_v38 = vmul.f32 0.70710677, %v5227_v27  ;;  %v5251_v49 = vadd.f32 %v5104_v35, %v294_v32  ;;  %v521_v54 = vmul.f32 2.1237322e-06, %v5235_v34  ;;  %v802_v11 = vadd.f32 0.00028619796, %v801_v33 }
  0xfb   : > { %v766_v45 = vadd.f32 0.05243302, %v765_v19  ;;  %v485_v2 = vmul.f32 %v484_v39, %v5195_v63  ;;  %v384_v9 = vsub.f32 1.0, %v383_v37  ;;  %v5313_v19 = vmul.f32 %v410_v46, %v5130_v55 }
  0xfc   : > { %v839_v48 = vmul.f32 %v5238_v38, %v5238_v38  ;;  %v5266_v3 = vmul.f32 0.70710677, %v5251_v49  ;;  %v522_v25 = vadd.f32 0.00028619796, %v521_v54  ;;  %v803_v28 = vmul.f32 %v802_v11, %v5222_v26 }
  0xfd   : > { %v767_v31 = vmul.f32 %v766_v45, %v5186_v50  ;;  %v486_v37 = vadd.f32 0.05243302, %v485_v2  ;;  %v730_v55 = vadd.f32 1.1283791, %v729_v62  ;;  %v5334_v45 = vmul.f32 0.5, %v5203_v7 }
  0xfe   : > { %v5258_v60 = vmin.f32 %v839_v48, 16.0  ;;  %v559_v21 = vmul.f32 %v5266_v3, %v5266_v3  ;;  %v5297_v48 = vmul.f32 0.5, %v5191_v57  ;;  %v523_v53 = vmul.f32 %v522_v25, %v5235_v34 }
  0xff   : > { %v318_v4 = vpop.f32.mrf.mxu2  ;;  %v804_v58 = vadd.f32 0.0036580483, %v803_v28  ;;  %v448_v25 = vadd.f32 0.18741608, %v447_v43  ;;  %7921 = vst [vmem:[#allocation15_spill] sm:$0xff] %v5334_v45  ;;  %vm388_vm0 = vweird.f32 %v5268_v6 }
 0x100   : > { %v841_v12 = vmul.f32 2.1237322e-06, %v5258_v60  ;;  %v5273_v13 = vadd.f32 %v5104_v35, %v318_v4  ;;  %v5285_v32 = vmin.f32 %v559_v21, 16.0  ;;  %v768_v62 = vadd.f32 0.18741608, %v767_v31  ;;  %vm5357_vm2 = vmor %vm387_vm1, %vm388_vm0 }
 0x101   : > { %v297_v23 = vpop.f32.mrf.mxu0  ;;  %v805_v46 = vmul.f32 %v804_v58, %v5222_v26 }
 0x102   : > { %v842_v30 = vadd.f32 0.00028619796, %v841_v12  ;;  %v5288_v33 = vadd.f32 %v5104_v35, %v297_v23  ;;  %v5294_v41 = vmul.f32 0.70710677, %v5273_v13  ;;  %v561_v54 = vmul.f32 2.1237322e-06, %v5285_v32 }
 0x103   : > { %v5310_v12 = vmul.f32 %v690_v40, %v5121_v51  ;;  %v524_v23 = vadd.f32 0.0036580483, %v523_v53  ;;  %v385_v53 = vmul.f32 %v5268_v6, %v384_v9  ;;  %v487_v9 = vmul.f32 %v486_v37, %v5195_v63 }
 0x104   : > { %7918 = vst [vmem:[#allocation12_spill] sm:$0xff] %v5288_v33  ;;  %v843_v11 = vmul.f32 %v842_v30, %v5258_v60  ;;  %v879_v61 = vmul.f32 %v5294_v41, %v5294_v41  ;;  %v562_v4 = vadd.f32 0.00028619796, %v561_v54  ;;  %v5307_v8 = vmul.f32 0.70710677, %v5288_v33 }
 0x105   : > { %v449_v54 = vmul.f32 %v448_v25, %v5168_v29  ;;  %v525_v2 = vmul.f32 %v524_v23, %v5235_v34  ;;  %v386_v7 = vadd.f32 %v5268_v6, %v385_v53 }
 0x106   : > { %v5315_v21 = vmin.f32 %v879_v61, 16.0  ;;  %v563_v39 = vmul.f32 %v562_v4, %v5285_v32  ;;  %v599_v28 = vmul.f32 %v5307_v8, %v5307_v8  ;;  %v844_v51 = vadd.f32 0.0036580483, %v843_v11 }
 0x107   : > { %v321_v57 = vpop.f32.mrf.mxu2  ;;  %v5338_v11 = vmul.f32 0.5, %v5227_v27  ;;  %v5349_v23 = vadd.f32 1.1283791, %v449_v54 }
 0x108   : > { %v5321_v30 = vadd.f32 %v5104_v35, %v321_v57  ;;  %v881_v40 = vmul.f32 2.1237322e-06, %v5315_v21  ;;  %v5326_v43 = vmin.f32 %v599_v28, 16.0  ;;  %v564_v61 = vadd.f32 0.0036580483, %v563_v39 }
 0x109   : > { %7922 = vst [vmem:[#allocation16_spill] sm:$0xff] %v5338_v11  ;;  %v845_v25 = vmul.f32 %v844_v51, %v5258_v60  ;;  %v5345_v28 = vmul.f32 %v730_v55, %v5146_v10  ;;  %v300_v37 = vpop.f32.mrf.mxu0  ;;  %v526_v51 = vadd.f32 0.05243302, %v525_v2  ;;  %v391_v10 = vand.u32 2147483647, %v5214_v16 }
 0x10a   : > { %7919 = vst [vmem:[#allocation13_spill] sm:$0xff] %v5321_v30  ;;  %v882_v4 = vadd.f32 0.00028619796, %v881_v40  ;;  %v5331_v57 = vmul.f32 0.70710677, %v5321_v30  ;;  %v565_v27 = vmul.f32 %v564_v61, %v5285_v32  ;;  %v769_v55 = vmul.f32 %v768_v62, %v5186_v50 }
 0x10b   : > { %v601_v58 = vmul.f32 2.1237322e-06, %v5326_v43  ;;  %v806_v40 = vadd.f32 0.05243302, %v805_v46  ;;  %v488_v46 = vadd.f32 0.18741608, %v487_v9  ;;  %v390_v2 = vsel %vm5357_vm2, %v5268_v6, %v386_v7 }
 0x10c   : > { %7920 = vst [vmem:[#allocation14_spill] sm:$0xff] %v5331_v57  ;;  %v883_v39 = vmul.f32 %v882_v4, %v5315_v21  ;;  %v919_v31 = vmul.f32 %v5331_v57, %v5331_v57  ;;  %v846_v53 = vadd.f32 0.05243302, %v845_v25  ;;  %v393_v61 = vand.u32 2147483648, %v5214_v16 }
 0x10d   : > { %v602_v30 = vadd.f32 0.00028619796, %v601_v58  ;;  %v807_v4 = vmul.f32 %v806_v40, %v5222_v26  ;;  %v5367_v58 = vadd.f32 %v5104_v35, %v300_v37  ;;  %v566_v62 = vadd.f32 0.05243302, %v565_v27 }
 0x10e   : > { %v884_v33 = vadd.f32 0.0036580483, %v883_v39  ;;  %v693_v39 = vadd.f32 0.001143296, %v5255_v56  ;;  %v5371_v25 = vmin.f32 %v919_v31, 16.0  ;;  %v394_v57 = vor.u32 1.1754944e-38, %v393_v61 }
 0x10f   : > { %7925 = vst [vmem:[#allocation17_spill] sm:$0xff] %v5367_v58  ;;  %v603_v9 = vmul.f32 %v602_v30, %v5326_v43  ;;  %v527_v11 = vmul.f32 %v526_v51, %v5235_v34  ;;  %vm392_vm3 = vcmp.eq.f32.partialorder %v391_v10, 8.507059e+37  ;;  %v5376_v40 = vmul.f32 0.70710677, %v5367_v58 }
 0x110   : > { %v885_v16 = vmul.f32 %v884_v33, %v5315_v21  ;;  %v847_v6 = vmul.f32 %v846_v53, %v5258_v60  ;;  %v921_v7 = vmul.f32 2.1237322e-06, %v5371_v25  ;;  %v395_v37 = vsel %vm392_vm3, %v394_v57, %v390_v2 }
 0x111   : > { %7926 = vst [vmem:[#allocation18_spill] sm:$0xff] %v5376_v40  ;;  %v694_v56 = vmul.f32 %v693_v39, %v5132_v59  ;;  %v770_v27 = vadd.f32 1.1283791, %v769_v55  ;;  %v808_v30 = vadd.f32 0.18741608, %v807_v4  ;;  %v396_v31 = vmul.f32 %v395_v37, %v5282_v24 }
 0x112   : > { %v639_v51 = vmul.f32 %v5376_v40, %v5376_v40  ;;  %v489_v33 = vmul.f32 %v488_v46, %v5195_v63  ;;  %v567_v10 = vmul.f32 %v566_v62, %v5285_v32  ;;  %v604_v54 = vadd.f32 0.0036580483, %v603_v9 }
 0x113   : > { %v695_v61 = vadd.f32 0.014752088, %v694_v56  ;;  %v528_v58 = vadd.f32 0.18741608, %v527_v11  ;;  %v5387_v53 = vmul.f32 0.5, %v5251_v49  ;;  %v4419_v2 = vclamps-f32 %v396_v31, 1.0 }
 0x114   : > { %v886_v57 = vadd.f32 0.05243302, %v885_v16  ;;  %v848_v39 = vadd.f32 0.18741608, %v847_v6  ;;  %v922_v55 = vadd.f32 0.00028619796, %v921_v7  ;;  %v809_v37 = vmul.f32 %v808_v30, %v5222_v26 }
 0x115   : > { %7927 = vst [vmem:[#allocation19_spill] sm:$0xff] %v5387_v53  ;;  %v696_v4 = vmul.f32 %v695_v61, %v5132_v59  ;;  %v412_v24 = vmul.f32 3.8918573e-05, %v5138_v1  ;;  %v5393_v46 = vmul.f32 0.5, %v5273_v13  ;;  %v999_v62 = vadd.f32 1.0, %v4419_v2 }
 0x116   : > { %v5395_v9 = vmin.f32 %v639_v51, 16.0  ;;  %v490_v11 = vadd.f32 1.1283791, %v489_v33  ;;  %v568_v56 = vadd.f32 0.18741608, %v567_v10  ;;  %v605_v49 = vmul.f32 %v604_v54, %v5326_v43 }
 0x117   : > { %7928 = vst [vmem:[#allocation20_spill] sm:$0xff] %v5393_v46  ;;  %v697_v16 = vadd.f32 0.112945676, %v696_v4  ;;  %v529_v6 = vmul.f32 %v528_v58, %v5235_v34  ;;  %v887_v7 = vmul.f32 %v886_v57, %v5315_v21  ;;  %v1015_v31 = vmul.f32 %v999_v62, %v5209_v14 }
 0x118   : > { %v413_v61 = vadd.f32 0.001143296, %v412_v24  ;;  %v849_v30 = vmul.f32 %v848_v39, %v5258_v60  ;;  %v923_v13 = vmul.f32 %v922_v55, %v5371_v25  ;;  %v732_v51 = vmul.f32 3.8918573e-05, %v5159_v22  ;;  %v324_v24 = vpop.f32.mrf.mxu2 }
 0x119   : > { %v698_v2 = vmul.f32 %v697_v16, %v5132_v59  ;;  %v810_v33 = vadd.f32 1.1283791, %v809_v37  ;;  %1069 = vmatmul.f32.vlgmr.msra.gmra.mxu1 %v1015_v31  ;;  %v641_v10 = vmul.f32 2.1237322e-06, %v5395_v9  ;;  %v452_v58 = vmul.f32 3.8918573e-05, %v5168_v29 }
 0x11a   : > { %v414_v54 = vmul.f32 %v413_v61, %v5138_v1  ;;  %v569_v57 = vmul.f32 %v568_v56, %v5285_v32  ;;  %v606_v14 = vadd.f32 0.05243302, %v605_v49  ;;  %v733_v39 = vadd.f32 0.001143296, %v732_v51 }
 0x11b   : > { %v699_v4 = vadd.f32 0.4994258, %v698_v2  ;;  %v5411_v55 = vmul.f32 %v5349_v23, %v5155_v17  ;;  %v888_v62 = vadd.f32 0.18741608, %v887_v7  ;;  %v453_v37 = vadd.f32 0.001143296, %v452_v58 }
 0x11c   : > { %v415_v16 = vadd.f32 0.014752088, %v414_v54  ;;  %v530_v31 = vadd.f32 1.1283791, %v529_v6  ;;  %v850_v40 = vadd.f32 1.1283791, %v849_v30  ;;  %v5415_v45 = vadd.f32 %v5104_v35, %v324_v24 }
 0x11d   : > { %v924_v46 = vadd.f32 0.0036580483, %v923_v13  ;;  %v700_v61 = vmul.f32 %v699_v4, %v5132_v59  ;;  %v642_v53 = vadd.f32 0.00028619796, %v641_v10  ;;  %v734_v49 = vmul.f32 %v733_v39, %v5159_v22 }
 0x11e   : > { %v416_v56 = vmul.f32 %v415_v16, %v5138_v1  ;;  %v570_v2 = vadd.f32 1.1283791, %v569_v57  ;;  %v454_v17 = vmul.f32 %v453_v37, %v5168_v29  ;;  %v772_v23 = vmul.f32 3.8918573e-05, %v5186_v50 }
 0x11f   : > { %v701_v51 = vadd.f32 1.0, %v700_v61  ;;  %v889_v6 = vmul.f32 %v888_v62, %v5315_v21  ;;  %v607_v7 = vmul.f32 %v606_v14, %v5326_v43  ;;  %v735_v59 = vadd.f32 0.014752088, %v734_v49 }
 0x120   : > { %v417_v30 = vadd.f32 0.112945676, %v416_v56  ;;  %v5424_v13 = vmul.f32 %v770_v27, %v5172_v36  ;;  %v5427_v35 = vmul.f32 %v490_v11, %v5182_v44  ;;  %v5430_v10 = vmul.f32 %v810_v33, %v5199_v5 }
 0x121   : > { %4619 = vrcp.f32 %v701_v51  ;;  %v925_v54 = vmul.f32 %v924_v46, %v5371_v25  ;;  %v643_v58 = vmul.f32 %v642_v53, %v5395_v9  ;;  %v5435_v57 = vmul.f32 0.70710677, %v5415_v45 }
 0x122   : > { %v418_v14 = vmul.f32 %v417_v30, %v5138_v1  ;;  %v5439_v4 = vmul.f32 %v530_v31, %v5212_v15  ;;  %v736_v36 = vmul.f32 %v735_v59, %v5159_v22  ;;  %v455_v44 = vadd.f32 0.014752088, %v454_v17 }
 0x123   : > { %v773_v27 = vadd.f32 0.001143296, %v772_v23  ;;  %v5443_v5 = vmul.f32 %v850_v40, %v5238_v38  ;;  %v5446_v11 = vmul.f32 %v570_v2, %v5266_v3  ;;  %v890_v46 = vadd.f32 1.1283791, %v889_v6 }
 0x124   : > { %v608_v53 = vadd.f32 0.18741608, %v607_v7  ;;  %v419_v33 = vadd.f32 0.4994258, %v418_v14  ;;  %v737_v24 = vadd.f32 0.112945676, %v736_v36  ;;  %v456_v39 = vmul.f32 %v455_v44, %v5168_v29 }
 0x125   : > { %v774_v62 = vmul.f32 %v773_v27, %v5186_v50  ;;  %v926_v15 = vadd.f32 0.05243302, %v925_v54  ;;  %v644_v16 = vadd.f32 0.0036580483, %v643_v58  ;;  %v959_v37 = vmul.f32 %v5435_v57, %v5435_v57 }
 0x126   : > { %v492_v31 = vmul.f32 3.8918573e-05, %v5195_v63  ;;  %v420_v40 = vmul.f32 %v419_v33, %v5138_v1  ;;  %v738_v3 = vmul.f32 %v737_v24, %v5159_v22  ;;  %v457_v61 = vadd.f32 0.112945676, %v456_v39 }
 0x127   : > { %v4620_v38 = vpop.eup %4619  ;;  %v775_v56 = vadd.f32 0.014752088, %v774_v62  ;;  %v609_v49 = vmul.f32 %v608_v53, %v5326_v43  ;;  %v711_v17 = vand.u32 2147483647, %v701_v51  ;;  %v713_v23 = vand.u32 2147483648, %v701_v51 }
 0x128   : > { %v703_v2 = vmul.f32 %v4620_v38, %v701_v51  ;;  %v5456_v6 = vadd.f32 1.0, %v420_v40  ;;  %v739_v7 = vadd.f32 0.4994258, %v738_v3  ;;  %v458_v30 = vmul.f32 %v457_v61, %v5168_v29 }
 0x129   : > { %v776_v59 = vmul.f32 %v775_v56, %v5186_v50  ;;  %vm707_vm4 = vweird.f32 %v701_v51  ;;  %vm708_vm5 = vweird.f32 %v4620_v38  ;;  %v493_v1 = vadd.f32 0.001143296, %v492_v31 }
 0x12a   : > { %v704_v54 = vsub.f32 1.0, %v703_v2  ;;  %v927_v58 = vmul.f32 %v926_v15, %v5371_v25  ;;  %v645_v14 = vmul.f32 %v644_v16, %v5395_v9  ;;  %v5462_v36 = vmin.f32 %v959_v37, 16.0  ;;  %vm5470_vm7 = vmor %vm707_vm4, %vm708_vm5 }
 0x12b   : > { %4621 = vrcp.f32 %v5456_v6  ;;  %vm5465_vm6 = vcmp.eq.f32.partialorder %v711_v17, 8.507059e+37  ;;  %v740_v53 = vmul.f32 %v739_v7, %v5159_v22  ;;  %v459_v33 = vadd.f32 0.4994258, %v458_v30 }
 0x12c   : > { %v705_v44 = vmul.f32 %v4620_v38, %v704_v54  ;;  %v714_v24 = vor.u32 1.1754944e-38, %v713_v23  ;;  %v777_v39 = vadd.f32 0.112945676, %v776_v59  ;;  %v494_v62 = vmul.f32 %v493_v1, %v5195_v63 }
 0x12d   : > { %v812_v15 = vmul.f32 3.8918573e-05, %v5222_v26  ;;  %v961_v37 = vmul.f32 2.1237322e-06, %v5462_v36  ;;  %v741_v31 = vadd.f32 1.0, %v740_v53  ;;  %v460_v40 = vmul.f32 %v459_v33, %v5168_v29 }
 0x12e   : > { %v706_v16 = vadd.f32 %v4620_v38, %v705_v44  ;;  %v5479_v3 = vmul.f32 %v890_v46, %v5294_v41  ;;  %v5481_v22 = vadd.f32 1.1283791, %v609_v49  ;;  %v5483_v61 = vadd.f32 0.18741608, %v927_v58 }
 0x12f   : > { %v431_v56 = vand.u32 2147483647, %v5456_v6  ;;  %v433_v17 = vand.u32 2147483648, %v5456_v6  ;;  %4623 = vrcp.f32 %v741_v31  ;;  %v778_v23 = vmul.f32 %v777_v39, %v5186_v50 }
 0x130   : > { %v710_v2 = vsel %vm5470_vm7, %v4620_v38, %v706_v16  ;;  %v5492_v41 = vadd.f32 1.0, %v460_v40  ;;  %v495_v46 = vadd.f32 0.014752088, %v494_v62  ;;  %v813_v49 = vadd.f32 0.001143296, %v812_v15 }
 0x131   : > { %v4622_v7 = vpop.eup %4621  ;;  %v715_v29 = vsel %vm5465_vm6, %v714_v24, %v710_v2  ;;  %v5494_v30 = vadd.f32 0.05243302, %v645_v14  ;;  %v5497_v54 = vadd.f32 0.00028619796, %v961_v37  ;;  %vm427_vm8 = vweird.f32 %v5456_v6 }
 0x132   : > { %v716_v59 = vmul.f32 %v715_v29, %v5310_v12  ;;  %v423_v38 = vmul.f32 %v4622_v7, %v5456_v6  ;;  %vm5501_vm9 = vcmp.eq.f32.partialorder %v431_v56, 8.507059e+37  ;;  %v751_v58 = vand.u32 2147483647, %v741_v31 }
 0x133   : > { %4625 = vrcp.f32 %v5492_v41  ;;  %v434_v53 = vor.u32 1.1754944e-38, %v433_v17  ;;  %v532_v14 = vmul.f32 3.8918573e-05, %v5235_v34  ;;  %vm747_vm10 = vweird.f32 %v741_v31 }
 0x134   : > { %v4427_v44 = vclamps-f32 %v716_v59, 1.0  ;;  %v424_v27 = vsub.f32 1.0, %v423_v38  ;;  %v779_v12 = vadd.f32 0.4994258, %v778_v23  ;;  %v496_v33 = vmul.f32 %v495_v46, %v5195_v63 }
 0x135   : > { %v814_v51 = vmul.f32 %v813_v49, %v5222_v26  ;;  %v4624_v24 = vpop.eup %4623  ;;  %vm428_vm11 = vweird.f32 %v4622_v7  ;;  %v753_v15 = vand.u32 2147483648, %v741_v31  ;;  %vm5509_vm12 = vcmp.eq.f32.partialorder %v751_v58, 8.507059e+37 }
 0x136   : > { %v1007_v39 = vadd.f32 1.0, %v4427_v44  ;;  %v425_v62 = vmul.f32 %v4622_v7, %v424_v27  ;;  %v743_v16 = vmul.f32 %v4624_v24, %v741_v31  ;;  %v471_v40 = vand.u32 2147483647, %v5492_v41  ;;  %vm429_vm14 = vmor %vm427_vm8, %vm428_vm11 }
 0x137   : > { %v780_v56 = vmul.f32 %v779_v12, %v5186_v50  ;;  %vm748_vm13 = vweird.f32 %v4624_v24  ;;  %v497_v23 = vadd.f32 0.112945676, %v496_v33  ;;  %v815_v59 = vadd.f32 0.014752088, %v814_v51 }
 0x138   : > { %v1023_v2 = vmul.f32 %v1007_v39, %v5217_v18  ;;  %v426_v17 = vadd.f32 %v4622_v7, %v425_v62  ;;  %v744_v46 = vsub.f32 1.0, %v743_v16  ;;  %v533_v38 = vadd.f32 0.001143296, %v532_v14  ;;  %vm5529_vm15 = vmor %vm747_vm10, %vm748_vm13 }
 0x139   : > { %v4626_v29 = vpop.eup %4625  ;;  %v5518_v49 = vadd.f32 1.0, %v780_v56  ;;  %v473_v50 = vand.u32 2147483648, %v5492_v41  ;;  %v498_v18 = vmul.f32 %v497_v23, %v5195_v63  ;;  %v754_v33 = vor.u32 1.1754944e-38, %v753_v15 }
 0x13a   : > { %1093 = vmatmul.f32.vlgmr.msra.gmra.mxu3 %v1023_v2  ;;  %v430_v58 = vsel %vm429_vm14, %v4622_v7, %v426_v17  ;;  %v463_v44 = vmul.f32 %v4626_v29, %v5492_v41  ;;  %v745_v12 = vmul.f32 %v4624_v24, %v744_v46  ;;  %vm467_vm0 = vweird.f32 %v5492_v41 }
 0x13b   : > { %v435_v27 = vsel %vm5501_vm9, %v434_v53, %v430_v58  ;;  %4627 = vrcp.f32 %v5518_v49  ;;  %vm5534_vm1 = vcmp.eq.f32.partialorder %v471_v40, 8.507059e+37  ;;  %v499_v53 = vadd.f32 0.4994258, %v498_v18 }
 0x13c   : > { %v436_v6 = vmul.f32 %v435_v27, %v5313_v19  ;;  %v464_v7 = vsub.f32 1.0, %v463_v44  ;;  %v746_v1 = vadd.f32 %v4624_v24, %v745_v12  ;;  %v816_v39 = vmul.f32 %v815_v59, %v5222_v26 }
 0x13d   : > { %v534_v62 = vmul.f32 %v533_v38, %v5235_v34  ;;  %vm468_vm2 = vweird.f32 %v4626_v29  ;;  %v474_v31 = vor.u32 1.1754944e-38, %v473_v50  ;;  %v500_v56 = vmul.f32 %v499_v53, %v5195_v63 }
 0x13e   : > { %v4420_v19 = vclamps-f32 %v436_v6, 1.0  ;;  %v465_v15 = vmul.f32 %v4626_v29, %v464_v7  ;;  %v750_v16 = vsel %vm5529_vm15, %v4624_v24, %v746_v1  ;;  %v817_v2 = vadd.f32 0.112945676, %v816_v39  ;;  %vm469_vm4 = vmor %vm467_vm0, %vm468_vm2 }
 0x13f   : > { %v535_v40 = vadd.f32 0.014752088, %v534_v62  ;;  %v755_v23 = vsel %vm5509_vm12, %v754_v33, %v750_v16  ;;  %vm787_vm3 = vweird.f32 %v5518_v49  ;;  %v5549_v58 = vadd.f32 1.0, %v500_v56 }
 0x140   : > { %v1000_v17 = vadd.f32 1.0, %v4420_v19  ;;  %v466_v46 = vadd.f32 %v4626_v29, %v465_v15  ;;  %v756_v38 = vmul.f32 %v755_v23, %v5345_v28  ;;  %v818_v24 = vmul.f32 %v817_v2, %v5222_v26 }
 0x141   : > { %v4628_v59 = vpop.eup %4627  ;;  %v536_v63 = vmul.f32 %v535_v40, %v5235_v34  ;;  %v793_v18 = vand.u32 2147483648, %v5518_v49  ;;  %4629 = vrcp.f32 %v5549_v58  ;;  %v852_v41 = vmul.f32 3.8918573e-05, %v5258_v60 }
 0x142   : > { %v1016_v44 = vmul.f32 %v1000_v17, %v5231_v47  ;;  %v470_v50 = vsel %vm469_vm4, %v4626_v29, %v466_v46  ;;  %v783_v37 = vmul.f32 %v4628_v59, %v5518_v49  ;;  %v4428_v27 = vclamps-f32 %v756_v38, 1.0 }
 0x143   : > { %v475_v28 = vsel %vm5534_vm1, %v474_v31, %v470_v50  ;;  %vm788_vm5 = vweird.f32 %v4628_v59  ;;  %v791_v47 = vand.u32 2147483647, %v5518_v49  ;;  %v5564_v29 = vmul.f32 %v5483_v61, %v5371_v25 }
 0x144   : > { %1072 = vmatmul.f32.gmra.mxu1 %v1016_v44  ;;  %v476_v12 = vmul.f32 %v475_v28, %v5411_v55  ;;  %v784_v33 = vsub.f32 1.0, %v783_v37  ;;  %v1008_v6 = vadd.f32 1.0, %v4428_v27  ;;  %v819_v14 = vadd.f32 0.4994258, %v818_v24  ;;  %vm5573_vm6 = vmor %vm787_vm3, %vm788_vm5 }
 0x145   : > { %v537_v7 = vadd.f32 0.112945676, %v536_v63  ;;  %v5568_v51 = vmul.f32 %v5497_v54, %v5462_v36  ;;  %v794_v39 = vor.u32 1.1754944e-38, %v793_v18  ;;  %v853_v15 = vadd.f32 0.001143296, %v852_v41 }
 0x146   : > { %v4421_v1 = vclamps-f32 %v476_v12, 1.0  ;;  %v785_v53 = vmul.f32 %v4628_v59, %v784_v33  ;;  %v1024_v55 = vmul.f32 %v1008_v6, %v5242_v42  ;;  %v820_v61 = vmul.f32 %v819_v14, %v5222_v26 }
 0x147   : > { %v538_v19 = vmul.f32 %v537_v7, %v5235_v34  ;;  %vm792_vm7 = vcmp.eq.f32.partialorder %v791_v47, 8.507059e+37  ;;  %v511_v54 = vand.u32 2147483647, %v5549_v58  ;;  %v4630_v56 = vpop.eup %4629  ;;  %v854_v49 = vmul.f32 %v853_v15, %v5258_v60 }
 0x148   : > { %v1001_v31 = vadd.f32 1.0, %v4421_v1  ;;  %v786_v16 = vadd.f32 %v4628_v59, %v785_v53  ;;  %1096 = vmatmul.f32.gmra.mxu3 %v1024_v55  ;;  %v821_v2 = vadd.f32 1.0, %v820_v61  ;;  %v572_v40 = vmul.f32 3.8918573e-05, %v5285_v32 }
 0x149   : > { %v539_v42 = vadd.f32 0.4994258, %v538_v19  ;;  %v503_v23 = vmul.f32 %v4630_v56, %v5549_v58  ;;  %vm507_vm8 = vweird.f32 %v5549_v58  ;;  %v513_v38 = vand.u32 2147483648, %v5549_v58 }
 0x14a   : > { %v1017_v17 = vmul.f32 %v1001_v31, %v5245_v52  ;;  %v790_v26 = vsel %vm5573_vm6, %v4628_v59, %v786_v16  ;;  %4631 = vrcp.f32 %v821_v2  ;;  %v892_v24 = vmul.f32 3.8918573e-05, %v5315_v21 }
 0x14b   : > { %v795_v46 = vsel %vm792_vm7, %v794_v39, %v790_v26  ;;  %v504_v44 = vsub.f32 1.0, %v503_v23  ;;  %vm5590_vm9 = vcmp.eq.f32.partialorder %v511_v54, 8.507059e+37  ;;  %v540_v52 = vmul.f32 %v539_v42, %v5235_v34 }
 0x14c   : > { %1075 = vmatmul.f32.gmra.mxu1 %v1017_v17  ;;  %v796_v63 = vmul.f32 %v795_v46, %v5424_v13  ;;  %vm508_vm10 = vweird.f32 %v4630_v56  ;;  %v855_v59 = vadd.f32 0.014752088, %v854_v49  ;;  %v573_v37 = vadd.f32 0.001143296, %v572_v40 }
 0x14d   : > { %v612_v18 = vmul.f32 3.8918573e-05, %v5326_v43  ;;  %v505_v28 = vmul.f32 %v4630_v56, %v504_v44  ;;  %v831_v41 = vand.u32 2147483647, %v821_v2  ;;  %v5596_v12 = vadd.f32 1.0, %v540_v52  ;;  %vm509_vm11 = vmor %vm507_vm8, %vm508_vm10 }
 0x14e   : > { %v4429_v27 = vclamps-f32 %v796_v63, 1.0  ;;  %v514_v33 = vor.u32 1.1754944e-38, %v513_v38  ;;  %v833_v47 = vand.u32 2147483648, %v821_v2  ;;  %v856_v13 = vmul.f32 %v855_v59, %v5258_v60 }
 0x14f   : > { %v893_v6 = vadd.f32 0.001143296, %v892_v24  ;;  %v506_v7 = vadd.f32 %v4630_v56, %v505_v28  ;;  %4633 = vrcp.f32 %v5596_v12  ;;  %v574_v34 = vmul.f32 %v573_v37, %v5285_v32 }
 0x150   : > { %v1009_v14 = vadd.f32 1.0, %v4429_v27  ;;  %v4632_v1 = vpop.eup %4631  ;;  %vm827_vm12 = vweird.f32 %v821_v2  ;;  %v857_v53 = vadd.f32 0.112945676, %v856_v13  ;;  %v613_v55 = vadd.f32 0.001143296, %v612_v18 }
 0x151   : > { %v894_v39 = vmul.f32 %v893_v6, %v5315_v21  ;;  %v510_v61 = vsel %vm509_vm11, %v4630_v56, %v506_v7  ;;  %v823_v19 = vmul.f32 %v4632_v1, %v821_v2  ;;  %vm5606_vm13 = vcmp.eq.f32.partialorder %v831_v41, 8.507059e+37 }
 0x152   : > { %v1025_v62 = vmul.f32 %v1009_v14, %v5263_v0  ;;  %v515_v31 = vsel %vm5590_vm9, %v514_v33, %v510_v61  ;;  %vm828_vm14 = vweird.f32 %v4632_v1  ;;  %v834_v16 = vor.u32 1.1754944e-38, %v833_v47 }
 0x153   : > { %v858_v58 = vmul.f32 %v857_v53, %v5258_v60  ;;  %v516_v54 = vmul.f32 %v515_v31, %v5427_v35  ;;  %v824_v42 = vsub.f32 1.0, %v823_v19  ;;  %v575_v49 = vadd.f32 0.014752088, %v574_v34  ;;  %vm5621_vm15 = vmor %vm827_vm12, %vm828_vm14 }
 0x154   : > { %1099 = vmatmul.f32.gmra.mxu3 %v1025_v62  ;;  %v895_v40 = vadd.f32 0.014752088, %v894_v39  ;;  %v551_v0 = vand.u32 2147483647, %v5596_v12  ;;  %v614_v17 = vmul.f32 %v613_v55, %v5326_v43  ;;  %v932_v26 = vmul.f32 3.8918573e-05, %v5371_v25 }
 0x155   : > { %v859_v56 = vadd.f32 0.4994258, %v858_v58  ;;  %v4634_v23 = vpop.eup %4633  ;;  %v4422_v46 = vclamps-f32 %v516_v54, 1.0  ;;  %v825_v38 = vmul.f32 %v4632_v1, %v824_v42  ;;  %v576_v24 = vmul.f32 %v575_v49, %v5285_v32 }
 0x156   : > { %v896_v63 = vmul.f32 %v895_v40, %v5315_v21  ;;  %v543_v44 = vmul.f32 %v4634_v23, %v5596_v12  ;;  %v553_v50 = vand.u32 2147483648, %v5596_v12  ;;  %v615_v59 = vadd.f32 0.014752088, %v614_v17 }
 0x157   : > { %v860_v52 = vmul.f32 %v859_v56, %v5258_v60  ;;  %v1002_v37 = vadd.f32 1.0, %v4422_v46  ;;  %v826_v18 = vadd.f32 %v4632_v1, %v825_v38  ;;  %v577_v27 = vadd.f32 0.112945676, %v576_v24 }
 0x158   : > { %v897_v28 = vadd.f32 0.112945676, %v896_v63  ;;  %v544_v41 = vsub.f32 1.0, %v543_v44  ;;  %v616_v47 = vmul.f32 %v615_v59, %v5326_v43  ;;  %v933_v2 = vadd.f32 0.001143296, %v932_v26 }
 0x159   : > { %v861_v33 = vadd.f32 1.0, %v860_v52  ;;  %v1018_v13 = vmul.f32 %v1002_v37, %v5277_v20  ;;  %v830_v6 = vsel %vm5621_vm15, %v4632_v1, %v826_v18  ;;  %v578_v14 = vmul.f32 %v577_v27, %v5285_v32  ;;  %v7953_v18 = vld [vmem:[#allocation15_spill] sm:$0xff] }
 0x15a   : > { %v898_v7 = vmul.f32 %v897_v28, %v5315_v21  ;;  %v835_v60 = vsel %vm5606_vm13, %v834_v16, %v830_v6  ;;  %v545_v34 = vmul.f32 %v4634_v23, %v544_v41  ;;  %vm548_vm0 = vweird.f32 %v4634_v23 }
 0x15b   : > { %4635 = vrcp.f32 %v861_v33  ;;  %1078 = vmatmul.f32.gmra.mxu1 %v1018_v13  ;;  %v836_v53 = vmul.f32 %v835_v60, %v5430_v10  ;;  %vm547_vm1 = vweird.f32 %v5596_v12  ;;  %vm5638_vm2 = vcmp.eq.f32.partialorder %v551_v0, 8.507059e+37 }
 0x15c   : > { %v579_v1 = vadd.f32 0.4994258, %v578_v14  ;;  %v546_v39 = vadd.f32 %v4634_v23, %v545_v34  ;;  %v899_v55 = vadd.f32 0.4994258, %v898_v7  ;;  %v617_v62 = vadd.f32 0.112945676, %v616_v47  ;;  %vm549_vm3 = vmor %vm547_vm1, %vm548_vm0 }
 0x15d   : > { %v934_v61 = vmul.f32 %v933_v2, %v5371_v25  ;;  %v4430_v19 = vclamps-f32 %v836_v53, 1.0  ;;  %v554_v15 = vor.u32 1.1754944e-38, %v553_v50  ;;  %v652_v16 = vmul.f32 3.8918573e-05, %v5395_v9 }
 0x15e   : > { %v580_v31 = vmul.f32 %v579_v1, %v5285_v32  ;;  %v550_v10 = vsel %vm549_vm3, %v4634_v23, %v546_v39  ;;  %v900_v12 = vmul.f32 %v899_v55, %v5315_v21  ;;  %v618_v58 = vmul.f32 %v617_v62, %v5326_v43 }
 0x15f   : > { %v935_v54 = vadd.f32 0.014752088, %v934_v61  ;;  %v964_v42 = vadd.f32 0.0036580483, %v5568_v51  ;;  %v1010_v49 = vadd.f32 1.0, %v4430_v19  ;;  %v555_v40 = vsel %vm5638_vm2, %v554_v15, %v550_v10 }
 0x160   : > { %v5650_v0 = vadd.f32 1.0, %v580_v31  ;;  %v556_v17 = vmul.f32 %v555_v40, %v5439_v4  ;;  %v871_v32 = vand.u32 2147483647, %v861_v33  ;;  %v5653_v26 = vadd.f32 1.0, %v900_v12 }
 0x161   : > { %v4636_v56 = vpop.eup %4635  ;;  %v619_v23 = vadd.f32 0.4994258, %v618_v58  ;;  %v1026_v21 = vmul.f32 %v1010_v49, %v5297_v48  ;;  %v936_v51 = vmul.f32 %v935_v54, %v5371_v25  ;;  %v5660_v38 = vmul.f32 %v5481_v22, %v5307_v8 }
 0x162   : > { %v863_v46 = vmul.f32 %v4636_v56, %v861_v33  ;;  %4637 = vrcp.f32 %v5650_v0  ;;  %v4423_v24 = vclamps-f32 %v556_v17, 1.0  ;;  %v873_v63 = vand.u32 2147483648, %v861_v33 }
 0x163   : > { %v653_v35 = vadd.f32 0.001143296, %v652_v16  ;;  %1102 = vmatmul.f32.gmra.mxu3 %v1026_v21  ;;  %vm867_vm4 = vweird.f32 %v861_v33  ;;  %vm868_vm5 = vweird.f32 %v4636_v56  ;;  %4639 = vrcp.f32 %v5653_v26 }
 0x164   : > { %v864_v4 = vsub.f32 1.0, %v863_v46  ;;  %v5664_v48 = vadd.f32 1.1283791, %v5564_v29  ;;  %v5668_v44 = vmul.f32 %v5494_v30, %v5395_v9  ;;  %v5671_v50 = vmul.f32 %v964_v42, %v5462_v36  ;;  %vm5679_vm7 = vmor %vm867_vm4, %vm868_vm5 }
 0x165   : > { %v1003_v8 = vadd.f32 1.0, %v4423_v24  ;;  %vm5673_vm6 = vcmp.eq.f32.partialorder %v871_v32, 8.507059e+37  ;;  %v620_v59 = vmul.f32 %v619_v23, %v5326_v43  ;;  %v937_v37 = vadd.f32 0.112945676, %v936_v51 }
 0x166   : > { %v865_v22 = vmul.f32 %v4636_v56, %v864_v4  ;;  %v874_v30 = vor.u32 1.1754944e-38, %v873_v63  ;;  %v654_v28 = vmul.f32 %v653_v35, %v5395_v9  ;;  %v972_v41 = vmul.f32 3.8918573e-05, %v5462_v36  ;;  %v7962_v63 = vld [vmem:[#allocation16_spill] sm:$0xff] }
 0x167   : > { %v1019_v27 = vmul.f32 %v1003_v8, %v7953_v18  ;;  %v591_v2 = vand.u32 2147483647, %v5650_v0  ;;  %v5686_v13 = vadd.f32 1.0, %v620_v59  ;;  %v938_v43 = vmul.f32 %v937_v37, %v5371_v25 }
 0x168   : > { %v4638_v33 = vpop.eup %4637  ;;  %v866_v47 = vadd.f32 %v4636_v56, %v865_v22  ;;  %v593_v14 = vand.u32 2147483648, %v5650_v0  ;;  %v655_v7 = vadd.f32 0.014752088, %v654_v28  ;;  %v973_v60 = vadd.f32 0.001143296, %v972_v41 }
 0x169   : > { %1081 = vmatmul.f32.gmra.mxu1 %v1019_v27  ;;  %v583_v6 = vmul.f32 %v4638_v33, %v5650_v0  ;;  %v4640_v34 = vpop.eup %4639  ;;  %vm907_vm8 = vweird.f32 %v5653_v26  ;;  %v911_v20 = vand.u32 2147483647, %v5653_v26  ;;  %4641 = vrcp.f32 %v5686_v13 }
 0x16a   : > { %v870_v53 = vsel %vm5679_vm7, %v4636_v56, %v866_v47  ;;  %v903_v55 = vmul.f32 %v4640_v34, %v5653_v26  ;;  %v913_v62 = vand.u32 2147483648, %v5653_v26  ;;  %vm588_vm9 = vweird.f32 %v4638_v33 }
 0x16b   : > { %v875_v1 = vsel %vm5673_vm6, %v874_v30, %v870_v53  ;;  %v584_v39 = vsub.f32 1.0, %v583_v6  ;;  %vm908_vm10 = vweird.f32 %v4640_v34  ;;  %v939_v19 = vadd.f32 0.4994258, %v938_v43 }
 0x16c   : > { %v876_v61 = vmul.f32 %v875_v1, %v5443_v5  ;;  %v904_v31 = vsub.f32 1.0, %v903_v55  ;;  %v656_v16 = vmul.f32 %v655_v7, %v5395_v9  ;;  %v974_v10 = vmul.f32 %v973_v60, %v5462_v36  ;;  %vm5716_vm14 = vmor %vm907_vm8, %vm908_vm10  ;;  %v7965_v60 = vld [vmem:[#allocation19_spill] sm:$0xff] }
 0x16d   : > { %v585_v15 = vmul.f32 %v4638_v33, %v584_v39  ;;  %vm587_vm11 = vweird.f32 %v5650_v0  ;;  %vm5704_vm12 = vcmp.eq.f32.partialorder %v591_v2, 8.507059e+37  ;;  %v940_v54 = vmul.f32 %v939_v19, %v5371_v25  ;;  %v1838_v19 = vld [vmem:[#allocation5 + $0x178] sm:$0xff] }
 0x16e   : > { %v4431_v12 = vclamps-f32 %v876_v61, 1.0  ;;  %vm5709_vm13 = vmor %vm587_vm11, %vm588_vm9  ;;  %v594_v49 = vor.u32 1.1754944e-38, %v593_v14  ;;  %v905_v40 = vmul.f32 %v4640_v34, %v904_v31  ;;  %v914_v56 = vor.u32 1.1754944e-38, %v913_v62  ;;  %v7966_v31 = vld [vmem:[#allocation20_spill] sm:$0xff]  ;;  %1844 = vmatpush.msrb.mxu2 %v1838_v19 }
 0x16f   : > { %v586_v42 = vadd.f32 %v4638_v33, %v585_v15  ;;  %v4642_v17 = vpop.eup %4641  ;;  %v5720_v23 = vadd.f32 1.0, %v940_v54  ;;  %v657_v25 = vadd.f32 0.112945676, %v656_v16  ;;  %v975_v21 = vadd.f32 0.014752088, %v974_v10  ;;  %v1837_v15 = vld [vmem:[#allocation5 + $0x170] sm:$0xff] }
 0x170   : > { %v1011_v32 = vadd.f32 1.0, %v4431_v12  ;;  %v906_v51 = vadd.f32 %v4640_v34, %v905_v40  ;;  %vm912_vm15 = vcmp.eq.f32.partialorder %v911_v20, 8.507059e+37  ;;  %v623_v24 = vmul.f32 %v4642_v17, %v5686_v13  ;;  %v1836_v54 = vld [vmem:[#allocation5 + $0x168] sm:$0xff]  ;;  %1845 = vmatpush.msrb.mxu2 %v1837_v15 }
 0x171   : > { %v590_v46 = vsel %vm5709_vm13, %v4638_v33, %v586_v42  ;;  %v631_v4 = vand.u32 2147483647, %v5686_v13  ;;  %4643 = vrcp.f32 %v5720_v23  ;;  %v633_v59 = vand.u32 2147483648, %v5686_v13  ;;  %v7967_v40 = vld [vmem:[#allocation12_spill] sm:$0xff] }
 0x172   : > { %v1027_v35 = vmul.f32 %v1011_v32, %v7962_v63  ;;  %v595_v26 = vsel %vm5704_vm12, %v594_v49, %v590_v46  ;;  %v910_v22 = vsel %vm5716_vm14, %v4640_v34, %v906_v51  ;;  %v624_v52 = vsub.f32 1.0, %v623_v24  ;;  %1846 = vmatpush.msrb.mxu2 %v1836_v54 }
 0x173   : > { %v596_v8 = vmul.f32 %v595_v26, %v5446_v11  ;;  %v966_v37 = vadd.f32 0.05243302, %v5671_v50  ;;  %v915_v18 = vsel %vm912_vm15, %v914_v56, %v910_v22  ;;  %v658_v27 = vmul.f32 %v657_v25, %v5395_v9 }
 0x174   : > { %1105 = vmatmul.f32.gmra.mxu3 %v1027_v35  ;;  %v976_v29 = vmul.f32 %v975_v21, %v5462_v36  ;;  %v916_v28 = vmul.f32 %v915_v18, %v5479_v3  ;;  %v625_v41 = vmul.f32 %v4642_v17, %v624_v52  ;;  %vm628_vm0 = vweird.f32 %v4642_v17 }
 0x175   : > { %v4424_v30 = vclamps-f32 %v596_v8, 1.0  ;;  %vm627_vm1 = vweird.f32 %v5686_v13  ;;  %vm5739_vm2 = vcmp.eq.f32.partialorder %v631_v4, 8.507059e+37  ;;  %v659_v33 = vadd.f32 0.4994258, %v658_v27  ;;  %v7969_v8 = vld [vmem:[#allocation13_spill] sm:$0xff] }
 0x176   : > { %v977_v47 = vadd.f32 0.112945676, %v976_v29  ;;  %v4432_v2 = vclamps-f32 %v916_v28, 1.0  ;;  %v626_v43 = vadd.f32 %v4642_v17, %v625_v41  ;;  %v634_v6 = vor.u32 1.1754944e-38, %v633_v59  ;;  %vm629_vm3 = vmor %vm627_vm1, %vm628_vm0 }
 0x177   : > { %v1004_v50 = vadd.f32 1.0, %v4424_v30  ;;  %v4644_v14 = vpop.eup %4643  ;;  %vm947_vm4 = vweird.f32 %v5720_v23  ;;  %v951_v3 = vand.u32 2147483647, %v5720_v23  ;;  %v660_v7 = vmul.f32 %v659_v33, %v5395_v9 }
 0x178   : > { %v978_v13 = vmul.f32 %v977_v47, %v5462_v36  ;;  %v1012_v53 = vadd.f32 1.0, %v4432_v2  ;;  %v630_v20 = vsel %vm629_vm3, %v4642_v17, %v626_v43  ;;  %v943_v1 = vmul.f32 %v4644_v14, %v5720_v23  ;;  %v7968_v17 = vld [vmem:[#allocation14_spill] sm:$0xff] }
 0x179   : > { %v1020_v34 = vmul.f32 %v1004_v50, %v7965_v60  ;;  %v635_v39 = vsel %vm5739_vm2, %v634_v6, %v630_v20  ;;  %v953_v55 = vand.u32 2147483648, %v5720_v23  ;;  %v5752_v62 = vadd.f32 1.0, %v660_v7  ;;  %v7970_v43 = vld [vmem:[#allocation18_spill] sm:$0xff] }
 0x17a   : > { %v979_v61 = vadd.f32 0.4994258, %v978_v13  ;;  %v1028_v16 = vmul.f32 %v1012_v53, %v7966_v31  ;;  %v636_v10 = vmul.f32 %v635_v39, %v5660_v38  ;;  %v944_v12 = vsub.f32 1.0, %v943_v1  ;;  %v7971_v39 = vld [vmem:[#allocation17_spill] sm:$0xff] }
 0x17b   : > { %1084 = vmatmul.f32.gmra.mxu1 %v1020_v34  ;;  %vm948_vm5 = vweird.f32 %v4644_v14  ;;  %v967_v58 = vmul.f32 %v966_v37, %v5462_v36  ;;  %4645 = vrcp.f32 %v5752_v62  ;;  %v333_v56 = vmul.f32 0.5, %v7967_v40 }
 0x17c   : > { %1108 = vmatmul.f32.gmra.mxu3 %v1028_v16  ;;  %v4425_v42 = vclamps-f32 %v636_v10, 1.0  ;;  %v945_v5 = vmul.f32 %v4644_v14, %v944_v12  ;;  %v980_v49 = vmul.f32 %v979_v61, %v5462_v36  ;;  %v931_v32 = vmul.f32 %v5664_v48, %v7968_v17  ;;  %vm949_vm6 = vmor %vm947_vm4, %vm948_vm5  ;;  %v5776_v10 = vld [vmem:[#allocation7 + $0x1] ss:$0 sm:$0xff]  ;;  %v1834_v17 = vld [vmem:[#allocation5 + $0x158] sm:$0xff] }
 0x17d   : > { %v648_v38 = vadd.f32 0.18741608, %v5668_v44  ;;  %v954_v0 = vor.u32 1.1754944e-38, %v953_v55  ;;  %vm952_vm7 = vcmp.eq.f32.partialorder %v951_v3, 8.507059e+37  ;;  %v968_v51 = vadd.f32 0.18741608, %v967_v58 }
 0x17e   : > { %v1005_v25 = vadd.f32 1.0, %v4425_v42  ;;  %v946_v21 = vadd.f32 %v4644_v14, %v945_v5  ;;  %v981_v46 = vadd.f32 1.0, %v980_v49  ;;  %v341_v22 = vmul.f32 0.5, %v7969_v8 }
 0x17f   : > { %v649_v26 = vmul.f32 %v648_v38, %v5395_v9  ;;  %v969_v23 = vmul.f32 %v968_v51, %v5462_v36  ;;  %v673_v37 = vand.u32 2147483648, %v5752_v62  ;;  %v671_v9 = vand.u32 2147483647, %v5752_v62 }
 0x180   : > { %v1021_v24 = vmul.f32 %v1005_v25, %v333_v56  ;;  %v950_v63 = vsel %vm949_vm6, %v4644_v14, %v946_v21  ;;  %4647 = vrcp.f32 %v981_v46  ;;  %vm667_vm9 = vweird.f32 %v5752_v62  ;;  %v1835_v56 = vld [vmem:[#allocation5 + $0x160] sm:$0xff] }
 0x181   : > { %v4646_v35 = vpop.eup %4645  ;;  %v955_v4 = vsel %vm952_vm7, %v954_v0, %v950_v63  ;;  %v650_v18 = vadd.f32 1.1283791, %v649_v26  ;;  %v970_v28 = vadd.f32 1.1283791, %v969_v23  ;;  %v674_v36 = vor.u32 1.1754944e-38, %v673_v37  ;;  %1847 = vmatpush.msrb.mxu2 %v1835_v56  ;;  %v1832_v63 = vld [vmem:[#allocation5 + $0x148] sm:$0xff] }
 0x182   : > { %v956_v48 = vmul.f32 %v955_v4, %v931_v32  ;;  %v663_v44 = vmul.f32 %v4646_v35, %v5752_v62  ;;  %vm668_vm8 = vweird.f32 %v4646_v35  ;;  %v993_v47 = vand.u32 2147483648, %v981_v46  ;;  %v1831_v37 = vld [vmem:[#allocation5 + $0x140] sm:$0xff]  ;;  %v1828_v56 = vld [vmem:[#allocation5 + $0x128] sm:$0xff] }
 0x183   : > { %1087 = vmatmul.f32.gmra.mxu1 %v1021_v24  ;;  %vm669_vm10 = vmor %vm667_vm9, %vm668_vm8  ;;  %vm987_vm11 = vweird.f32 %v981_v46  ;;  %v991_v2 = vand.u32 2147483647, %v981_v46  ;;  %v651_v6 = vmul.f32 %v650_v18, %v7970_v43  ;;  %vm672_vm13 = vcmp.eq.f32.partialorder %v671_v9, 8.507059e+37  ;;  %1848 = vmatpush.msrb.mxu2 %v1834_v17  ;;  %v1833_v24 = vld [vmem:[#allocation5 + $0x150] sm:$0xff]  ;;  %v1830_v9 = vld [vmem:[#allocation5 + $0x138] sm:$0xff] }
 0x184   : > { %v4433_v52 = vclamps-f32 %v956_v48, 1.0  ;;  %v664_v59 = vsub.f32 1.0, %v663_v44  ;;  %v994_v60 = vor.u32 1.1754944e-38, %v993_v47  ;;  %v971_v34 = vmul.f32 %v970_v28, %v5435_v57 }
 0x185   : > { %vm992_vm15 = vcmp.eq.f32.partialorder %v991_v2, 8.507059e+37  ;;  %v334_v55 = vmul.f32 0.5, %v7971_v39  ;;  %v342_v31 = vmul.f32 0.5, %v5415_v45  ;;  %1849 = vmatpush.msrb.mxu2 %v1833_v24 }
 0x186   : > { %v4648_v27 = vpop.eup %4647  ;;  %v1013_v29 = vadd.f32 1.0, %v4433_v52  ;;  %v665_v30 = vmul.f32 %v4646_v35, %v664_v59 }
 0x187   : > { %v983_v41 = vmul.f32 %v4648_v27, %v981_v46  ;;  %vm988_vm12 = vweird.f32 %v4648_v27  ;;  %1850 = vmatpush.msrb.mxu2 %v1832_v63 }
 0x188   : > { %v1029_v11 = vmul.f32 %v1013_v29, %v341_v22  ;;  %v666_v33 = vadd.f32 %v4646_v35, %v665_v30  ;;  %vm989_vm14 = vmor %vm987_vm11, %vm988_vm12 }
 0x189   : > { %v984_v50 = vsub.f32 1.0, %v983_v41  ;;  %1851 = vmatpush.msrb.mxu2 %v1831_v37 }
 0x18a   : > { %1111 = vmatmul.f32.gmra.mxu3 %v1029_v11  ;;  %v670_v14 = vsel %vm669_vm10, %v4646_v35, %v666_v33 }
 0x18b   : > { %v675_v3 = vsel %vm672_vm13, %v674_v36, %v670_v14  ;;  %v985_v7 = vmul.f32 %v4648_v27, %v984_v50  ;;  %1852 = vmatpush.msrb.mxu2 %v1830_v9 }
 0x18c   : > { %v676_v13 = vmul.f32 %v675_v3, %v651_v6 }
 0x18d   : > { %v986_v53 = vadd.f32 %v4648_v27, %v985_v7 }
 0x18e   : > { %v4426_v20 = vclamps-f32 %v676_v13, 1.0 }
 0x18f   : > { %v990_v1 = vsel %vm989_vm14, %v4648_v27, %v986_v53 }
 0x190   : > { %v1006_v62 = vadd.f32 1.0, %v4426_v20  ;;  %v995_v61 = vsel %vm992_vm15, %v994_v60, %v990_v1 }
 0x191   : > { %v996_v19 = vmul.f32 %v995_v61, %v971_v34 }
 0x192   : > { %v1022_v15 = vmul.f32 %v1006_v62, %v334_v55 }
 0x193   : > { %v4434_v16 = vclamps-f32 %v996_v19, 1.0 }
 0x194   : > { %1090 = vmatmul.f32.gmra.mxu1 %v1022_v15 }
 0x195   : > { %v1014_v12 = vadd.f32 1.0, %v4434_v16 }
 0x196   : > { %v1070_v58 = vpop.f32.mrf.mxu1 }
 0x197   : > { %v1030_v54 = vmul.f32 %v1014_v12, %v342_v31  ;;  %v5779_v57 = vadd.f32 %v5776_v10, %v1070_v58 }
 0x199   : > { %1114 = vmatmul.f32.gmra.mxu3 %v1030_v54  ;;  %v5782_v42 = vmul.f32 0.70710677, %v5779_v57 }
 0x19b   : > { %v1150_v5 = vmul.f32 %v5782_v42, %v5782_v42 }
 0x19d   : > { %v5786_v49 = vmin.f32 %v1150_v5, 16.0 }
 0x19f   : > { %v1163_v45 = vmul.f32 3.8918573e-05, %v5786_v49  ;;  %v1152_v46 = vmul.f32 2.1237322e-06, %v5786_v49 }
 0x1a1   : > { %v1164_v40 = vadd.f32 0.001143296, %v1163_v45  ;;  %v1153_v35 = vadd.f32 0.00028619796, %v1152_v46 }
 0x1a3   : > { %v1165_v32 = vmul.f32 %v1164_v40, %v5786_v49  ;;  %v1154_v23 = vmul.f32 %v1153_v35, %v5786_v49  ;;  %v1829_v40 = vld [vmem:[#allocation5 + $0x130] sm:$0xff] }
 0x1a4   : > { %1853 = vmatpush.msrb.mxu2 %v1829_v40 }
 0x1a5   : > { %v1166_v38 = vadd.f32 0.014752088, %v1165_v32  ;;  %v1155_v18 = vadd.f32 0.0036580483, %v1154_v23 }
 0x1a6   : > { %1854 = vmatpush.msrb.mxu2 %v1828_v56 }
 0x1a7   : > { %v1167_v0 = vmul.f32 %v1166_v38, %v5786_v49  ;;  %v1156_v11 = vmul.f32 %v1155_v18, %v5786_v49 }
 0x1a9   : > { %v1168_v25 = vadd.f32 0.112945676, %v1167_v0  ;;  %v1157_v7 = vadd.f32 0.05243302, %v1156_v11 }
 0x1ab   : > { %v1169_v21 = vmul.f32 %v1168_v25, %v5786_v49  ;;  %v1158_v55 = vmul.f32 %v1157_v7, %v5786_v49 }
 0x1ad   : > { %v1170_v51 = vadd.f32 0.4994258, %v1169_v21  ;;  %v1159_v5 = vadd.f32 0.18741608, %v1158_v55  ;;  %v1827_v55 = vld [vmem:[#allocation5 + $0x120] sm:$0xff] }
 0x1ae   : > { %1855 = vmatpush.msrb.mxu2 %v1827_v55 }
 0x1af   : > { %v1171_v26 = vmul.f32 %v1170_v51, %v5786_v49  ;;  %v1160_v63 = vmul.f32 %v1159_v5, %v5786_v49 }
 0x1b1   : > { %v5798_v8 = vadd.f32 1.0, %v1171_v26 }
 0x1b3   : > { %4649 = vrcp.f32 %v5798_v8  ;;  %vm1178_vm1 = vweird.f32 %v5798_v8 }
 0x1b9   : > { %v5825_v2 = vpop.eup %4649 }
 0x1ba   : > { %v1174_v34 = vmul.f32 %v5825_v2, %v5798_v8  ;;  %vm1179_vm0 = vweird.f32 %v5825_v2 }
 0x1bb   : > { %vm1180_vm2 = vmor %vm1178_vm1, %vm1179_vm0 }
 0x1bc   : > { %v1175_v15 = vsub.f32 1.0, %v1174_v34 }
 0x1bd   : > { %v1094_v4 = vpop.f32.mrf.mxu3 }
 0x1be   : > { %v5801_v22 = vadd.f32 %v5776_v10, %v1094_v4  ;;  %v1176_v32 = vmul.f32 %v5825_v2, %v1175_v15 }
 0x1c0   : > { %v5810_v27 = vmul.f32 0.70710677, %v5801_v22  ;;  %v1177_v4 = vadd.f32 %v5825_v2, %v1176_v32 }
 0x1c1   : > { %v1073_v48 = vpop.f32.mrf.mxu1 }
 0x1c2   : > { %v5795_v44 = vadd.f32 %v5776_v10, %v1073_v48  ;;  %v1470_v33 = vmul.f32 %v5810_v27, %v5810_v27  ;;  %v1184_v48 = vand.u32 2147483648, %v5798_v8 }
 0x1c4   : > { %v5804_v52 = vmul.f32 0.70710677, %v5795_v44  ;;  %v5830_v13 = vmin.f32 %v1470_v33, 16.0  ;;  %v1161_v33 = vadd.f32 1.1283791, %v1160_v63 }
 0x1c6   : > { %v1190_v59 = vmul.f32 %v5804_v52, %v5804_v52  ;;  %v1472_v62 = vmul.f32 2.1237322e-06, %v5830_v13 }
 0x1c8   : > { %v5812_v29 = vmin.f32 %v1190_v59, 16.0  ;;  %v1473_v45 = vadd.f32 0.00028619796, %v1472_v62  ;;  %v1826_v62 = vld [vmem:[#allocation5 + $0x118] sm:$0xff] }
 0x1c9   : > { %v1076_v30 = vpop.f32.mrf.mxu1  ;;  %1856 = vmatpush.msrb.mxu2 %v1826_v62 }
 0x1ca   : > { %v1192_v28 = vmul.f32 2.1237322e-06, %v5812_v29  ;;  %v5816_v41 = vadd.f32 %v5776_v10, %v1076_v30  ;;  %v1203_v36 = vmul.f32 3.8918573e-05, %v5812_v29  ;;  %v1474_v35 = vmul.f32 %v1473_v45, %v5830_v13 }
 0x1cb   : > { %v1097_v43 = vpop.f32.mrf.mxu3  ;;  %v1182_v30 = vand.u32 2147483647, %v5798_v8 }
 0x1cc   : > { %v1193_v47 = vadd.f32 0.00028619796, %v1192_v28  ;;  %v5823_v50 = vmul.f32 0.70710677, %v5816_v41  ;;  %v1204_v6 = vadd.f32 0.001143296, %v1203_v36  ;;  %v5838_v20 = vadd.f32 %v5776_v10, %v1097_v43 }
 0x1cd   : > { %v1475_v28 = vadd.f32 0.0036580483, %v1474_v35  ;;  %v1181_v36 = vsel %vm1180_vm2, %v5825_v2, %v1177_v4  ;;  %vm1183_vm3 = vcmp.eq.f32.partialorder %v1182_v30, 8.507059e+37  ;;  %v1162_v2 = vmul.f32 %v1161_v33, %v5782_v42  ;;  %v1825_v4 = vld [vmem:[#allocation5 + $0x110] sm:$0xff] }
 0x1ce   : > { %v1194_v14 = vmul.f32 %v1193_v47, %v5812_v29  ;;  %v1230_v3 = vmul.f32 %v5823_v50, %v5823_v50  ;;  %v1205_v60 = vmul.f32 %v1204_v6, %v5812_v29  ;;  %v5845_v31 = vmul.f32 0.70710677, %v5838_v20  ;;  %1857 = vmatpush.msrb.mxu2 %v1825_v4 }
 0x1cf   : > { %v1185_v47 = vor.u32 1.1754944e-38, %v1184_v48  ;;  %v1476_v34 = vmul.f32 %v1475_v28, %v5830_v13  ;;  %v1483_v4 = vmul.f32 3.8918573e-05, %v5830_v13 }
 0x1d0   : > { %v5835_v53 = vmin.f32 %v1230_v3, 16.0  ;;  %v1195_v1 = vadd.f32 0.0036580483, %v1194_v14  ;;  %v1206_v39 = vadd.f32 0.014752088, %v1205_v60  ;;  %v1510_v38 = vmul.f32 %v5845_v31, %v5845_v31 }
 0x1d1   : > { %v1186_v60 = vsel %vm1183_vm3, %v1185_v47, %v1181_v36  ;;  %v1477_v56 = vadd.f32 0.05243302, %v1476_v34 }
 0x1d2   : > { %v1207_v61 = vmul.f32 %v1206_v39, %v5812_v29  ;;  %v1243_v19 = vmul.f32 3.8918573e-05, %v5835_v53  ;;  %v1196_v16 = vmul.f32 %v1195_v1, %v5812_v29  ;;  %v1232_v12 = vmul.f32 2.1237322e-06, %v5835_v53 }
 0x1d3   : > { %v5863_v23 = vmin.f32 %v1510_v38, 16.0 }
 0x1d4   : > { %v1208_v58 = vadd.f32 0.112945676, %v1207_v61  ;;  %v1244_v54 = vadd.f32 0.001143296, %v1243_v19  ;;  %v1197_v0 = vadd.f32 0.05243302, %v1196_v16 }
 0x1d5   : > { %v1233_v25 = vadd.f32 0.00028619796, %v1232_v12  ;;  %v1512_v43 = vmul.f32 2.1237322e-06, %v5863_v23 }
 0x1d6   : > { %v1209_v17 = vmul.f32 %v1208_v58, %v5812_v29  ;;  %v1245_v24 = vmul.f32 %v1244_v54, %v5835_v53  ;;  %v1198_v59 = vmul.f32 %v1197_v0, %v5812_v29  ;;  %v1187_v54 = vmul.f32 %v1186_v60, %v1162_v2 }
 0x1d7   : > { %v1234_v37 = vmul.f32 %v1233_v25, %v5835_v53  ;;  %v1100_v6 = vpop.f32.mrf.mxu3  ;;  %v1513_v12 = vadd.f32 0.00028619796, %v1512_v43 }
 0x1d8   : > { %v1079_v21 = vpop.f32.mrf.mxu1  ;;  %v1210_v46 = vadd.f32 0.4994258, %v1209_v17  ;;  %v1246_v9 = vadd.f32 0.014752088, %v1245_v24  ;;  %v1199_v14 = vadd.f32 0.18741608, %v1198_v59  ;;  %v5885_v39 = vadd.f32 %v5776_v10, %v1100_v6 }
 0x1d9   : > { %v5854_v51 = vadd.f32 %v5776_v10, %v1079_v21  ;;  %v1235_v3 = vadd.f32 0.0036580483, %v1234_v37  ;;  %v1514_v24 = vmul.f32 %v1513_v12, %v5863_v23  ;;  %v4435_v37 = vclamps-f32 %v1187_v54, 1.0 }
 0x1da   : > { %v1211_v26 = vmul.f32 %v1210_v46, %v5812_v29  ;;  %v1247_v8 = vmul.f32 %v1246_v9, %v5835_v53  ;;  %v1200_v15 = vmul.f32 %v1199_v14, %v5812_v29  ;;  %v5894_v17 = vmul.f32 0.70710677, %v5885_v39 }
 0x1db   : > { %v5868_v18 = vmul.f32 0.70710677, %v5854_v51  ;;  %v1236_v16 = vmul.f32 %v1235_v3, %v5835_v53  ;;  %v1118_v29 = vmul.f32 0.5, %v5779_v57  ;;  %v1790_v43 = vadd.f32 1.0, %v4435_v37 }
 0x1dc   : > { %v5870_v49 = vadd.f32 1.0, %v1211_v26  ;;  %v1248_v61 = vadd.f32 0.112945676, %v1247_v8  ;;  %v1201_v21 = vadd.f32 1.1283791, %v1200_v15  ;;  %v1550_v57 = vmul.f32 %v5894_v17, %v5894_v17  ;;  %v1823_v8 = vld [vmem:[#allocation5 + $0x100] sm:$0xff] }
 0x1dd   : > { %v1270_v11 = vmul.f32 %v5868_v18, %v5868_v18  ;;  %v1237_v46 = vadd.f32 0.05243302, %v1236_v16 }
 0x1de   : > { %4651 = vrcp.f32 %v5870_v49  ;;  %v1249_v40 = vmul.f32 %v1248_v61, %v5835_v53  ;;  %v1224_v63 = vand.u32 2147483648, %v5870_v49  ;;  %v1222_v59 = vand.u32 2147483647, %v5870_v49 }
 0x1df   : > { %v5879_v7 = vmin.f32 %v1270_v11, 16.0  ;;  %vm1218_vm5 = vweird.f32 %v5870_v49  ;;  %v1824_v11 = vld [vmem:[#allocation5 + $0x108] sm:$0xff]  ;;  %v1202_v14 = vmul.f32 %v1201_v21, %v5804_v52  ;;  %v1238_v3 = vmul.f32 %v1237_v46, %v5835_v53 }
 0x1e0   : > { %v1250_v0 = vadd.f32 0.4994258, %v1249_v40  ;;  %1858 = vmatpush.msrb.mxu2 %v1824_v11  ;;  %v1225_v6 = vor.u32 1.1754944e-38, %v1224_v63  ;;  %vm1223_vm7 = vcmp.eq.f32.partialorder %v1222_v59, 8.507059e+37  ;;  %v5924_v61 = vmin.f32 %v1550_v57, 16.0 }
 0x1e1   : > { %v1272_v1 = vmul.f32 2.1237322e-06, %v5879_v7  ;;  %v1283_v58 = vmul.f32 3.8918573e-05, %v5879_v7  ;;  %v1478_v52 = vmul.f32 %v1477_v56, %v5830_v13 }
 0x1e2   : > { %v1251_v30 = vmul.f32 %v1250_v0, %v5835_v53  ;;  %1859 = vmatpush.msrb.mxu2 %v1823_v8 }
 0x1e3   : > { %v1273_v42 = vadd.f32 0.00028619796, %v1272_v1  ;;  %v1284_v25 = vadd.f32 0.001143296, %v1283_v58  ;;  %v1806_v1 = vmul.f32 %v1790_v43, %v1118_v29  ;;  %v1119_v58 = vmul.f32 0.5, %v5795_v44 }
 0x1e4   : > { %v4652_v19 = vpop.eup %4651  ;;  %v1479_v21 = vadd.f32 0.18741608, %v1478_v52 }
 0x1e5   : > { %v1214_v45 = vmul.f32 %v4652_v19, %v5870_v49  ;;  %vm1219_vm4 = vweird.f32 %v4652_v19  ;;  %v1274_v9 = vmul.f32 %v1273_v42, %v5879_v7  ;;  %v1285_v36 = vmul.f32 %v1284_v25, %v5879_v7  ;;  %1860 = vmatmul.f32.vlgmr.msrb.gmra.mxu2 %v1806_v1 }
 0x1e6   : > { %v1082_v5 = vpop.f32.mrf.mxu1  ;;  %v1103_v26 = vpop.f32.mrf.mxu3  ;;  %vm1220_vm6 = vmor %vm1218_vm5, %vm1219_vm4  ;;  %v5918_v49 = vadd.f32 1.0, %v1251_v30  ;;  %v1552_v42 = vmul.f32 2.1237322e-06, %v5924_v61 }
 0x1e7   : > { %v5897_v32 = vadd.f32 %v5776_v10, %v1082_v5  ;;  %v1215_v38 = vsub.f32 1.0, %v1214_v45  ;;  %v5915_v47 = vadd.f32 %v5776_v10, %v1103_v26  ;;  %v1286_v55 = vadd.f32 0.014752088, %v1285_v36 }
 0x1e8   : > { %v1275_v62 = vadd.f32 0.0036580483, %v1274_v9  ;;  %4653 = vrcp.f32 %v5918_v49  ;;  %v1515_v45 = vadd.f32 0.0036580483, %v1514_v24  ;;  %v1553_v57 = vadd.f32 0.00028619796, %v1552_v42 }
 0x1e9   : > { %v5903_v35 = vmul.f32 0.70710677, %v5897_v32  ;;  %v1216_v48 = vmul.f32 %v4652_v19, %v1215_v38  ;;  %v5928_v16 = vmul.f32 0.70710677, %v5915_v47  ;;  %v1287_v5 = vmul.f32 %v1286_v55, %v5879_v7 }
 0x1ea   : > { %v1276_v40 = vmul.f32 %v1275_v62, %v5879_v7  ;;  %v1262_v43 = vand.u32 2147483647, %v5918_v49  ;;  %v1554_v55 = vmul.f32 %v1553_v57, %v5924_v61  ;;  %vm1258_vm9 = vweird.f32 %v5918_v49 }
 0x1eb   : > { %v1310_v28 = vmul.f32 %v5903_v35, %v5903_v35  ;;  %v1217_v33 = vadd.f32 %v4652_v19, %v1216_v48  ;;  %v1590_v38 = vmul.f32 %v5928_v16, %v5928_v16  ;;  %v1288_v0 = vadd.f32 0.112945676, %v1287_v5 }
 0x1ec   : > { %v1516_v48 = vmul.f32 %v1515_v45, %v5863_v23  ;;  %v1277_v59 = vadd.f32 0.05243302, %v1276_v40  ;;  %vm1263_vm11 = vcmp.eq.f32.partialorder %v1262_v43, 8.507059e+37 }
 0x1ed   : > { %v1221_v60 = vsel %vm1220_vm6, %v4652_v19, %v1217_v33  ;;  %v5922_v34 = vmin.f32 %v1310_v28, 16.0  ;;  %v1239_v19 = vadd.f32 0.18741608, %v1238_v3  ;;  %v1289_v24 = vmul.f32 %v1288_v0, %v5879_v7 }
 0x1ee   : > { %v1226_v2 = vsel %vm1223_vm7, %v1225_v6, %v1221_v60  ;;  %v4654_v25 = vpop.eup %4653  ;;  %v5944_v9 = vmin.f32 %v1590_v38, 16.0  ;;  %v1264_v6 = vand.u32 2147483648, %v5918_v49  ;;  %v1517_v1 = vadd.f32 0.05243302, %v1516_v48 }
 0x1ef   : > { %v1227_v15 = vmul.f32 %v1226_v2, %v1202_v14  ;;  %v1312_v54 = vmul.f32 2.1237322e-06, %v5922_v34  ;;  %v1323_v56 = vmul.f32 3.8918573e-05, %v5922_v34  ;;  %v1240_v44 = vmul.f32 %v1239_v19, %v5835_v53 }
 0x1f0   : > { %v1254_v26 = vmul.f32 %v4654_v25, %v5918_v49  ;;  %v1290_v11 = vadd.f32 0.4994258, %v1289_v24  ;;  %vm1259_vm8 = vweird.f32 %v4654_v25  ;;  %v1278_v2 = vmul.f32 %v1277_v59, %v5879_v7 }
 0x1f1   : > { %v4436_v12 = vclamps-f32 %v1227_v15, 1.0  ;;  %v1313_v63 = vadd.f32 0.00028619796, %v1312_v54  ;;  %v1324_v30 = vadd.f32 0.001143296, %v1323_v56  ;;  %vm1260_vm10 = vmor %vm1258_vm9, %vm1259_vm8  ;;  %v5981_v24 = vmul.f32 0.5, %v5801_v22 }
 0x1f2   : > { %v1255_v53 = vsub.f32 1.0, %v1254_v26  ;;  %v1241_v33 = vadd.f32 1.1283791, %v1240_v44  ;;  %v1291_v62 = vmul.f32 %v1290_v11, %v5879_v7  ;;  %v1592_v15 = vmul.f32 2.1237322e-06, %v5944_v9 }
 0x1f3   : > { %v1791_v29 = vadd.f32 1.0, %v4436_v12  ;;  %v1325_v14 = vmul.f32 %v1324_v30, %v5922_v34  ;;  %v1314_v3 = vmul.f32 %v1313_v63, %v5922_v34  ;;  %v1555_v38 = vadd.f32 0.0036580483, %v1554_v55 }
 0x1f4   : > { %v1256_v60 = vmul.f32 %v4654_v25, %v1255_v53  ;;  %v5966_v54 = vadd.f32 1.0, %v1291_v62  ;;  %v1242_v45 = vmul.f32 %v1241_v33, %v5823_v50  ;;  %v1593_v49 = vadd.f32 0.00028619796, %v1592_v15 }
 0x1f5   : > { %v1807_v46 = vmul.f32 %v1791_v29, %v1119_v58  ;;  %v1265_v58 = vor.u32 1.1754944e-38, %v1264_v6  ;;  %v1326_v5 = vadd.f32 0.014752088, %v1325_v14  ;;  %v1315_v40 = vadd.f32 0.0036580483, %v1314_v3 }
 0x1f6   : > { %v1257_v19 = vadd.f32 %v4654_v25, %v1256_v60  ;;  %v1279_v29 = vadd.f32 0.18741608, %v1278_v2  ;;  %4655 = vrcp.f32 %v5966_v54  ;;  %v1480_v63 = vmul.f32 %v1479_v21, %v5830_v13 }
 0x1f7   : > { %1863 = vmatmul.f32.gmra.mxu2 %v1807_v46  ;;  %v1106_v36 = vpop.f32.mrf.mxu3  ;;  %v1120_v48 = vmul.f32 0.5, %v5816_v41  ;;  %v1518_v59 = vmul.f32 %v1517_v1, %v5863_v23  ;;  %v1316_v57 = vmul.f32 %v1315_v40, %v5922_v34  ;;  %v1556_v30 = vmul.f32 %v1555_v38, %v5924_v61 }
 0x1f8   : > { %v1085_v37 = vpop.f32.mrf.mxu1  ;;  %v5961_v52 = vadd.f32 %v5776_v10, %v1106_v36  ;;  %v1261_v42 = vsel %vm1260_vm10, %v4654_v25, %v1257_v19  ;;  %v1327_v25 = vmul.f32 %v1326_v5, %v5922_v34  ;;  %v1484_v53 = vadd.f32 0.001143296, %v1483_v4 }
 0x1f9   : > { %v5947_v28 = vadd.f32 %v5776_v10, %v1085_v37  ;;  %v1266_v56 = vsel %vm1263_vm11, %v1265_v58, %v1261_v42  ;;  %v1280_v37 = vmul.f32 %v1279_v29, %v5879_v7  ;;  %v5992_v11 = vmul.f32 0.5, %v5838_v20 }
 0x1fa   : > { %v5971_v44 = vmul.f32 0.70710677, %v5961_v52  ;;  %v1267_v50 = vmul.f32 %v1266_v56, %v1242_v45  ;;  %v1594_v22 = vmul.f32 %v1593_v49, %v5944_v9  ;;  %v1481_v43 = vadd.f32 1.1283791, %v1480_v63 }
 0x1fb   : > { %v5954_v8 = vmul.f32 0.70710677, %v5947_v28  ;;  %v1328_v14 = vadd.f32 0.112945676, %v1327_v25  ;;  %v1519_v3 = vadd.f32 0.18741608, %v1518_v59  ;;  %v1485_v62 = vmul.f32 %v1484_v53, %v5830_v13 }
 0x1fc   : > { %v1630_v41 = vmul.f32 %v5971_v44, %v5971_v44  ;;  %v4437_v33 = vclamps-f32 %v1267_v50, 1.0  ;;  %v4656_v36 = vpop.eup %4655  ;;  %v1317_v60 = vadd.f32 0.05243302, %v1316_v57  ;;  %v1281_v1 = vadd.f32 1.1283791, %v1280_v37 }
 0x1fd   : > { %v1350_v12 = vmul.f32 %v5954_v8, %v5954_v8  ;;  %v1294_v20 = vmul.f32 %v4656_v36, %v5966_v54  ;;  %v1557_v2 = vadd.f32 0.05243302, %v1556_v30  ;;  %v1595_v15 = vadd.f32 0.0036580483, %v1594_v22 }
 0x1fe   : > { %v1792_v4 = vadd.f32 1.0, %v4437_v33  ;;  %v6004_v19 = vmin.f32 %v1630_v41, 16.0  ;;  %v1304_v42 = vand.u32 2147483648, %v5966_v54  ;;  %v1329_v29 = vmul.f32 %v1328_v14, %v5922_v34 }
 0x1ff   : > { %v5977_v26 = vmin.f32 %v1350_v12, 16.0  ;;  %v1295_v58 = vsub.f32 1.0, %v1294_v20  ;;  %v1109_v40 = vpop.f32.mrf.mxu3  ;;  %v1318_v38 = vmul.f32 %v1317_v60, %v5922_v34  ;;  %vm1299_vm12 = vweird.f32 %v4656_v36 }
 0x200   : > { %v1088_v0 = vpop.f32.mrf.mxu1  ;;  %v1808_v12 = vmul.f32 %v1792_v4, %v1120_v48  ;;  %v1302_v56 = vand.u32 2147483647, %v5966_v54  ;;  %v1330_v63 = vadd.f32 0.4994258, %v1329_v29  ;;  %v1486_v50 = vadd.f32 0.014752088, %v1485_v62 }
 0x201   : > { %v5974_v46 = vadd.f32 %v5776_v10, %v1088_v0  ;;  %v1352_v6 = vmul.f32 2.1237322e-06, %v5977_v26  ;;  %v1296_v0 = vmul.f32 %v4656_v36, %v1295_v58  ;;  %v1632_v25 = vmul.f32 2.1237322e-06, %v6004_v19 }
 0x202   : > { %1866 = vmatmul.f32.gmra.mxu2 %v1808_v12  ;;  %v6013_v48 = vadd.f32 %v5776_v10, %v1109_v40  ;;  %vm1298_vm13 = vweird.f32 %v5966_v54  ;;  %v1305_v30 = vor.u32 1.1754944e-38, %v1304_v42  ;;  %v1331_v53 = vmul.f32 %v1330_v63, %v5922_v34 }
 0x203   : > { %v5989_v21 = vmul.f32 0.70710677, %v5974_v46  ;;  %v1353_v5 = vadd.f32 0.00028619796, %v1352_v6  ;;  %v1297_v59 = vadd.f32 %v4656_v36, %v1296_v0  ;;  %vm1300_vm14 = vmor %vm1298_vm13, %vm1299_vm12  ;;  %v1319_v22 = vadd.f32 0.18741608, %v1318_v38 }
 0x204   : > { %vm1303_vm15 = vcmp.eq.f32.partialorder %v1302_v56, 8.507059e+37  ;;  %v1363_v33 = vmul.f32 3.8918573e-05, %v5977_v26  ;;  %v1282_v6 = vmul.f32 %v1281_v1, %v5868_v18  ;;  %v6022_v60 = vadd.f32 1.0, %v1331_v53 }
 0x205   : > { %v1390_v7 = vmul.f32 %v5989_v21, %v5989_v21  ;;  %v1354_v57 = vmul.f32 %v1353_v5, %v5977_v26  ;;  %v1301_v41 = vsel %vm1300_vm14, %v4656_v36, %v1297_v59  ;;  %v1596_v54 = vmul.f32 %v1595_v15, %v5944_v9 }
 0x206   : > { %v1306_v14 = vsel %vm1303_vm15, %v1305_v30, %v1301_v41  ;;  %v1633_v4 = vadd.f32 0.00028619796, %v1632_v25  ;;  %v6026_v20 = vmul.f32 0.70710677, %v6013_v48  ;;  %v1487_v62 = vmul.f32 %v1486_v50, %v5830_v13 }
 0x207   : > { %v6001_v55 = vmin.f32 %v1390_v7, 16.0  ;;  %v1558_v7 = vmul.f32 %v1557_v2, %v5924_v61  ;;  %v1355_v12 = vadd.f32 0.0036580483, %v1354_v57  ;;  %v1307_v5 = vmul.f32 %v1306_v14, %v1282_v6 }
 0x208   : > { %4657 = vrcp.f32 %v6022_v60  ;;  %v1520_v18 = vmul.f32 %v1519_v3, %v5863_v23  ;;  %v1320_v1 = vmul.f32 %v1319_v22, %v5922_v34  ;;  %v1364_v15 = vadd.f32 0.001143296, %v1363_v33 }
 0x209   : > { %v1392_v45 = vmul.f32 2.1237322e-06, %v6001_v55  ;;  %v1121_v40 = vmul.f32 0.5, %v5854_v51  ;;  %v1559_v42 = vadd.f32 0.18741608, %v1558_v7  ;;  %v4438_v29 = vclamps-f32 %v1307_v5, 1.0 }
 0x20a   : > { %v1597_v38 = vadd.f32 0.05243302, %v1596_v54  ;;  %v1634_v0 = vmul.f32 %v1633_v4, %v6004_v19  ;;  %v1488_v3 = vadd.f32 0.112945676, %v1487_v62  ;;  %v1356_v34 = vmul.f32 %v1355_v12, %v5977_v26 }
 0x20b   : > { %v1393_v49 = vadd.f32 0.00028619796, %v1392_v45  ;;  %v6036_v45 = vmul.f32 %v1481_v43, %v5810_v27  ;;  %v1670_v63 = vmul.f32 %v6026_v20, %v6026_v20  ;;  %v1793_v27 = vadd.f32 1.0, %v4438_v29 }
 0x20c   : > { %v6047_v43 = vadd.f32 1.1283791, %v1520_v18  ;;  %v1321_v51 = vadd.f32 1.1283791, %v1320_v1  ;;  %v1365_v25 = vmul.f32 %v1364_v15, %v5977_v26  ;;  %v6053_v57 = vmul.f32 %v1559_v42, %v5924_v61 }
 0x20d   : > { %v1394_v37 = vmul.f32 %v1393_v49, %v6001_v55  ;;  %v1809_v30 = vmul.f32 %v1793_v27, %v1121_v40  ;;  %v1403_v53 = vmul.f32 3.8918573e-05, %v6001_v55  ;;  %v6060_v22 = vmul.f32 %v1597_v38, %v5944_v9  ;;  %v1112_v12 = vpop.f32.mrf.mxu3 }
 0x20e   : > { %v4658_v59 = vpop.eup %4657  ;;  %v1635_v41 = vadd.f32 0.0036580483, %v1634_v0  ;;  %v1357_v7 = vadd.f32 0.05243302, %v1356_v34  ;;  %v6065_v54 = vmin.f32 %v1670_v63, 16.0  ;;  %v1489_v4 = vmul.f32 %v1488_v3, %v5830_v13 }
 0x20f   : > { %v1395_v36 = vadd.f32 0.0036580483, %v1394_v37  ;;  %v6056_v37 = vmul.f32 0.5, %v5897_v32  ;;  %v1334_v6 = vmul.f32 %v4658_v59, %v6022_v60  ;;  %1869 = vmatmul.f32.gmra.mxu2 %v1809_v30  ;;  %v1322_v32 = vmul.f32 %v1321_v51, %v5903_v35 }
 0x210   : > { %vm1339_vm0 = vweird.f32 %v4658_v59  ;;  %v1342_v5 = vand.u32 2147483647, %v6022_v60  ;;  %v1344_v18 = vand.u32 2147483648, %v6022_v60  ;;  %v1404_v1 = vadd.f32 0.001143296, %v1403_v53 }
 0x211   : > { %v1091_v58 = vpop.f32.mrf.mxu1  ;;  %v1396_v49 = vmul.f32 %v1395_v36, %v6001_v55  ;;  %v1335_v36 = vsub.f32 1.0, %v1334_v6  ;;  %v1358_v38 = vmul.f32 %v1357_v7, %v5977_v26  ;;  %v1672_v35 = vmul.f32 2.1237322e-06, %v6065_v54 }
 0x212   : > { %v6033_v2 = vadd.f32 %v5776_v10, %v1091_v58  ;;  %v1366_v58 = vadd.f32 0.014752088, %v1365_v25  ;;  %v6077_v0 = vadd.f32 %v5776_v10, %v1112_v12  ;;  %vm1338_vm1 = vweird.f32 %v6022_v60 }
 0x213   : > { %v1397_v14 = vadd.f32 0.05243302, %v1396_v49  ;;  %v1336_v40 = vmul.f32 %v4658_v59, %v1335_v36  ;;  %v1405_v63 = vmul.f32 %v1404_v1, %v6001_v55  ;;  %vm1340_vm2 = vmor %vm1338_vm1, %vm1339_vm0  ;;  %vm1343_vm3 = vcmp.eq.f32.partialorder %v1342_v5, 8.507059e+37 }
 0x214   : > { %v6041_v56 = vmul.f32 0.70710677, %v6033_v2  ;;  %v1367_v42 = vmul.f32 %v1366_v58, %v5977_v26  ;;  %v1345_v51 = vor.u32 1.1754944e-38, %v1344_v18  ;;  %v1359_v7 = vadd.f32 0.18741608, %v1358_v38 }
 0x215   : > { %v1337_v34 = vadd.f32 %v4658_v59, %v1336_v40  ;;  %v1398_v27 = vmul.f32 %v1397_v14, %v6001_v55  ;;  %v1406_v6 = vadd.f32 0.014752088, %v1405_v63  ;;  %v6086_v60 = vmul.f32 0.70710677, %v6077_v0 }
 0x216   : > { %v1430_v50 = vmul.f32 %v6041_v56, %v6041_v56  ;;  %v1368_v49 = vadd.f32 0.112945676, %v1367_v42  ;;  %v1636_v18 = vmul.f32 %v1635_v41, %v6004_v19 }
 0x217   : > { %v1341_v30 = vsel %vm1340_vm2, %v4658_v59, %v1337_v34  ;;  %v1407_v5 = vmul.f32 %v1406_v6, %v6001_v55  ;;  %v1399_v1 = vadd.f32 0.18741608, %v1398_v27  ;;  %v1710_v34 = vmul.f32 %v6086_v60, %v6086_v60 }
 0x218   : > { %v6062_v33 = vmin.f32 %v1430_v50, 16.0  ;;  %v1369_v53 = vmul.f32 %v1368_v49, %v5977_v26 }
 0x219   : > { %v1408_v38 = vadd.f32 0.112945676, %v1407_v5  ;;  %v6123_v5 = vmul.f32 0.5, %v5947_v28 }
 0x21a   : > { %v1432_v62 = vmul.f32 2.1237322e-06, %v6062_v33  ;;  %v1443_v29 = vmul.f32 3.8918573e-05, %v6062_v33  ;;  %v1370_v58 = vadd.f32 0.4994258, %v1369_v53 }
 0x21c   : > { %v1433_v15 = vadd.f32 0.00028619796, %v1432_v62  ;;  %v1444_v50 = vadd.f32 0.001143296, %v1443_v29  ;;  %v1346_v62 = vsel %vm1343_vm3, %v1345_v51, %v1341_v30  ;;  %v1371_v29 = vmul.f32 %v1370_v58, %v5977_v26  ;;  %v1115_v6 = vpop.f32.mrf.mxu3 }
 0x21d   : > { %v1347_v14 = vmul.f32 %v1346_v62, %v1322_v32  ;;  %v1599_v51 = vadd.f32 0.18741608, %v6060_v22  ;;  %v1637_v30 = vadd.f32 0.05243302, %v1636_v18  ;;  %v6115_v22 = vadd.f32 1.1283791, %v6053_v57 }
 0x21e   : > { %v1434_v3 = vmul.f32 %v1433_v15, %v6062_v33  ;;  %v1445_v12 = vmul.f32 %v1444_v50, %v6062_v33  ;;  %v1490_v15 = vadd.f32 0.4994258, %v1489_v4  ;;  %v6099_v27 = vadd.f32 1.0, %v1371_v29 }
 0x21f   : > { %v4439_v42 = vclamps-f32 %v1347_v14, 1.0  ;;  %v1409_v4 = vmul.f32 %v1408_v38, %v6001_v55  ;;  %v1400_v50 = vmul.f32 %v1399_v1, %v6001_v55 }
 0x220   : > { %v1435_v25 = vadd.f32 0.0036580483, %v1434_v3  ;;  %v1446_v59 = vadd.f32 0.014752088, %v1445_v12  ;;  %v1360_v3 = vmul.f32 %v1359_v7, %v5977_v26  ;;  %v1491_v49 = vmul.f32 %v1490_v15, %v5830_v13 }
 0x221   : > { %v1794_v41 = vadd.f32 1.0, %v4439_v42  ;;  %4659 = vrcp.f32 %v6099_v27  ;;  %v6110_v13 = vmul.f32 %v6047_v43, %v5845_v31  ;;  %v1673_v12 = vadd.f32 0.00028619796, %v1672_v35 }
 0x222   : > { %v1436_v36 = vmul.f32 %v1435_v25, %v6062_v33  ;;  %v1447_v32 = vmul.f32 %v1446_v59, %v6062_v33  ;;  %v6104_v26 = vadd.f32 1.0, %v1491_v49  ;;  %v1361_v62 = vadd.f32 1.1283791, %v1360_v3 }
 0x223   : > { %v1810_v7 = vmul.f32 %v1794_v41, %v6056_v37  ;;  %v1410_v14 = vadd.f32 0.4994258, %v1409_v4  ;;  %v6120_v37 = vmul.f32 %v1599_v51, %v5944_v9  ;;  %v1401_v31 = vadd.f32 1.1283791, %v1400_v50 }
 0x224   : > { %v1437_v40 = vadd.f32 0.05243302, %v1436_v36  ;;  %v1448_v25 = vadd.f32 0.112945676, %v1447_v32  ;;  %v6112_v36 = vmin.f32 %v1710_v34, 16.0  ;;  %4661 = vrcp.f32 %v6104_v26 }
 0x225   : > { %1872 = vmatmul.f32.gmra.mxu2 %v1810_v7  ;;  %v6126_v43 = vadd.f32 %v5776_v10, %v1115_v6  ;;  %v6129_v35 = vmul.f32 0.5, %v5974_v46  ;;  %v1411_v18 = vmul.f32 %v1410_v14, %v6001_v55  ;;  %v1362_v59 = vmul.f32 %v1361_v62, %v5954_v8 }
 0x226   : > { %v1438_v63 = vmul.f32 %v1437_v40, %v6062_v33  ;;  %v1449_v58 = vmul.f32 %v1448_v25, %v6062_v33  ;;  %v6135_v15 = vmul.f32 %v1637_v30, %v6004_v19  ;;  %v6138_v28 = vmul.f32 %v1673_v12, %v6065_v54 }
 0x227   : > { %v6141_v40 = vmul.f32 2.1237322e-06, %v6112_v36  ;;  %v4660_v10 = vpop.eup %4659  ;;  %v1382_v46 = vand.u32 2147483647, %v6099_v27  ;;  %v1384_v42 = vand.u32 2147483648, %v6099_v27  ;;  %v6145_v29 = vadd.f32 1.0, %v1411_v18 }
 0x228   : > { %v1439_v53 = vadd.f32 0.18741608, %v1438_v63  ;;  %v1450_v1 = vadd.f32 0.4994258, %v1449_v58  ;;  %v6149_v8 = vmul.f32 %v1401_v31, %v5989_v21  ;;  %v6152_v38 = vmul.f32 0.70710677, %v6126_v43 }
 0x229   : > { %v1374_v3 = vmul.f32 %v4660_v10, %v6099_v27  ;;  %vm1378_vm4 = vweird.f32 %v6099_v27  ;;  %4663 = vrcp.f32 %v6145_v29  ;;  %v1502_v49 = vand.u32 2147483647, %v6104_v26 }
 0x22a   : > { %v1440_v57 = vmul.f32 %v1439_v53, %v6062_v33  ;;  %v1451_v55 = vmul.f32 %v1450_v1, %v6062_v33  ;;  %v6156_v34 = vpop.eup %4661  ;;  %v1523_v63 = vmul.f32 3.8918573e-05, %v5863_v23  ;;  %v1563_v4 = vmul.f32 3.8918573e-05, %v5924_v61 }
 0x22b   : > { %v1375_v33 = vsub.f32 1.0, %v1374_v3  ;;  %v1494_v21 = vmul.f32 %v6156_v34, %v6104_v26  ;;  %vm6166_vm5 = vcmp.eq.f32.partialorder %v1382_v46, 8.507059e+37  ;;  %v1385_v50 = vor.u32 1.1754944e-38, %v1384_v42 }
 0x22c   : > { %v1441_v32 = vadd.f32 1.1283791, %v1440_v57  ;;  %v6161_v41 = vadd.f32 1.0, %v1451_v55  ;;  %v1424_v25 = vand.u32 2147483648, %v6145_v29  ;;  %v1504_v30 = vand.u32 2147483648, %v6104_v26 }
 0x22d   : > { %v1376_v53 = vmul.f32 %v4660_v10, %v1375_v33  ;;  %vm1379_vm6 = vweird.f32 %v4660_v10  ;;  %v1422_v6 = vand.u32 2147483647, %v6145_v29  ;;  %v1495_v62 = vsub.f32 1.0, %v1494_v21 }
 0x22e   : > { %4665 = vrcp.f32 %v6161_v41  ;;  %v6175_v7 = vmul.f32 %v1441_v32, %v6041_v56  ;;  %vm1498_vm7 = vweird.f32 %v6104_v26  ;;  %v1524_v12 = vadd.f32 0.001143296, %v1523_v63  ;;  %vm1380_vm10 = vmor %vm1378_vm4, %vm1379_vm6 }
 0x22f   : > { %v1377_v14 = vadd.f32 %v4660_v10, %v1376_v53  ;;  %vm1418_vm8 = vweird.f32 %v6145_v29  ;;  %vm6179_vm9 = vcmp.eq.f32.partialorder %v1502_v49, 8.507059e+37  ;;  %v1564_v31 = vadd.f32 0.001143296, %v1563_v4  ;;  %v4664_v18 = vpop.eup %4663 }
 0x230   : > { %v1603_v57 = vmul.f32 3.8918573e-05, %v5944_v9  ;;  %v1425_v56 = vor.u32 1.1754944e-38, %v1424_v25  ;;  %v1462_v1 = vand.u32 2147483647, %v6161_v41  ;;  %v1496_v46 = vmul.f32 %v6156_v34, %v1495_v62 }
 0x231   : > { %v1525_v42 = vmul.f32 %v1524_v12, %v5863_v23  ;;  %v1381_v55 = vsel %vm1380_vm10, %v4660_v10, %v1377_v14  ;;  %v1414_v3 = vmul.f32 %v4664_v18, %v6145_v29  ;;  %vm6190_vm11 = vcmp.eq.f32.partialorder %v1422_v6, 8.507059e+37 }
 0x232   : > { %vm1499_vm12 = vweird.f32 %v6156_v34  ;;  %v1505_v49 = vor.u32 1.1754944e-38, %v1504_v30  ;;  %v1386_v27 = vsel %vm6166_vm5, %v1385_v50, %v1381_v55  ;;  %vm1458_vm13 = vweird.f32 %v6161_v41 }
 0x233   : > { %v1497_v63 = vadd.f32 %v6156_v34, %v1496_v46  ;;  %v1526_v33 = vadd.f32 0.014752088, %v1525_v42  ;;  %v1565_v21 = vmul.f32 %v1564_v31, %v5924_v61  ;;  %v1387_v4 = vmul.f32 %v1386_v27, %v1362_v59  ;;  %vm6210_vm0 = vmor %vm1498_vm7, %vm1499_vm12 }
 0x234   : > { %v4666_v10 = vpop.eup %4665  ;;  %v1415_v25 = vsub.f32 1.0, %v1414_v3  ;;  %v1464_v53 = vand.u32 2147483648, %v6161_v41  ;;  %v1604_v6 = vadd.f32 0.001143296, %v1603_v57  ;;  %vm1419_vm14 = vweird.f32 %v4664_v18 }
 0x235   : > { %v1454_v62 = vmul.f32 %v4666_v10, %v6161_v41  ;;  %vm6202_vm15 = vcmp.eq.f32.partialorder %v1462_v1, 8.507059e+37  ;;  %v1527_v59 = vmul.f32 %v1526_v33, %v5863_v23  ;;  %v4440_v50 = vclamps-f32 %v1387_v4, 1.0  ;;  %vm1420_vm2 = vmor %vm1418_vm8, %vm1419_vm14 }
 0x236   : > { %v1416_v12 = vmul.f32 %v4664_v18, %v1415_v25  ;;  %v1501_v14 = vsel %vm6210_vm0, %v6156_v34, %v1497_v63  ;;  %v1566_v31 = vadd.f32 0.014752088, %v1565_v21  ;;  %vm1459_vm1 = vweird.f32 %v4666_v10 }
 0x237   : > { %v1455_v57 = vsub.f32 1.0, %v1454_v62  ;;  %v1528_v1 = vadd.f32 0.112945676, %v1527_v59  ;;  %v1605_v46 = vmul.f32 %v1604_v6, %v5944_v9  ;;  %v1795_v42 = vadd.f32 1.0, %v4440_v50  ;;  %vm1460_vm3 = vmor %vm1458_vm13, %vm1459_vm1 }
 0x238   : > { %v1417_v26 = vadd.f32 %v4664_v18, %v1416_v12  ;;  %v1567_v55 = vmul.f32 %v1566_v31, %v5924_v61  ;;  %v1643_v3 = vmul.f32 3.8918573e-05, %v6004_v19  ;;  %v1506_v34 = vsel %vm6179_vm9, %v1505_v49, %v1501_v14 }
 0x239   : > { %v1456_v27 = vmul.f32 %v4666_v10, %v1455_v57  ;;  %v1529_v63 = vmul.f32 %v1528_v1, %v5863_v23  ;;  %v1606_v33 = vadd.f32 0.014752088, %v1605_v46  ;;  %v1811_v21 = vmul.f32 %v1795_v42, %v6123_v5 }
 0x23a   : > { %v1421_v4 = vsel %vm1420_vm2, %v4664_v18, %v1417_v26  ;;  %v1568_v25 = vadd.f32 0.112945676, %v1567_v55  ;;  %v1644_v6 = vadd.f32 0.001143296, %v1643_v3  ;;  %v1465_v59 = vor.u32 1.1754944e-38, %v1464_v53 }
 0x23b   : > { %v1426_v62 = vsel %vm6190_vm11, %v1425_v56, %v1421_v4  ;;  %v1457_v51 = vadd.f32 %v4666_v10, %v1456_v27  ;;  %v1530_v50 = vadd.f32 0.4994258, %v1529_v63  ;;  %1875 = vmatmul.f32.gmra.mxu2 %v1811_v21  ;;  %v1607_v5 = vmul.f32 %v1606_v33, %v5944_v9 }
 0x23c   : > { %v1427_v29 = vmul.f32 %v1426_v62, %v6149_v8  ;;  %v1569_v58 = vmul.f32 %v1568_v25, %v5924_v61  ;;  %v1645_v18 = vmul.f32 %v1644_v6, %v6004_v19  ;;  %v1507_v32 = vmul.f32 %v1506_v34, %v6036_v45 }
 0x23d   : > { %v1461_v49 = vsel %vm1460_vm3, %v4666_v10, %v1457_v51  ;;  %v1531_v56 = vmul.f32 %v1530_v50, %v5863_v23  ;;  %v1683_v53 = vmul.f32 3.8918573e-05, %v6065_v54  ;;  %v1608_v41 = vadd.f32 0.112945676, %v1607_v5 }
 0x23e   : > { %v4441_v12 = vclamps-f32 %v1427_v29, 1.0  ;;  %v1466_v8 = vsel %vm6202_vm15, %v1465_v59, %v1461_v49  ;;  %v1570_v14 = vadd.f32 0.4994258, %v1569_v58  ;;  %v1646_v1 = vadd.f32 0.014752088, %v1645_v18 }
 0x23f   : > { %v1467_v31 = vmul.f32 %v1466_v8, %v6175_v7  ;;  %v6243_v57 = vadd.f32 1.0, %v1531_v56  ;;  %v1684_v46 = vadd.f32 0.001143296, %v1683_v53  ;;  %v1639_v10 = vadd.f32 0.18741608, %v6135_v15 }
 0x240   : > { %v1796_v42 = vadd.f32 1.0, %v4441_v12  ;;  %v1571_v45 = vmul.f32 %v1570_v14, %v5924_v61  ;;  %v1609_v23 = vmul.f32 %v1608_v41, %v5944_v9  ;;  %v1750_v26 = vmul.f32 %v6152_v38, %v6152_v38 }
 0x241   : > { %v4442_v30 = vclamps-f32 %v1467_v31, 1.0  ;;  %v4443_v55 = vclamps-f32 %v1507_v32, 1.0  ;;  %4667 = vrcp.f32 %v6243_v57  ;;  %v1723_v34 = vmul.f32 3.8918573e-05, %v6112_v36 }
 0x242   : > { %v1812_v7 = vmul.f32 %v1796_v42, %v6129_v35  ;;  %v6252_v3 = vadd.f32 1.0, %v1571_v45  ;;  %v1610_v27 = vadd.f32 0.4994258, %v1609_v23  ;;  %v1675_v15 = vadd.f32 0.0036580483, %v6138_v28 }
 0x243   : > { %v1713_v61 = vadd.f32 0.00028619796, %v6141_v40  ;;  %v1647_v63 = vmul.f32 %v1646_v1, %v6004_v19  ;;  %v1685_v33 = vmul.f32 %v1684_v46, %v6065_v54  ;;  %v6261_v21 = vmul.f32 %v6115_v22, %v5894_v17 }
 0x244   : > { %v6264_v4 = vadd.f32 1.1283791, %v6120_v37  ;;  %1878 = vmatmul.f32.gmra.mxu2 %v1812_v7  ;;  %v1797_v35 = vadd.f32 1.0, %v4442_v30  ;;  %4669 = vrcp.f32 %v6252_v3  ;;  %v6268_v25 = vmul.f32 %v1639_v10, %v6004_v19 }
 0x245   : > { %v6270_v28 = vmin.f32 %v1750_v26, 16.0  ;;  %v1611_v40 = vmul.f32 %v1610_v27, %v5944_v9  ;;  %v1648_v6 = vadd.f32 0.112945676, %v1647_v63  ;;  %v1125_v62 = vmul.f32 0.5, %v6033_v2 }
 0x246   : > { %v1798_v51 = vadd.f32 1.0, %v4443_v55  ;;  %v1686_v17 = vadd.f32 0.014752088, %v1685_v33  ;;  %v1724_v22 = vadd.f32 0.001143296, %v1723_v34  ;;  %v6275_v37 = vmul.f32 %v1675_v15, %v6065_v54 }
 0x247   : > { %v4668_v59 = vpop.eup %4667  ;;  %v6278_v50 = vmul.f32 %v1713_v61, %v6112_v36  ;;  %v6280_v29 = vadd.f32 1.0, %v1611_v40  ;;  %v1649_v58 = vmul.f32 %v1648_v6, %v6004_v19  ;;  %v1813_v5 = vmul.f32 %v1797_v35, %v1125_v62 }
 0x248   : > { %v1534_v9 = vmul.f32 %v4668_v59, %v6243_v57  ;;  %v1687_v18 = vmul.f32 %v1686_v17, %v6065_v54  ;;  %v1725_v2 = vmul.f32 %v1724_v22, %v6112_v36  ;;  %v6287_v49 = vmul.f32 2.1237322e-06, %v6270_v28 }
 0x249   : > { %v1544_v32 = vand.u32 2147483648, %v6243_v57  ;;  %4671 = vrcp.f32 %v6280_v29  ;;  %v1763_v56 = vmul.f32 3.8918573e-05, %v6270_v28  ;;  %v1814_v12 = vmul.f32 %v1798_v51, %v5981_v24 }
 0x24a   : > { %v4670_v53 = vpop.eup %4669  ;;  %v1535_v8 = vsub.f32 1.0, %v1534_v9  ;;  %v1650_v14 = vadd.f32 0.4994258, %v1649_v58  ;;  %v1688_v41 = vadd.f32 0.112945676, %v1687_v18  ;;  %vm1538_vm4 = vweird.f32 %v6243_v57 }
 0x24b   : > { %vm1539_vm5 = vweird.f32 %v4668_v59  ;;  %v1542_v31 = vand.u32 2147483647, %v6243_v57  ;;  %v1574_v1 = vmul.f32 %v4670_v53, %v6252_v3  ;;  %v1726_v45 = vadd.f32 0.014752088, %v1725_v2 }
 0x24c   : > { %1881 = vmatmul.f32.gmra.mxu2 %v1813_v5  ;;  %v1536_v46 = vmul.f32 %v4668_v59, %v1535_v8  ;;  %v1651_v10 = vmul.f32 %v1650_v14, %v6004_v19  ;;  %v1689_v42 = vmul.f32 %v1688_v41, %v6065_v54  ;;  %v1545_v23 = vor.u32 1.1754944e-38, %v1544_v32  ;;  %vm1540_vm6 = vmor %vm1538_vm4, %vm1539_vm5 }
 0x24d   : > { %v1575_v26 = vsub.f32 1.0, %v1574_v1  ;;  %v1582_v24 = vand.u32 2147483647, %v6252_v3  ;;  %v1764_v30 = vadd.f32 0.001143296, %v1763_v56  ;;  %v1584_v7 = vand.u32 2147483648, %v6252_v3 }
 0x24e   : > { %v1537_v55 = vadd.f32 %v4668_v59, %v1536_v46  ;;  %v6300_v27 = vadd.f32 1.0, %v1651_v10  ;;  %v1690_v34 = vadd.f32 0.4994258, %v1689_v42  ;;  %vm1579_vm7 = vweird.f32 %v4670_v53 }
 0x24f   : > { %v4672_v15 = vpop.eup %4671  ;;  %v1576_v19 = vmul.f32 %v4670_v53, %v1575_v26  ;;  %v1727_v61 = vmul.f32 %v1726_v45, %v6112_v36  ;;  %v1765_v63 = vmul.f32 %v1764_v30, %v6270_v28  ;;  %vm1543_vm8 = vcmp.eq.f32.partialorder %v1542_v31, 8.507059e+37 }
 0x250   : > { %v1541_v33 = vsel %vm1540_vm6, %v4668_v59, %v1537_v55  ;;  %v1614_v35 = vmul.f32 %v4672_v15, %v6280_v29  ;;  %4673 = vrcp.f32 %v6300_v27  ;;  %vm1578_vm9 = vweird.f32 %v6252_v3 }
 0x251   : > { %v1546_v40 = vsel %vm1543_vm8, %v1545_v23, %v1541_v33  ;;  %v1577_v6 = vadd.f32 %v4670_v53, %v1576_v19  ;;  %vm1583_vm10 = vcmp.eq.f32.partialorder %v1582_v24, 8.507059e+37  ;;  %vm1580_vm11 = vmor %vm1578_vm9, %vm1579_vm7  ;;  %v1585_v62 = vor.u32 1.1754944e-38, %v1584_v7 }
 0x252   : > { %v1547_v57 = vmul.f32 %v1546_v40, %v6110_v13  ;;  %v1615_v51 = vsub.f32 1.0, %v1614_v35  ;;  %v1691_v17 = vmul.f32 %v1690_v34, %v6065_v54  ;;  %vm1618_vm12 = vweird.f32 %v6280_v29 }
 0x253   : > { %v1581_v22 = vsel %vm1580_vm11, %v4670_v53, %v1577_v6  ;;  %v1728_v59 = vadd.f32 0.112945676, %v1727_v61  ;;  %v1766_v58 = vadd.f32 0.014752088, %v1765_v63  ;;  %vm1619_vm13 = vweird.f32 %v4672_v15 }
 0x254   : > { %1884 = vmatmul.f32.gmra.mxu2 %v1814_v12  ;;  %v4444_v5 = vclamps-f32 %v1547_v57, 1.0  ;;  %v1586_v9 = vsel %vm1583_vm10, %v1585_v62, %v1581_v22  ;;  %v1616_v18 = vmul.f32 %v4672_v15, %v1615_v51  ;;  %v1622_v2 = vand.u32 2147483647, %v6280_v29  ;;  %vm6324_vm14 = vmor %vm1618_vm12, %vm1619_vm13 }
 0x255   : > { %v1587_v3 = vmul.f32 %v1586_v9, %v6261_v21  ;;  %v1624_v13 = vand.u32 2147483648, %v6280_v29  ;;  %v6316_v32 = vadd.f32 1.0, %v1691_v17  ;;  %v1729_v14 = vmul.f32 %v1728_v59, %v6112_v36 }
 0x256   : > { %v4674_v56 = vpop.eup %4673  ;;  %v1799_v8 = vadd.f32 1.0, %v4444_v5  ;;  %v1617_v53 = vadd.f32 %v4672_v15, %v1616_v18  ;;  %v1767_v41 = vmul.f32 %v1766_v58, %v6270_v28  ;;  %v1677_v12 = vadd.f32 0.05243302, %v6275_v37 }
 0x257   : > { %v1715_v31 = vadd.f32 0.0036580483, %v6278_v50  ;;  %v1654_v1 = vmul.f32 %v4674_v56, %v6300_v27  ;;  %4675 = vrcp.f32 %v6316_v32  ;;  %v1128_v46 = vmul.f32 0.5, %v5885_v39 }
 0x258   : > { %v1602_v10 = vmul.f32 %v6264_v4, %v5928_v16  ;;  %v1753_v42 = vadd.f32 0.00028619796, %v6287_v49  ;;  %v1621_v37 = vsel %vm6324_vm14, %v4672_v15, %v1617_v53  ;;  %v1641_v50 = vadd.f32 1.1283791, %v6268_v25 }
 0x259   : > { %vm1623_vm15 = vcmp.eq.f32.partialorder %v1622_v2, 8.507059e+37  ;;  %v1625_v29 = vor.u32 1.1754944e-38, %v1624_v13  ;;  %v1655_v45 = vsub.f32 1.0, %v1654_v1  ;;  %v1815_v23 = vmul.f32 %v1799_v8, %v5992_v11 }
 0x25a   : > { %v4445_v26 = vclamps-f32 %v1587_v3, 1.0  ;;  %v1730_v24 = vadd.f32 0.4994258, %v1729_v14  ;;  %v1768_v30 = vadd.f32 0.112945676, %v1767_v41  ;;  %v1678_v39 = vmul.f32 %v1677_v12, %v6065_v54 }
 0x25b   : > { %v1716_v55 = vmul.f32 %v1715_v31, %v6112_v36  ;;  %v1626_v16 = vsel %vm1623_vm15, %v1625_v29, %v1621_v37  ;;  %v1656_v4 = vmul.f32 %v4674_v56, %v1655_v45  ;;  %v1754_v49 = vmul.f32 %v1753_v42, %v6270_v28 }
 0x25c   : > { %1887 = vmatmul.f32.gmra.mxu2 %v1815_v23  ;;  %vm1659_vm0 = vweird.f32 %v4674_v56  ;;  %v1731_v25 = vmul.f32 %v1730_v24, %v6112_v36  ;;  %v1769_v7 = vmul.f32 %v1768_v30, %v6270_v28  ;;  %vm1658_vm1 = vweird.f32 %v6300_v27 }
 0x25d   : > { %v4676_v34 = vpop.eup %4675  ;;  %v1657_v15 = vadd.f32 %v4674_v56, %v1656_v4  ;;  %v1662_v11 = vand.u32 2147483647, %v6300_v27  ;;  %v1664_v19 = vand.u32 2147483648, %v6300_v27  ;;  %v1800_v61 = vadd.f32 1.0, %v4445_v26  ;;  %vm6349_vm2 = vmor %vm1658_vm1, %vm1659_vm0 }
 0x25e   : > { %v1627_v63 = vmul.f32 %v1626_v16, %v1602_v10  ;;  %v1694_v33 = vmul.f32 %v4676_v34, %v6316_v32  ;;  %v6347_v35 = vadd.f32 1.0, %v1731_v25  ;;  %v1679_v40 = vadd.f32 0.18741608, %v1678_v39  ;;  %v2629_v39 = vld [vmem:[#allocation5 + $0x1f8] sm:$0xff]  ;;  %v6374_v25 = vld [vmem:[#allocation7 + $0x2] ss:$0 sm:$0xff] }
 0x25f   : > { %v1717_v6 = vadd.f32 0.05243302, %v1716_v55  ;;  %v1770_v62 = vadd.f32 0.4994258, %v1769_v7  ;;  %v1755_v51 = vadd.f32 0.0036580483, %v1754_v49  ;;  %v1661_v17 = vsel %vm6349_vm2, %v4674_v56, %v1657_v15  ;;  %2635 = vmatpush.msrb.mxu3 %v2629_v39 }
 0x260   : > { %v1695_v22 = vsub.f32 1.0, %v1694_v33  ;;  %4677 = vrcp.f32 %v6347_v35  ;;  %vm1663_vm3 = vcmp.eq.f32.partialorder %v1662_v11, 8.507059e+37  ;;  %v1665_v27 = vor.u32 1.1754944e-38, %v1664_v19  ;;  %v2628_v55 = vld [vmem:[#allocation5 + $0x1f0] sm:$0xff] }
 0x261   : > { %v1816_v59 = vmul.f32 %v1800_v61, %v1128_v46  ;;  %v4446_v58 = vclamps-f32 %v1627_v63, 1.0  ;;  %v1771_v9 = vmul.f32 %v1770_v62, %v6270_v28  ;;  %v1642_v18 = vmul.f32 %v1641_v50, %v5971_v44  ;;  %2636 = vmatpush.msrb.mxu3 %v2628_v55 }
 0x262   : > { %v1696_v5 = vmul.f32 %v4676_v34, %v1695_v22  ;;  %v1680_v3 = vmul.f32 %v1679_v40, %v6065_v54  ;;  %v1718_v2 = vmul.f32 %v1717_v6, %v6112_v36  ;;  %v1666_v13 = vsel %vm1663_vm3, %v1665_v27, %v1661_v17 }
 0x263   : > { %v1756_v8 = vmul.f32 %v1755_v51, %v6270_v28  ;;  %vm1699_vm4 = vweird.f32 %v4676_v34  ;;  %v6361_v53 = vadd.f32 1.0, %v1771_v9  ;;  %vm1698_vm5 = vweird.f32 %v6316_v32 }
 0x264   : > { %1890 = vmatmul.f32.gmra.mxu2 %v1816_v59  ;;  %v1697_v56 = vadd.f32 %v4676_v34, %v1696_v5  ;;  %v1704_v14 = vand.u32 2147483648, %v6316_v32  ;;  %v1801_v12 = vadd.f32 1.0, %v4446_v58  ;;  %v1667_v31 = vmul.f32 %v1666_v13, %v1642_v18  ;;  %vm1700_vm6 = vmor %vm1698_vm5, %vm1699_vm4 }
 0x265   : > { %v1702_v44 = vand.u32 2147483647, %v6316_v32  ;;  %4679 = vrcp.f32 %v6361_v53  ;;  %v1129_v54 = vmul.f32 0.5, %v5915_v47  ;;  %v1681_v1 = vadd.f32 1.1283791, %v1680_v3 }
 0x266   : > { %v4678_v41 = vpop.eup %4677  ;;  %v1719_v46 = vadd.f32 0.18741608, %v1718_v2  ;;  %v1757_v10 = vadd.f32 0.05243302, %v1756_v8  ;;  %v1701_v42 = vsel %vm1700_vm6, %v4676_v34, %v1697_v56  ;;  %v1705_v37 = vor.u32 1.1754944e-38, %v1704_v14 }
 0x267   : > { %v1734_v21 = vmul.f32 %v4678_v41, %v6347_v35  ;;  %v1817_v29 = vmul.f32 %v1801_v12, %v1129_v54  ;;  %v4447_v45 = vclamps-f32 %v1667_v31, 1.0  ;;  %vm1703_vm7 = vcmp.eq.f32.partialorder %v1702_v44, 8.507059e+37  ;;  %v2626_v44 = vld [vmem:[#allocation5 + $0x1e0] sm:$0xff]  ;;  %v2625_v54 = vld [vmem:[#allocation5 + $0x1d8] sm:$0xff] }
 0x268   : > { %v1706_v23 = vsel %vm1703_vm7, %v1705_v37, %v1701_v42  ;;  %v1682_v32 = vmul.f32 %v1681_v1, %v6026_v20  ;;  %v1720_v30 = vmul.f32 %v1719_v46, %v6112_v36  ;;  %v1758_v47 = vmul.f32 %v1757_v10, %v6270_v28  ;;  %v2627_v36 = vld [vmem:[#allocation5 + $0x1e8] sm:$0xff]  ;;  %v1861_v15 = vpop.f32.mrf.mxu2  ;;  %v2624_v46 = vld [vmem:[#allocation5 + $0x1d0] sm:$0xff] }
 0x269   : > { %v1735_v50 = vsub.f32 1.0, %v1734_v21  ;;  %vm1739_vm8 = vweird.f32 %v4678_v41  ;;  %v1744_v4 = vand.u32 2147483648, %v6347_v35  ;;  %v1802_v7 = vadd.f32 1.0, %v4447_v45  ;;  %2637 = vmatpush.msrb.mxu3 %v2627_v36  ;;  %v2623_v10 = vld [vmem:[#allocation5 + $0x1c8] sm:$0xff]  ;;  %v2622_v45 = vld [vmem:[#allocation5 + $0x1c0] sm:$0xff] }
 0x26a   : > { %v1707_v34 = vmul.f32 %v1706_v23, %v1682_v32  ;;  %vm1738_vm9 = vweird.f32 %v6347_v35  ;;  %v1742_v20 = vand.u32 2147483647, %v6347_v35  ;;  %v6383_v61 = vadd.f32 %v6374_v25, %v1861_v15  ;;  %v2621_v23 = vld [vmem:[#allocation5 + $0x1b8] sm:$0xff] }
 0x26b   : > { %v1736_v26 = vmul.f32 %v4678_v41, %v1735_v50  ;;  %v4680_v24 = vpop.eup %4679  ;;  %vm6378_vm10 = vmor %vm1738_vm9, %vm1739_vm8  ;;  %v1130_v63 = vmul.f32 0.5, %v5961_v52  ;;  %v1721_v33 = vadd.f32 1.1283791, %v1720_v30  ;;  %v1759_v40 = vadd.f32 0.18741608, %v1758_v47  ;;  %2638 = vmatpush.msrb.mxu3 %v2626_v44 }
 0x26c   : > { %1893 = vmatmul.f32.gmra.mxu2 %v1817_v29  ;;  %v1774_v49 = vmul.f32 %v4680_v24, %v6361_v53  ;;  %v1745_v57 = vor.u32 1.1754944e-38, %v1744_v4  ;;  %v6389_v62 = vmul.f32 0.70710677, %v6383_v61  ;;  %v4448_v17 = vclamps-f32 %v1707_v34, 1.0  ;;  %v2619_v4 = vld [vmem:[#allocation5 + $0x1a8] sm:$0xff] }
 0x26d   : > { %v1737_v16 = vadd.f32 %v4678_v41, %v1736_v26  ;;  %v1818_v51 = vmul.f32 %v1802_v7, %v1130_v63  ;;  %vm1743_vm11 = vcmp.eq.f32.partialorder %v1742_v20, 8.507059e+37  ;;  %v1722_v52 = vmul.f32 %v1721_v33, %v6086_v60  ;;  %2639 = vmatpush.msrb.mxu3 %v2625_v54  ;;  %v2618_v63 = vld [vmem:[#allocation5 + $0x1a0] sm:$0xff]  ;;  %v2617_v33 = vld [vmem:[#allocation5 + $0x198] sm:$0xff] }
 0x26e   : > { %v1775_v19 = vsub.f32 1.0, %v1774_v49  ;;  %v1941_v27 = vmul.f32 %v6389_v62, %v6389_v62  ;;  %v1760_v59 = vmul.f32 %v1759_v40, %v6270_v28  ;;  %vm1779_vm12 = vweird.f32 %v4680_v24 }
 0x26f   : > { %v1741_v6 = vsel %vm6378_vm10, %v4678_v41, %v1737_v16  ;;  %v1784_v5 = vand.u32 2147483648, %v6361_v53  ;;  %v1803_v18 = vadd.f32 1.0, %v4448_v17  ;;  %vm1778_vm13 = vweird.f32 %v6361_v53  ;;  %2640 = vmatpush.msrb.mxu3 %v2624_v46  ;;  %v2620_v16 = vld [vmem:[#allocation5 + $0x1b0] sm:$0xff] }
 0x270   : > { %v1776_v35 = vmul.f32 %v4680_v24, %v1775_v19  ;;  %v1746_v22 = vsel %vm1743_vm11, %v1745_v57, %v1741_v6  ;;  %v6396_v9 = vmin.f32 %v1941_v27, 16.0  ;;  %v1782_v2 = vand.u32 2147483647, %v6361_v53  ;;  %vm1780_vm14 = vmor %vm1778_vm13, %vm1779_vm12 }
 0x271   : > { %v1747_v3 = vmul.f32 %v1746_v22, %v1722_v52  ;;  %v1131_v13 = vmul.f32 0.5, %v6013_v48  ;;  %v1761_v8 = vadd.f32 1.1283791, %v1760_v59  ;;  %v1785_v56 = vor.u32 1.1754944e-38, %v1784_v5  ;;  %2641 = vmatpush.msrb.mxu3 %v2623_v10 }
 0x272   : > { %v1777_v58 = vadd.f32 %v4680_v24, %v1776_v35  ;;  %v1954_v28 = vmul.f32 3.8918573e-05, %v6396_v9  ;;  %vm1783_vm15 = vcmp.eq.f32.partialorder %v1782_v2, 8.507059e+37  ;;  %v1132_v48 = vmul.f32 0.5, %v6077_v0 }
 0x273   : > { %v1819_v14 = vmul.f32 %v1803_v18, %v1131_v13  ;;  %v4449_v41 = vclamps-f32 %v1747_v3, 1.0  ;;  %v1762_v31 = vmul.f32 %v1761_v8, %v6152_v38  ;;  %2642 = vmatpush.msrb.mxu3 %v2622_v45  ;;  %v1133_v26 = vmul.f32 0.5, %v6126_v43 }
 0x274   : > { %1896 = vmatmul.f32.gmra.mxu2 %v1818_v51  ;;  %v1781_v60 = vsel %vm1780_vm14, %v4680_v24, %v1777_v58  ;;  %v1955_v21 = vadd.f32 0.001143296, %v1954_v28  ;;  %v1943_v39 = vmul.f32 2.1237322e-06, %v6396_v9 }
 0x275   : > { %v1786_v12 = vsel %vm1783_vm15, %v1785_v56, %v1781_v60  ;;  %v1804_v53 = vadd.f32 1.0, %v4449_v41  ;;  %2643 = vmatpush.msrb.mxu3 %v2621_v23 }
 0x276   : > { %v1787_v1 = vmul.f32 %v1786_v12, %v1762_v31  ;;  %v1956_v42 = vmul.f32 %v1955_v21, %v6396_v9  ;;  %v1944_v49 = vadd.f32 0.00028619796, %v1943_v39 }
 0x277   : > { %v1820_v37 = vmul.f32 %v1804_v53, %v1132_v48  ;;  %2644 = vmatpush.msrb.mxu3 %v2620_v16 }
 0x278   : > { %v4450_v50 = vclamps-f32 %v1787_v1, 1.0  ;;  %v1957_v38 = vadd.f32 0.014752088, %v1956_v42  ;;  %v1945_v43 = vmul.f32 %v1944_v49, %v6396_v9 }
 0x279   : > { %2645 = vmatpush.msrb.mxu3 %v2619_v4 }
 0x27a   : > { %v1805_v29 = vadd.f32 1.0, %v4450_v50  ;;  %v1958_v24 = vmul.f32 %v1957_v38, %v6396_v9  ;;  %v1864_v47 = vpop.f32.mrf.mxu2  ;;  %v1946_v36 = vadd.f32 0.0036580483, %v1945_v43  ;;  %v2616_v38 = vld [vmem:[#allocation5 + $0x190] sm:$0xff] }
 0x27b   : > { %v6412_v15 = vadd.f32 %v6374_v25, %v1864_v47  ;;  %2646 = vmatpush.msrb.mxu3 %v2618_v63 }
 0x27c   : > { %1899 = vmatmul.f32.gmra.mxu2 %v1819_v14  ;;  %v1821_v32 = vmul.f32 %v1805_v29, %v1133_v26  ;;  %v1959_v0 = vadd.f32 0.112945676, %v1958_v24  ;;  %v1947_v19 = vmul.f32 %v1946_v36, %v6396_v9  ;;  %v2615_v29 = vld [vmem:[#allocation5 + $0x188] sm:$0xff] }
 0x27d   : > { %v6419_v40 = vmul.f32 0.70710677, %v6412_v15  ;;  %2647 = vmatpush.msrb.mxu3 %v2617_v33 }
 0x27e   : > { %v1960_v30 = vmul.f32 %v1959_v0, %v6396_v9  ;;  %v1948_v51 = vadd.f32 0.05243302, %v1947_v19  ;;  %v2614_v19 = vld [vmem:[#allocation5 + $0x180] sm:$0xff] }
 0x27f   : > { %v1981_v22 = vmul.f32 %v6419_v40, %v6419_v40  ;;  %2648 = vmatpush.msrb.mxu3 %v2616_v38 }
 0x280   : > { %v1961_v55 = vadd.f32 0.4994258, %v1960_v30  ;;  %v1949_v52 = vmul.f32 %v1948_v51, %v6396_v9 }
 0x281   : > { %v6429_v58 = vmin.f32 %v1981_v22, 16.0  ;;  %2649 = vmatpush.msrb.mxu3 %v2615_v29 }
 0x282   : > { %v1962_v7 = vmul.f32 %v1961_v55, %v6396_v9  ;;  %v1950_v3 = vadd.f32 0.18741608, %v1949_v52 }
 0x283   : > { %v1983_v8 = vmul.f32 2.1237322e-06, %v6429_v58  ;;  %2650 = vmatpush.msrb.mxu3 %v2614_v19 }
 0x284   : > { %1902 = vmatmul.f32.gmra.mxu2 %v1820_v37  ;;  %v1963_v34 = vadd.f32 1.0, %v1962_v7  ;;  %v1951_v14 = vmul.f32 %v1950_v3, %v6396_v9  ;;  %v1994_v37 = vmul.f32 3.8918573e-05, %v6429_v58 }
 0x285   : > { %v1867_v20 = vpop.f32.mrf.mxu2  ;;  %v1984_v12 = vadd.f32 0.00028619796, %v1983_v8 }
 0x286   : > { %4681 = vrcp.f32 %v1963_v34  ;;  %v6415_v11 = vadd.f32 %v6374_v25, %v1867_v20  ;;  %v1975_v44 = vand.u32 2147483648, %v1963_v34  ;;  %vm1969_vm1 = vweird.f32 %v1963_v34 }
 0x287   : > { %v1973_v21 = vand.u32 2147483647, %v1963_v34  ;;  %v1952_v1 = vadd.f32 1.1283791, %v1951_v14  ;;  %v1985_v48 = vmul.f32 %v1984_v12, %v6429_v58  ;;  %v1995_v23 = vadd.f32 0.001143296, %v1994_v37 }
 0x288   : > { %v6422_v57 = vmul.f32 0.70710677, %v6415_v11  ;;  %v1976_v9 = vor.u32 1.1754944e-38, %v1975_v44 }
 0x289   : > { %vm1974_vm3 = vcmp.eq.f32.partialorder %v1973_v21, 8.507059e+37  ;;  %v1953_v26 = vmul.f32 %v1952_v1, %v6389_v62  ;;  %v1986_v24 = vadd.f32 0.0036580483, %v1985_v48  ;;  %v1996_v47 = vmul.f32 %v1995_v23, %v6429_v58 }
 0x28a   : > { %v2021_v27 = vmul.f32 %v6422_v57, %v6422_v57 }
 0x28b   : > { %v1997_v4 = vadd.f32 0.014752088, %v1996_v47  ;;  %v1987_v49 = vmul.f32 %v1986_v24, %v6429_v58 }
 0x28c   : > { %1905 = vmatmul.f32.gmra.mxu2 %v1821_v32  ;;  %v4682_v6 = vpop.eup %4681  ;;  %v6434_v18 = vmin.f32 %v2021_v27, 16.0 }
 0x28d   : > { %v1965_v17 = vmul.f32 %v4682_v6, %v1963_v34  ;;  %vm1970_vm0 = vweird.f32 %v4682_v6  ;;  %v1998_v43 = vmul.f32 %v1997_v4, %v6429_v58  ;;  %v1988_v51 = vadd.f32 0.05243302, %v1987_v49 }
 0x28e   : > { %v2023_v56 = vmul.f32 2.1237322e-06, %v6434_v18  ;;  %vm1971_vm2 = vmor %vm1969_vm1, %vm1970_vm0  ;;  %v2034_v34 = vmul.f32 3.8918573e-05, %v6434_v18 }
 0x28f   : > { %v1966_v59 = vsub.f32 1.0, %v1965_v17  ;;  %v1999_v33 = vadd.f32 0.112945676, %v1998_v43 }
 0x290   : > { %v2024_v54 = vadd.f32 0.00028619796, %v2023_v56 }
 0x291   : > { %v1967_v13 = vmul.f32 %v4682_v6, %v1966_v59  ;;  %v2000_v59 = vmul.f32 %v1999_v33, %v6429_v58 }
 0x292   : > { %v1870_v35 = vpop.f32.mrf.mxu2  ;;  %v2025_v42 = vmul.f32 %v2024_v54, %v6434_v18 }
 0x293   : > { %v6432_v5 = vadd.f32 %v6374_v25, %v1870_v35  ;;  %v1968_v41 = vadd.f32 %v4682_v6, %v1967_v13  ;;  %v1909_v35 = vmul.f32 0.5, %v6383_v61  ;;  %v2001_v14 = vadd.f32 0.4994258, %v2000_v59 }
 0x294   : > { %v2026_v0 = vadd.f32 0.0036580483, %v2025_v42 }
 0x295   : > { %v6438_v60 = vmul.f32 0.70710677, %v6432_v5  ;;  %v1972_v46 = vsel %vm1971_vm2, %v4682_v6, %v1968_v41  ;;  %v2035_v6 = vadd.f32 0.001143296, %v2034_v34  ;;  %v1989_v41 = vmul.f32 %v1988_v51, %v6429_v58 }
 0x296   : > { %v1977_v45 = vsel %vm1974_vm3, %v1976_v9, %v1972_v46  ;;  %v2027_v62 = vmul.f32 %v2026_v0, %v6434_v18  ;;  %v2002_v54 = vmul.f32 %v2001_v14, %v6429_v58 }
 0x297   : > { %v2061_v31 = vmul.f32 %v6438_v60, %v6438_v60  ;;  %v1978_v39 = vmul.f32 %v1977_v45, %v1953_v26  ;;  %v2036_v3 = vmul.f32 %v2035_v6, %v6434_v18  ;;  %v1990_v38 = vadd.f32 0.18741608, %v1989_v41 }
 0x298   : > { %v2028_v27 = vadd.f32 0.05243302, %v2027_v62  ;;  %v2003_v42 = vadd.f32 1.0, %v2002_v54 }
 0x299   : > { %v6451_v10 = vmin.f32 %v2061_v31, 16.0  ;;  %v4451_v63 = vclamps-f32 %v1978_v39, 1.0  ;;  %v2037_v61 = vadd.f32 0.014752088, %v2036_v3  ;;  %v1991_v39 = vmul.f32 %v1990_v38, %v6429_v58 }
 0x29a   : > { %v2029_v44 = vmul.f32 %v2028_v27, %v6434_v18  ;;  %4683 = vrcp.f32 %v2003_v42  ;;  %vm2009_vm5 = vweird.f32 %v2003_v42 }
 0x29b   : > { %v2063_v32 = vmul.f32 2.1237322e-06, %v6451_v10  ;;  %v2581_v22 = vadd.f32 1.0, %v4451_v63  ;;  %v2038_v21 = vmul.f32 %v2037_v61, %v6434_v18  ;;  %v2074_v1 = vmul.f32 3.8918573e-05, %v6451_v10 }
 0x29c   : > { %v2030_v45 = vadd.f32 0.18741608, %v2029_v44  ;;  %v2015_v61 = vand.u32 2147483648, %v2003_v42  ;;  %v2013_v44 = vand.u32 2147483647, %v2003_v42 }
 0x29d   : > { %v2064_v7 = vadd.f32 0.00028619796, %v2063_v32  ;;  %v2597_v56 = vmul.f32 %v2581_v22, %v1909_v35  ;;  %v2039_v37 = vadd.f32 0.112945676, %v2038_v21  ;;  %v1992_v35 = vadd.f32 1.1283791, %v1991_v39 }
 0x29e   : > { %v2031_v49 = vmul.f32 %v2030_v45, %v6434_v18  ;;  %v2016_v45 = vor.u32 1.1754944e-38, %v2015_v61  ;;  %vm2014_vm7 = vcmp.eq.f32.partialorder %v2013_v44, 8.507059e+37 }
 0x29f   : > { %v2065_v17 = vmul.f32 %v2064_v7, %v6451_v10  ;;  %2651 = vmatmul.f32.vlgmr.msrb.gmra.mxu3 %v2597_v56  ;;  %v2040_v32 = vmul.f32 %v2039_v37, %v6434_v18  ;;  %v1993_v54 = vmul.f32 %v1992_v35, %v6419_v40 }
 0x2a1   : > { %v2066_v12 = vadd.f32 0.0036580483, %v2065_v17  ;;  %v2041_v62 = vadd.f32 0.4994258, %v2040_v32  ;;  %v2032_v17 = vadd.f32 1.1283791, %v2031_v49 }
 0x2a2   : > { %v1910_v49 = vmul.f32 0.5, %v6412_v15 }
 0x2a3   : > { %v2067_v29 = vmul.f32 %v2066_v12, %v6451_v10  ;;  %v2042_v33 = vmul.f32 %v2041_v62, %v6434_v18  ;;  %v2033_v62 = vmul.f32 %v2032_v17, %v6422_v57 }
 0x2a5   : > { %v2068_v4 = vadd.f32 0.05243302, %v2067_v29 }
 0x2a7   : > { %v2069_v22 = vmul.f32 %v2068_v4, %v6451_v10 }
 0x2a8   : > { %v1873_v2 = vpop.f32.mrf.mxu2 }
 0x2a9   : > { %v6442_v28 = vadd.f32 %v6374_v25, %v1873_v2  ;;  %v2070_v21 = vadd.f32 0.18741608, %v2069_v22 }
 0x2ab   : > { %v6448_v53 = vmul.f32 0.70710677, %v6442_v28 }
 0x2ad   : > { %v2101_v50 = vmul.f32 %v6448_v53, %v6448_v53 }
 0x2af   : > { %v6460_v55 = vmin.f32 %v2101_v50, 16.0  ;;  %v2075_v50 = vadd.f32 0.001143296, %v2074_v1 }
 0x2b1   : > { %v2103_v20 = vmul.f32 2.1237322e-06, %v6460_v55  ;;  %v2076_v47 = vmul.f32 %v2075_v50, %v6451_v10  ;;  %v2114_v59 = vmul.f32 3.8918573e-05, %v6460_v55 }
 0x2b3   : > { %v2104_v2 = vadd.f32 0.00028619796, %v2103_v20  ;;  %v2077_v43 = vadd.f32 0.014752088, %v2076_v47  ;;  %v4684_v20 = vpop.eup %4683 }
 0x2b4   : > { %v2005_v51 = vmul.f32 %v4684_v20, %v2003_v42  ;;  %vm2010_vm4 = vweird.f32 %v4684_v20 }
 0x2b5   : > { %v2105_v46 = vmul.f32 %v2104_v2, %v6460_v55  ;;  %v2078_v6 = vmul.f32 %v2077_v43, %v6451_v10  ;;  %vm2011_vm6 = vmor %vm2009_vm5, %vm2010_vm4 }
 0x2b6   : > { %v2006_v2 = vsub.f32 1.0, %v2005_v51 }
 0x2b7   : > { %v2106_v26 = vadd.f32 0.0036580483, %v2105_v46  ;;  %v2079_v18 = vadd.f32 0.112945676, %v2078_v6  ;;  %v2115_v46 = vadd.f32 0.001143296, %v2114_v59 }
 0x2b8   : > { %v2007_v12 = vmul.f32 %v4684_v20, %v2006_v2 }
 0x2b9   : > { %v2107_v34 = vmul.f32 %v2106_v26, %v6460_v55  ;;  %v2080_v50 = vmul.f32 %v2079_v18, %v6451_v10  ;;  %v2116_v4 = vmul.f32 %v2115_v46, %v6460_v55 }
 0x2ba   : > { %v2008_v37 = vadd.f32 %v4684_v20, %v2007_v12 }
 0x2bb   : > { %v2108_v3 = vadd.f32 0.05243302, %v2107_v34  ;;  %v2081_v32 = vadd.f32 0.4994258, %v2080_v50  ;;  %v2117_v57 = vadd.f32 0.014752088, %v2116_v4 }
 0x2bc   : > { %v2012_v26 = vsel %vm2011_vm6, %v4684_v20, %v2008_v37 }
 0x2bd   : > { %v2017_v47 = vsel %vm2014_vm7, %v2016_v45, %v2012_v26  ;;  %v2118_v46 = vmul.f32 %v2117_v57, %v6460_v55 }
 0x2be   : > { %v1876_v30 = vpop.f32.mrf.mxu2  ;;  %v2018_v43 = vmul.f32 %v2017_v47, %v1993_v54 }
 0x2bf   : > { %v6463_v16 = vadd.f32 %v6374_v25, %v1876_v30  ;;  %v2119_v4 = vadd.f32 0.112945676, %v2118_v46 }
 0x2c1   : > { %v6471_v36 = vmul.f32 0.70710677, %v6463_v16 }
 0x2c3   : > { %v2141_v13 = vmul.f32 %v6471_v36, %v6471_v36 }
 0x2c5   : > { %v6491_v48 = vmin.f32 %v2141_v13, 16.0 }
 0x2c7   : > { %v1879_v52 = vpop.f32.mrf.mxu2  ;;  %v2143_v0 = vmul.f32 2.1237322e-06, %v6491_v48 }
 0x2c8   : > { %v6480_v8 = vadd.f32 %v6374_v25, %v1879_v52  ;;  %v6516_v52 = vadd.f32 1.0, %v2042_v33  ;;  %v2082_v33 = vmul.f32 %v2081_v32, %v6451_v10  ;;  %v2154_v32 = vmul.f32 3.8918573e-05, %v6491_v48 }
 0x2c9   : > { %v2144_v19 = vadd.f32 0.00028619796, %v2143_v0 }
 0x2ca   : > { %v6484_v31 = vmul.f32 0.70710677, %v6480_v8  ;;  %4685 = vrcp.f32 %v6516_v52  ;;  %v2055_v15 = vand.u32 2147483648, %v6516_v52  ;;  %vm2049_vm9 = vweird.f32 %v6516_v52 }
 0x2cb   : > { %v2145_v56 = vmul.f32 %v2144_v19, %v6491_v48  ;;  %v2071_v19 = vmul.f32 %v2070_v21, %v6451_v10 }
 0x2cc   : > { %v2181_v9 = vmul.f32 %v6484_v31, %v6484_v31  ;;  %v2056_v54 = vor.u32 1.1754944e-38, %v2055_v15 }
 0x2cd   : > { %v2146_v38 = vadd.f32 0.0036580483, %v2145_v56  ;;  %v2072_v2 = vadd.f32 1.1283791, %v2071_v19 }
 0x2ce   : > { %v6501_v30 = vmin.f32 %v2181_v9, 16.0  ;;  %v2109_v9 = vmul.f32 %v2108_v3, %v6460_v55  ;;  %v2053_v3 = vand.u32 2147483647, %v6516_v52 }
 0x2cf   : > { %v1882_v23 = vpop.f32.mrf.mxu2  ;;  %v2147_v6 = vmul.f32 %v2146_v38, %v6491_v48  ;;  %v1911_v38 = vmul.f32 0.5, %v6415_v11  ;;  %v2073_v47 = vmul.f32 %v2072_v2, %v6438_v60  ;;  %v2120_v60 = vmul.f32 %v2119_v4, %v6460_v55 }
 0x2d0   : > { %v6497_v24 = vadd.f32 %v6374_v25, %v1882_v23  ;;  %v2183_v63 = vmul.f32 2.1237322e-06, %v6501_v30  ;;  %v4686_v0 = vpop.eup %4685  ;;  %vm2054_vm11 = vcmp.eq.f32.partialorder %v2053_v3, 8.507059e+37 }
 0x2d1   : > { %v2045_v34 = vmul.f32 %v4686_v0, %v6516_v52  ;;  %vm2050_vm8 = vweird.f32 %v4686_v0  ;;  %v2121_v15 = vadd.f32 0.4994258, %v2120_v60 }
 0x2d2   : > { %v6507_v7 = vmul.f32 0.70710677, %v6497_v24  ;;  %v2184_v14 = vadd.f32 0.00028619796, %v2183_v63  ;;  %v2110_v63 = vadd.f32 0.18741608, %v2109_v9  ;;  %vm2051_vm10 = vmor %vm2049_vm9, %vm2050_vm8 }
 0x2d3   : > { %v2046_v51 = vsub.f32 1.0, %v2045_v34  ;;  %v2148_v9 = vadd.f32 0.05243302, %v2147_v6  ;;  %v6623_v60 = vmul.f32 0.5, %v6497_v24 }
 0x2d4   : > { %v2221_v58 = vmul.f32 %v6507_v7, %v6507_v7  ;;  %v2185_v29 = vmul.f32 %v2184_v14, %v6501_v30  ;;  %v2111_v56 = vmul.f32 %v2110_v63, %v6460_v55 }
 0x2d5   : > { %v2047_v59 = vmul.f32 %v4686_v0, %v2046_v51 }
 0x2d6   : > { %v6524_v41 = vmin.f32 %v2221_v58, 16.0  ;;  %v2186_v20 = vadd.f32 0.0036580483, %v2185_v29  ;;  %v4452_v58 = vclamps-f32 %v2018_v43, 1.0  ;;  %v2149_v43 = vmul.f32 %v2148_v9, %v6491_v48 }
 0x2d7   : > { %v1885_v27 = vpop.f32.mrf.mxu2  ;;  %v2048_v61 = vadd.f32 %v4686_v0, %v2047_v59 }
 0x2d8   : > { %v6520_v13 = vadd.f32 %v6374_v25, %v1885_v27  ;;  %v2223_v40 = vmul.f32 2.1237322e-06, %v6524_v41  ;;  %v6547_v27 = vadd.f32 1.0, %v2082_v33  ;;  %v2582_v17 = vadd.f32 1.0, %v4452_v58 }
 0x2d9   : > { %v2187_v10 = vmul.f32 %v2186_v20, %v6501_v30  ;;  %v2052_v37 = vsel %vm2051_vm10, %v4686_v0, %v2048_v61  ;;  %v2150_v61 = vadd.f32 0.18741608, %v2149_v43 }
 0x2da   : > { %v6528_v1 = vmul.f32 0.70710677, %v6520_v13  ;;  %v2224_v35 = vadd.f32 0.00028619796, %v2223_v40  ;;  %4687 = vrcp.f32 %v6547_v27  ;;  %v2598_v14 = vmul.f32 %v2582_v17, %v1910_v49 }
 0x2db   : > { %v2188_v29 = vadd.f32 0.05243302, %v2187_v10  ;;  %v2057_v45 = vsel %vm2054_vm11, %v2056_v54, %v2052_v37  ;;  %v2112_v49 = vadd.f32 1.1283791, %v2111_v56  ;;  %v2093_v6 = vand.u32 2147483647, %v6547_v27 }
 0x2dc   : > { %v2261_v23 = vmul.f32 %v6528_v1, %v6528_v1  ;;  %v2225_v12 = vmul.f32 %v2224_v35, %v6524_v41  ;;  %2654 = vmatmul.f32.gmra.mxu3 %v2598_v14  ;;  %v2058_v40 = vmul.f32 %v2057_v45, %v2033_v62  ;;  %v2155_v35 = vadd.f32 0.001143296, %v2154_v32 }
 0x2dd   : > { %v2189_v62 = vmul.f32 %v2188_v29, %v6501_v30  ;;  %v2122_v56 = vmul.f32 %v2121_v15, %v6460_v55  ;;  %vm2089_vm13 = vweird.f32 %v6547_v27  ;;  %vm2094_vm15 = vcmp.eq.f32.partialorder %v2093_v6, 8.507059e+37 }
 0x2de   : > { %v6536_v39 = vmin.f32 %v2261_v23, 16.0  ;;  %v6567_v23 = vmul.f32 0.5, %v6432_v5  ;;  %v4453_v34 = vclamps-f32 %v2058_v40, 1.0  ;;  %v2156_v14 = vmul.f32 %v2155_v35, %v6491_v48 }
 0x2df   : > { %v1888_v42 = vpop.f32.mrf.mxu2  ;;  %v6596_v46 = vadd.f32 1.0, %v2122_v56  ;;  %v6609_v32 = vmul.f32 0.5, %v6463_v16  ;;  %v2194_v16 = vmul.f32 3.8918573e-05, %v6501_v30  ;;  %v2234_v6 = vmul.f32 3.8918573e-05, %v6524_v41 }
 0x2e0   : > { %v2263_v22 = vmul.f32 2.1237322e-06, %v6536_v39  ;;  %v6552_v18 = vadd.f32 %v6374_v25, %v1888_v42  ;;  %v4688_v0 = vpop.eup %4687  ;;  %v2226_v42 = vadd.f32 0.0036580483, %v2225_v12  ;;  %v2583_v20 = vadd.f32 1.0, %v4453_v34 }
 0x2e1   : > { %v2085_v5 = vmul.f32 %v4688_v0, %v6547_v27  ;;  %vm2090_vm12 = vweird.f32 %v4688_v0  ;;  %v2190_v12 = vadd.f32 0.18741608, %v2189_v62  ;;  %v2157_v55 = vadd.f32 0.014752088, %v2156_v14 }
 0x2e2   : > { %v2264_v44 = vadd.f32 0.00028619796, %v2263_v22  ;;  %v6564_v52 = vmul.f32 0.70710677, %v6552_v18  ;;  %v2227_v58 = vmul.f32 %v2226_v42, %v6524_v41  ;;  %v2095_v22 = vand.u32 2147483648, %v6547_v27  ;;  %vm2091_vm14 = vmor %vm2089_vm13, %vm2090_vm12 }
 0x2e3   : > { %v2086_v33 = vsub.f32 1.0, %v2085_v5  ;;  %v2599_v17 = vmul.f32 %v2583_v20, %v1911_v38  ;;  %4689 = vrcp.f32 %v6596_v46  ;;  %v6606_v27 = vmul.f32 0.5, %v6442_v28 }
 0x2e4   : > { %v2265_v11 = vmul.f32 %v2264_v44, %v6536_v39  ;;  %v2301_v19 = vmul.f32 %v6564_v52, %v6564_v52  ;;  %v2228_v54 = vadd.f32 0.05243302, %v2227_v58  ;;  %v6612_v42 = vmul.f32 0.5, %v6480_v8 }
 0x2e5   : > { %v2087_v59 = vmul.f32 %v4688_v0, %v2086_v33  ;;  %2657 = vmatmul.f32.gmra.mxu3 %v2599_v17  ;;  %v2191_v4 = vmul.f32 %v2190_v12, %v6501_v30  ;;  %v2158_v34 = vmul.f32 %v2157_v55, %v6491_v48  ;;  %v2195_v33 = vadd.f32 0.001143296, %v2194_v16 }
 0x2e6   : > { %v2266_v51 = vadd.f32 0.0036580483, %v2265_v11  ;;  %v6589_v2 = vmin.f32 %v2301_v19, 16.0  ;;  %v2229_v5 = vmul.f32 %v2228_v54, %v6524_v41  ;;  %v2113_v19 = vmul.f32 %v2112_v49, %v6448_v53 }
 0x2e7   : > { %v1891_v21 = vpop.f32.mrf.mxu2  ;;  %v2088_v44 = vadd.f32 %v4688_v0, %v2087_v59  ;;  %v2196_v54 = vmul.f32 %v2195_v33, %v6501_v30  ;;  %vm2129_vm1 = vweird.f32 %v6596_v46 }
 0x2e8   : > { %v6560_v50 = vadd.f32 %v6374_v25, %v1891_v21  ;;  %v2096_v21 = vor.u32 1.1754944e-38, %v2095_v22  ;;  %v2267_v37 = vmul.f32 %v2266_v51, %v6536_v39  ;;  %v2303_v29 = vmul.f32 2.1237322e-06, %v6589_v2 }
 0x2e9   : > { %v2092_v38 = vsel %vm2091_vm14, %v4688_v0, %v2088_v44  ;;  %v2151_v0 = vmul.f32 %v2150_v61, %v6491_v48  ;;  %v4690_v35 = vpop.eup %4689  ;;  %v2192_v51 = vadd.f32 1.1283791, %v2191_v4  ;;  %v2133_v44 = vand.u32 2147483647, %v6596_v46 }
 0x2ea   : > { %v6570_v26 = vmul.f32 0.70710677, %v6560_v50  ;;  %v2097_v45 = vsel %vm2094_vm15, %v2096_v21, %v2092_v38  ;;  %v2268_v28 = vadd.f32 0.05243302, %v2267_v37  ;;  %v2304_v8 = vadd.f32 0.00028619796, %v2303_v29 }
 0x2eb   : > { %v2098_v11 = vmul.f32 %v2097_v45, %v2073_v47  ;;  %v2159_v47 = vadd.f32 0.112945676, %v2158_v34  ;;  %v2152_v58 = vadd.f32 1.1283791, %v2151_v0  ;;  %v2125_v17 = vmul.f32 %v4690_v35, %v6596_v46 }
 0x2ec   : > { %v2341_v63 = vmul.f32 %v6570_v26, %v6570_v26  ;;  %v2269_v53 = vmul.f32 %v2268_v28, %v6536_v39  ;;  %v2305_v59 = vmul.f32 %v2304_v8, %v6589_v2  ;;  %v2235_v21 = vadd.f32 0.001143296, %v2234_v6 }
 0x2ed   : > { %v4454_v62 = vclamps-f32 %v2098_v11, 1.0  ;;  %v2160_v15 = vmul.f32 %v2159_v47, %v6491_v48  ;;  %v2126_v12 = vsub.f32 1.0, %v2125_v17  ;;  %vm2130_vm0 = vweird.f32 %v4690_v35 }
 0x2ee   : > { %v6591_v10 = vmin.f32 %v2341_v63, 16.0  ;;  %v2197_v45 = vadd.f32 0.014752088, %v2196_v54  ;;  %v6647_v11 = vmul.f32 0.5, %v6520_v13  ;;  %v2270_v0 = vadd.f32 0.18741608, %v2269_v53  ;;  %vm2131_vm2 = vmor %vm2129_vm1, %vm2130_vm0 }
 0x2ef   : > { %v1894_v57 = vpop.f32.mrf.mxu2  ;;  %v2584_v20 = vadd.f32 1.0, %v4454_v62  ;;  %v2161_v14 = vadd.f32 0.4994258, %v2160_v15  ;;  %v2127_v55 = vmul.f32 %v4690_v35, %v2126_v12  ;;  %v2306_v34 = vadd.f32 0.0036580483, %v2305_v59 }
 0x2f0   : > { %v6587_v3 = vadd.f32 %v6374_v25, %v1894_v57  ;;  %v2343_v40 = vmul.f32 2.1237322e-06, %v6591_v10  ;;  %v2230_v57 = vadd.f32 0.18741608, %v2229_v5  ;;  %vm2134_vm3 = vcmp.eq.f32.partialorder %v2133_v44, 8.507059e+37 }
 0x2f1   : > { %v2600_v49 = vmul.f32 %v2584_v20, %v6567_v23  ;;  %v2135_v23 = vand.u32 2147483648, %v6596_v46  ;;  %v2162_v38 = vmul.f32 %v2161_v14, %v6491_v48  ;;  %v2128_v5 = vadd.f32 %v4690_v35, %v2127_v55 }
 0x2f2   : > { %v6599_v9 = vmul.f32 0.70710677, %v6587_v3  ;;  %v2344_v63 = vadd.f32 0.00028619796, %v2343_v40  ;;  %v2236_v40 = vmul.f32 %v2235_v21, %v6524_v41  ;;  %v2198_v48 = vmul.f32 %v2197_v45, %v6501_v30 }
 0x2f3   : > { %2660 = vmatmul.f32.gmra.mxu3 %v2600_v49  ;;  %v6649_v4 = vadd.f32 1.0, %v2162_v38  ;;  %v2136_v28 = vor.u32 1.1754944e-38, %v2135_v23  ;;  %v2132_v8 = vsel %vm2131_vm2, %v4690_v35, %v2128_v5  ;;  %v6659_v47 = vmul.f32 %v2152_v58, %v6471_v36 }
 0x2f4   : > { %v2381_v43 = vmul.f32 %v6599_v9, %v6599_v9  ;;  %v2345_v56 = vmul.f32 %v2344_v63, %v6591_v10  ;;  %v2237_v62 = vadd.f32 0.014752088, %v2236_v40  ;;  %v2199_v46 = vadd.f32 0.112945676, %v2198_v48 }
 0x2f5   : > { %4691 = vrcp.f32 %v6649_v4  ;;  %v2137_v20 = vsel %vm2134_vm3, %v2136_v28, %v2132_v8  ;;  %v2231_v6 = vmul.f32 %v2230_v57, %v6524_v41  ;;  %v2271_v15 = vmul.f32 %v2270_v0, %v6536_v39 }
 0x2f6   : > { %v6626_v22 = vmin.f32 %v2381_v43, 16.0  ;;  %v2274_v43 = vmul.f32 3.8918573e-05, %v6536_v39  ;;  %v2346_v16 = vadd.f32 0.0036580483, %v2345_v56  ;;  %v6664_v53 = vmul.f32 0.5, %v6552_v18 }
 0x2f7   : > { %v1897_v24 = vpop.f32.mrf.mxu2  ;;  %v2138_v49 = vmul.f32 %v2137_v20, %v2113_v19  ;;  %v2307_v17 = vmul.f32 %v2306_v34, %v6589_v2  ;;  %v2200_v35 = vmul.f32 %v2199_v46, %v6501_v30  ;;  %v2238_v36 = vmul.f32 %v2237_v62, %v6524_v41 }
 0x2f8   : > { %v6635_v61 = vadd.f32 %v6374_v25, %v1897_v24  ;;  %v2383_v37 = vmul.f32 2.1237322e-06, %v6626_v22  ;;  %v2275_v33 = vadd.f32 0.001143296, %v2274_v43  ;;  %v6672_v58 = vmul.f32 %v2192_v51, %v6484_v31 }
 0x2f9   : > { %v2347_v59 = vmul.f32 %v2346_v16, %v6591_v10  ;;  %v4455_v57 = vclamps-f32 %v2138_v49, 1.0  ;;  %v2201_v12 = vadd.f32 0.4994258, %v2200_v35  ;;  %v2239_v44 = vadd.f32 0.112945676, %v2238_v36 }
 0x2fa   : > { %v6643_v29 = vmul.f32 0.70710677, %v6635_v61  ;;  %v2384_v63 = vadd.f32 0.00028619796, %v2383_v37  ;;  %v2276_v54 = vmul.f32 %v2275_v33, %v6536_v39  ;;  %v2232_v21 = vadd.f32 1.1283791, %v2231_v6 }
 0x2fb   : > { %v4692_v18 = vpop.eup %4691  ;;  %v2272_v23 = vadd.f32 1.1283791, %v2271_v15  ;;  %v2585_v37 = vadd.f32 1.0, %v4455_v57  ;;  %v2308_v51 = vadd.f32 0.05243302, %v2307_v17  ;;  %v2202_v55 = vmul.f32 %v2201_v12, %v6501_v30 }
 0x2fc   : > { %v2421_v13 = vmul.f32 %v6643_v29, %v6643_v29  ;;  %v2385_v56 = vmul.f32 %v2384_v63, %v6626_v22  ;;  %v2165_v31 = vmul.f32 %v4692_v18, %v6649_v4  ;;  %v2348_v40 = vadd.f32 0.05243302, %v2347_v59 }
 0x2fd   : > { %v2601_v0 = vmul.f32 %v2585_v37, %v6606_v27  ;;  %v2240_v34 = vmul.f32 %v2239_v44, %v6524_v41  ;;  %v2175_v48 = vand.u32 2147483648, %v6649_v4  ;;  %v6689_v28 = vadd.f32 1.0, %v2202_v55 }
 0x2fe   : > { %v6667_v24 = vmin.f32 %v2421_v13, 16.0  ;;  %v2166_v43 = vsub.f32 1.0, %v2165_v31  ;;  %v2386_v5 = vadd.f32 0.0036580483, %v2385_v56  ;;  %v2277_v13 = vadd.f32 0.014752088, %v2276_v54 }
 0x2ff   : > { %v1900_v14 = vpop.f32.mrf.mxu2  ;;  %2663 = vmatmul.f32.gmra.mxu3 %v2601_v0  ;;  %vm2170_vm4 = vweird.f32 %v4692_v18  ;;  %v2173_v30 = vand.u32 2147483647, %v6649_v4  ;;  %v2241_v16 = vadd.f32 0.4994258, %v2240_v34  ;;  %v2309_v8 = vmul.f32 %v2308_v51, %v6589_v2 }
 0x300   : > { %v6677_v19 = vadd.f32 %v6374_v25, %v1900_v14  ;;  %v2423_v38 = vmul.f32 2.1237322e-06, %v6667_v24  ;;  %v2167_v62 = vmul.f32 %v4692_v18, %v2166_v43  ;;  %4693 = vrcp.f32 %v6689_v28 }
 0x301   : > { %v2349_v20 = vmul.f32 %v2348_v40, %v6591_v10  ;;  %vm2169_vm5 = vweird.f32 %v6649_v4  ;;  %v2242_v33 = vmul.f32 %v2241_v16, %v6524_v41  ;;  %v2387_v15 = vmul.f32 %v2386_v5, %v6626_v22 }
 0x302   : > { %v6684_v45 = vmul.f32 0.70710677, %v6677_v19  ;;  %v2424_v63 = vadd.f32 0.00028619796, %v2423_v38  ;;  %v2168_v46 = vadd.f32 %v4692_v18, %v2167_v62  ;;  %vm2171_vm6 = vmor %vm2169_vm5, %vm2170_vm4  ;;  %v2176_v49 = vor.u32 1.1754944e-38, %v2175_v48 }
 0x303   : > { %v2278_v35 = vmul.f32 %v2277_v13, %v6536_v39  ;;  %vm2174_vm7 = vcmp.eq.f32.partialorder %v2173_v30, 8.507059e+37  ;;  %v6704_v59 = vadd.f32 1.0, %v2242_v33  ;;  %v2314_v57 = vmul.f32 3.8918573e-05, %v6589_v2 }
 0x304   : > { %v2461_v27 = vmul.f32 %v6684_v45, %v6684_v45  ;;  %v2172_v36 = vsel %vm2171_vm6, %v4692_v18, %v2168_v46  ;;  %v2310_v56 = vadd.f32 0.18741608, %v2309_v8  ;;  %v2425_v41 = vmul.f32 %v2424_v63, %v6667_v24 }
 0x305   : > { %v2177_v4 = vsel %vm2174_vm7, %v2176_v49, %v2172_v36  ;;  %4695 = vrcp.f32 %v6704_v59  ;;  %v2279_v44 = vadd.f32 0.112945676, %v2278_v35  ;;  %v6716_v54 = vmul.f32 %v2232_v21, %v6507_v7 }
 0x306   : > { %v6708_v14 = vmin.f32 %v2461_v27, 16.0  ;;  %v2178_v12 = vmul.f32 %v2177_v4, %v6659_v47  ;;  %v4694_v18 = vpop.eup %4693  ;;  %v6719_v37 = vmul.f32 0.5, %v6560_v50  ;;  %v2350_v31 = vadd.f32 0.18741608, %v2349_v20 }
 0x307   : > { %v1903_v6 = vpop.f32.mrf.mxu2  ;;  %v2388_v51 = vadd.f32 0.05243302, %v2387_v15  ;;  %v6722_v38 = vmul.f32 %v2272_v23, %v6528_v1  ;;  %v2205_v47 = vmul.f32 %v4694_v18, %v6689_v28  ;;  %v2315_v40 = vadd.f32 0.001143296, %v2314_v57 }
 0x308   : > { %v6701_v17 = vadd.f32 %v6374_v25, %v1903_v6  ;;  %v4456_v55 = vclamps-f32 %v2178_v12, 1.0  ;;  %v2311_v0 = vmul.f32 %v2310_v56, %v6589_v2  ;;  %v2426_v43 = vadd.f32 0.0036580483, %v2425_v41 }
 0x309   : > { %v2213_v34 = vand.u32 2147483647, %v6689_v28  ;;  %v2463_v7 = vmul.f32 2.1237322e-06, %v6708_v14  ;;  %v2206_v5 = vsub.f32 1.0, %v2205_v47  ;;  %v2280_v48 = vmul.f32 %v2279_v44, %v6536_v39 }
 0x30a   : > { %v6713_v25 = vmul.f32 0.70710677, %v6701_v17  ;;  %v2586_v21 = vadd.f32 1.0, %v4456_v55  ;;  %v2351_v1 = vmul.f32 %v2350_v31, %v6591_v10  ;;  %v2389_v23 = vmul.f32 %v2388_v51, %v6626_v22 }
 0x30b   : > { %vm2210_vm8 = vweird.f32 %v4694_v18  ;;  %v2215_v13 = vand.u32 2147483648, %v6689_v28  ;;  %v4696_v62 = vpop.eup %4695  ;;  %v2207_v16 = vmul.f32 %v4694_v18, %v2206_v5  ;;  %v2281_v8 = vadd.f32 0.4994258, %v2280_v48 }
 0x30c   : > { %v2501_v50 = vmul.f32 %v6713_v25, %v6713_v25  ;;  %v2602_v30 = vmul.f32 %v2586_v21, %v6609_v32  ;;  %v2316_v63 = vmul.f32 %v2315_v40, %v6589_v2  ;;  %v2427_v27 = vmul.f32 %v2426_v43, %v6667_v24 }
 0x30d   : > { %vm2209_vm9 = vweird.f32 %v6689_v28  ;;  %v2464_v20 = vadd.f32 0.00028619796, %v2463_v7  ;;  %v2245_v46 = vmul.f32 %v4696_v62, %v6704_v59  ;;  %v2208_v33 = vadd.f32 %v4694_v18, %v2207_v16 }
 0x30e   : > { %2666 = vmatmul.f32.gmra.mxu3 %v2602_v30  ;;  %vm2214_vm10 = vcmp.eq.f32.partialorder %v2213_v34, 8.507059e+37  ;;  %v6739_v6 = vmin.f32 %v2501_v50, 16.0  ;;  %v2282_v15 = vmul.f32 %v2281_v8, %v6536_v39  ;;  %vm2211_vm11 = vmor %vm2209_vm9, %vm2210_vm8  ;;  %v2216_v32 = vor.u32 1.1754944e-38, %v2215_v13 }
 0x30f   : > { %v2246_v49 = vsub.f32 1.0, %v2245_v46  ;;  %v2253_v35 = vand.u32 2147483647, %v6704_v59  ;;  %v2354_v36 = vmul.f32 3.8918573e-05, %v6591_v10  ;;  %v2212_v57 = vsel %vm2211_vm11, %v4694_v18, %v2208_v33  ;;  %v1906_v7 = vpop.f32.mrf.mxu2 }
 0x310   : > { %v2255_v28 = vand.u32 2147483648, %v6704_v59  ;;  %v6746_v56 = vadd.f32 1.0, %v2282_v15  ;;  %v2317_v4 = vadd.f32 0.014752088, %v2316_v63  ;;  %v2217_v41 = vsel %vm2214_vm10, %v2216_v32, %v2212_v57 }
 0x311   : > { %v2465_v12 = vmul.f32 %v2464_v20, %v6708_v14  ;;  %v2247_v44 = vmul.f32 %v4696_v62, %v2246_v49  ;;  %vm2250_vm12 = vweird.f32 %v4696_v62  ;;  %v2312_v39 = vadd.f32 1.1283791, %v2311_v0 }
 0x312   : > { %v2218_v31 = vmul.f32 %v2217_v41, %v6672_v58  ;;  %v2503_v51 = vmul.f32 2.1237322e-06, %v6739_v6  ;;  %4697 = vrcp.f32 %v6746_v56  ;;  %v2352_v55 = vadd.f32 1.1283791, %v2351_v1 }
 0x313   : > { %v2248_v47 = vadd.f32 %v4696_v62, %v2247_v44  ;;  %vm2249_vm13 = vweird.f32 %v6704_v59  ;;  %v2355_v18 = vadd.f32 0.001143296, %v2354_v36  ;;  %v2390_v40 = vadd.f32 0.18741608, %v2389_v23  ;;  %v4777_v23 = vld [vmem:[#allocation7 + $0x2] ss:$0 sm:$0xff] }
 0x314   : > { %v4457_v43 = vclamps-f32 %v2218_v31, 1.0  ;;  %vm2251_vm14 = vmor %vm2249_vm13, %vm2250_vm12  ;;  %v2256_v34 = vor.u32 1.1754944e-38, %v2255_v28  ;;  %v2318_v21 = vmul.f32 %v2317_v4, %v6589_v2  ;;  %v2428_v5 = vadd.f32 0.05243302, %v2427_v27 }
 0x315   : > { %v2466_v0 = vadd.f32 0.0036580483, %v2465_v12  ;;  %v2252_v50 = vsel %vm2251_vm14, %v4696_v62, %v2248_v47  ;;  %vm2254_vm15 = vcmp.eq.f32.partialorder %v2253_v35, 8.507059e+37  ;;  %v2504_v13 = vadd.f32 0.00028619796, %v2503_v51 }
 0x316   : > { %v2587_v58 = vadd.f32 1.0, %v4457_v43  ;;  %v2257_v48 = vsel %vm2254_vm15, %v2256_v34, %v2252_v50  ;;  %v2319_v30 = vadd.f32 0.112945676, %v2318_v21  ;;  %v6755_v1 = vmul.f32 %v2312_v39, %v6564_v52 }
 0x317   : > { %v2258_v59 = vmul.f32 %v2257_v48, %v6716_v54  ;;  %v6758_v16 = vadd.f32 %v4777_v23, %v1906_v7  ;;  %v2356_v8 = vmul.f32 %v2355_v18, %v6591_v10  ;;  %v6762_v27 = vmul.f32 %v2352_v55, %v6570_v26 }
 0x318   : > { %v4698_v63 = vpop.eup %4697  ;;  %v2603_v62 = vmul.f32 %v2587_v58, %v6612_v42  ;;  %v2320_v20 = vmul.f32 %v2319_v30, %v6589_v2  ;;  %v2394_v46 = vmul.f32 3.8918573e-05, %v6626_v22  ;;  %v2391_v52 = vmul.f32 %v2390_v40, %v6626_v22 }
 0x319   : > { %v2429_v33 = vmul.f32 %v2428_v5, %v6667_v24  ;;  %v4458_v54 = vclamps-f32 %v2258_v59, 1.0  ;;  %v2285_v15 = vmul.f32 %v4698_v63, %v6746_v56  ;;  %v2467_v32 = vmul.f32 %v2466_v0, %v6708_v14 }
 0x31a   : > { %2669 = vmatmul.f32.gmra.mxu3 %v2603_v62  ;;  %v2505_v49 = vmul.f32 %v2504_v13, %v6739_v6  ;;  %v2321_v26 = vadd.f32 0.4994258, %v2320_v20  ;;  %v2357_v35 = vadd.f32 0.014752088, %v2356_v8  ;;  %v6773_v57 = vmul.f32 0.70710677, %v6758_v16 }
 0x31b   : > { %v2588_v36 = vadd.f32 1.0, %v4458_v54  ;;  %v2286_v42 = vsub.f32 1.0, %v2285_v15  ;;  %v2395_v28 = vadd.f32 0.001143296, %v2394_v46  ;;  %v2295_v4 = vand.u32 2147483648, %v6746_v56 }
 0x31c   : > { %v2322_v41 = vmul.f32 %v2321_v26, %v6589_v2  ;;  %v2358_v12 = vmul.f32 %v2357_v35, %v6591_v10  ;;  %v2434_v44 = vmul.f32 3.8918573e-05, %v6667_v24  ;;  %vm2290_vm0 = vweird.f32 %v4698_v63 }
 0x31d   : > { %v2287_v39 = vmul.f32 %v4698_v63, %v2286_v42  ;;  %v2293_v31 = vand.u32 2147483647, %v6746_v56  ;;  %v2396_v51 = vmul.f32 %v2395_v28, %v6626_v22  ;;  %v2604_v55 = vmul.f32 %v2588_v36, %v6623_v60 }
 0x31e   : > { %vm2289_vm1 = vweird.f32 %v6746_v56  ;;  %v6783_v47 = vadd.f32 1.0, %v2322_v41  ;;  %v2359_v18 = vadd.f32 0.112945676, %v2358_v12  ;;  %v2541_v2 = vmul.f32 %v6773_v57, %v6773_v57 }
 0x31f   : > { %v2288_v40 = vadd.f32 %v4698_v63, %v2287_v39  ;;  %v2397_v43 = vadd.f32 0.014752088, %v2396_v51  ;;  %v2435_v34 = vadd.f32 0.001143296, %v2434_v44  ;;  %v2392_v7 = vadd.f32 1.1283791, %v2391_v52  ;;  %vm2291_vm2 = vmor %vm2289_vm1, %vm2290_vm0 }
 0x320   : > { %v2468_v21 = vadd.f32 0.05243302, %v2467_v32  ;;  %v2296_v5 = vor.u32 1.1754944e-38, %v2295_v4  ;;  %4699 = vrcp.f32 %v6783_v47  ;;  %vm2294_vm3 = vcmp.eq.f32.partialorder %v2293_v31, 8.507059e+37 }
 0x321   : > { %v2292_v0 = vsel %vm2291_vm2, %v4698_v63, %v2288_v40  ;;  %v2360_v60 = vmul.f32 %v2359_v18, %v6591_v10  ;;  %v2398_v56 = vmul.f32 %v2397_v43, %v6626_v22  ;;  %v2430_v50 = vadd.f32 0.18741608, %v2429_v33 }
 0x322   : > { %2672 = vmatmul.f32.gmra.mxu3 %v2604_v55  ;;  %v2506_v58 = vadd.f32 0.0036580483, %v2505_v49  ;;  %v2297_v48 = vsel %vm2294_vm3, %v2296_v5, %v2292_v0  ;;  %v2436_v13 = vmul.f32 %v2435_v34, %v6667_v24  ;;  %v6792_v59 = vmin.f32 %v2541_v2, 16.0 }
 0x323   : > { %v2298_v30 = vmul.f32 %v2297_v48, %v6722_v38  ;;  %v2361_v23 = vadd.f32 0.4994258, %v2360_v60  ;;  %v2399_v8 = vadd.f32 0.112945676, %v2398_v56  ;;  %v6795_v62 = vmul.f32 %v2392_v7, %v6599_v9 }
 0x324   : > { %v2437_v63 = vadd.f32 0.014752088, %v2436_v13  ;;  %v2474_v20 = vmul.f32 3.8918573e-05, %v6708_v14  ;;  %v2514_v46 = vmul.f32 3.8918573e-05, %v6739_v6  ;;  %v2469_v52 = vmul.f32 %v2468_v21, %v6708_v14 }
 0x325   : > { %v4459_v33 = vclamps-f32 %v2298_v30, 1.0  ;;  %v2362_v54 = vmul.f32 %v2361_v23, %v6591_v10  ;;  %v2400_v15 = vmul.f32 %v2399_v8, %v6626_v22  ;;  %v2431_v32 = vmul.f32 %v2430_v50, %v6667_v24 }
 0x326   : > { %v4700_v38 = vpop.eup %4699  ;;  %v2507_v49 = vmul.f32 %v2506_v58, %v6739_v6  ;;  %v2438_v9 = vmul.f32 %v2437_v63, %v6667_v24  ;;  %v2475_v26 = vadd.f32 0.001143296, %v2474_v20  ;;  %v2515_v28 = vadd.f32 0.001143296, %v2514_v46 }
 0x327   : > { %v2589_v35 = vadd.f32 1.0, %v4459_v33  ;;  %v2325_v36 = vmul.f32 %v4700_v38, %v6783_v47  ;;  %v6806_v42 = vadd.f32 1.0, %v2362_v54  ;;  %v2543_v4 = vmul.f32 2.1237322e-06, %v6792_v59 }
 0x328   : > { %v2401_v41 = vadd.f32 0.4994258, %v2400_v15  ;;  %v2439_v10 = vadd.f32 0.112945676, %v2438_v9  ;;  %v2476_v12 = vmul.f32 %v2475_v26, %v6708_v14  ;;  %v2470_v44 = vadd.f32 0.18741608, %v2469_v52 }
 0x329   : > { %v2605_v39 = vmul.f32 %v2589_v35, %v6647_v11  ;;  %v2326_v31 = vsub.f32 1.0, %v2325_v36  ;;  %4701 = vrcp.f32 %v6806_v42  ;;  %vm2330_vm4 = vweird.f32 %v4700_v38 }
 0x32a   : > { %v2333_v51 = vand.u32 2147483647, %v6783_v47  ;;  %v2335_v55 = vand.u32 2147483648, %v6783_v47  ;;  %v2402_v18 = vmul.f32 %v2401_v41, %v6626_v22  ;;  %v2440_v2 = vmul.f32 %v2439_v10, %v6667_v24 }
 0x32b   : > { %2675 = vmatmul.f32.gmra.mxu3 %v2605_v39  ;;  %v2327_v40 = vmul.f32 %v4700_v38, %v2326_v31  ;;  %v2477_v43 = vadd.f32 0.014752088, %v2476_v12  ;;  %v2516_v34 = vmul.f32 %v2515_v28, %v6739_v6  ;;  %v2508_v7 = vadd.f32 0.05243302, %v2507_v49 }
 0x32c   : > { %v2544_v21 = vadd.f32 0.00028619796, %v2543_v4  ;;  %vm2329_vm5 = vweird.f32 %v6783_v47  ;;  %v6818_v11 = vadd.f32 1.0, %v2402_v18  ;;  %v2441_v0 = vadd.f32 0.4994258, %v2440_v2 }
 0x32d   : > { %v2328_v5 = vadd.f32 %v4700_v38, %v2327_v40  ;;  %v2478_v60 = vmul.f32 %v2477_v43, %v6708_v14  ;;  %v2517_v56 = vadd.f32 0.014752088, %v2516_v34  ;;  %vm2331_vm6 = vmor %vm2329_vm5, %vm2330_vm4  ;;  %vm2334_vm7 = vcmp.eq.f32.partialorder %v2333_v51, 8.507059e+37 }
 0x32e   : > { %v2336_v22 = vor.u32 1.1754944e-38, %v2335_v55  ;;  %4703 = vrcp.f32 %v6818_v11  ;;  %v2554_v50 = vmul.f32 3.8918573e-05, %v6792_v59  ;;  %v2442_v13 = vmul.f32 %v2441_v0, %v6667_v24 }
 0x32f   : > { %v4702_v58 = vpop.eup %4701  ;;  %v2332_v48 = vsel %vm2331_vm6, %v4700_v38, %v2328_v5  ;;  %v2479_v47 = vadd.f32 0.112945676, %v2478_v60  ;;  %v2518_v30 = vmul.f32 %v2517_v56, %v6739_v6  ;;  %v6826_v23 = vadd.f32 1.1283791, %v2431_v32 }
 0x330   : > { %v6829_v8 = vmul.f32 %v2470_v44, %v6708_v14  ;;  %v2337_v63 = vsel %vm2334_vm7, %v2336_v22, %v2332_v48  ;;  %v2365_v20 = vmul.f32 %v4702_v58, %v6806_v42  ;;  %v2375_v52 = vand.u32 2147483648, %v6806_v42 }
 0x331   : > { %v2338_v46 = vmul.f32 %v2337_v63, %v6755_v1  ;;  %v6834_v33 = vadd.f32 1.0, %v2442_v13  ;;  %v2480_v54 = vmul.f32 %v2479_v47, %v6708_v14  ;;  %v6838_v24 = vmul.f32 %v2508_v7, %v6739_v6 }
 0x332   : > { %v2545_v15 = vmul.f32 %v2544_v21, %v6792_v59  ;;  %v2366_v38 = vsub.f32 1.0, %v2365_v20  ;;  %v2519_v32 = vadd.f32 0.112945676, %v2518_v30  ;;  %v2373_v9 = vand.u32 2147483647, %v6806_v42 }
 0x333   : > { %v4460_v49 = vclamps-f32 %v2338_v46, 1.0  ;;  %4705 = vrcp.f32 %v6834_v33  ;;  %v2555_v26 = vadd.f32 0.001143296, %v2554_v50  ;;  %vm2370_vm8 = vweird.f32 %v4702_v58 }
 0x334   : > { %v4704_v1 = vpop.eup %4703  ;;  %v2367_v35 = vmul.f32 %v4702_v58, %v2366_v38  ;;  %v2481_v36 = vadd.f32 0.4994258, %v2480_v54  ;;  %v2520_v28 = vmul.f32 %v2519_v32, %v6739_v6  ;;  %vm2369_vm9 = vweird.f32 %v6806_v42 }
 0x335   : > { %v2590_v4 = vadd.f32 1.0, %v4460_v49  ;;  %v2376_v41 = vor.u32 1.1754944e-38, %v2375_v52  ;;  %v2405_v10 = vmul.f32 %v4704_v1, %v6818_v11  ;;  %v2413_v44 = vand.u32 2147483647, %v6818_v11  ;;  %vm2371_vm10 = vmor %vm2369_vm9, %vm2370_vm8 }
 0x336   : > { %v2368_v12 = vadd.f32 %v4702_v58, %v2367_v35  ;;  %v2482_v39 = vmul.f32 %v2481_v36, %v6708_v14  ;;  %v2521_v31 = vadd.f32 0.4994258, %v2520_v28  ;;  %v2415_v18 = vand.u32 2147483648, %v6818_v11 }
 0x337   : > { %v2606_v51 = vmul.f32 %v2590_v4, %v6664_v53  ;;  %v2406_v55 = vsub.f32 1.0, %v2405_v10  ;;  %v2556_v40 = vmul.f32 %v2555_v26, %v6792_v59  ;;  %vm2374_vm11 = vcmp.eq.f32.partialorder %v2373_v9, 8.507059e+37 }
 0x338   : > { %v2372_v2 = vsel %vm2371_vm10, %v4702_v58, %v2368_v12  ;;  %v6851_v42 = vadd.f32 1.0, %v2482_v39  ;;  %v2522_v43 = vmul.f32 %v2521_v31, %v6739_v6  ;;  %vm2410_vm12 = vweird.f32 %v4704_v1 }
 0x339   : > { %v4706_v34 = vpop.eup %4705  ;;  %2678 = vmatmul.f32.gmra.mxu3 %v2606_v51  ;;  %v2377_v7 = vsel %vm2374_vm11, %v2376_v41, %v2372_v2  ;;  %v2407_v21 = vmul.f32 %v4704_v1, %v2406_v55  ;;  %v2557_v14 = vadd.f32 0.014752088, %v2556_v40  ;;  %v2546_v5 = vadd.f32 0.0036580483, %v2545_v15 }
 0x33a   : > { %v2378_v53 = vmul.f32 %v2377_v7, %v6762_v27  ;;  %v2445_v0 = vmul.f32 %v4706_v34, %v6834_v33  ;;  %4707 = vrcp.f32 %v6851_v42  ;;  %vm2409_vm13 = vweird.f32 %v6818_v11 }
 0x33b   : > { %v2408_v60 = vadd.f32 %v4704_v1, %v2407_v21  ;;  %vm2414_vm14 = vcmp.eq.f32.partialorder %v2413_v44, 8.507059e+37  ;;  %v2416_v56 = vor.u32 1.1754944e-38, %v2415_v18  ;;  %vm2411_vm15 = vmor %vm2409_vm13, %vm2410_vm12  ;;  %v6858_v58 = vadd.f32 1.0, %v2522_v43 }
 0x33c   : > { %v4461_v22 = vclamps-f32 %v2378_v53, 1.0  ;;  %v2446_v50 = vsub.f32 1.0, %v2445_v0  ;;  %v2558_v48 = vmul.f32 %v2557_v14, %v6792_v59  ;;  %vm2450_vm0 = vweird.f32 %v4706_v34  ;;  %v3420_v53 = vld [vmem:[#allocation5 + $0x278] sm:$0xff] }
 0x33d   : > { %v2412_v13 = vsel %vm2411_vm15, %v4704_v1, %v2408_v60  ;;  %v2453_v27 = vand.u32 2147483647, %v6834_v33  ;;  %v2455_v47 = vand.u32 2147483648, %v6834_v33  ;;  %4709 = vrcp.f32 %v6858_v58  ;;  %3426 = vmatpush.msrb.mxu0 %v3420_v53 }
 0x33e   : > { %v2591_v30 = vadd.f32 1.0, %v4461_v22  ;;  %v2417_v63 = vsel %vm2414_vm14, %v2416_v56, %v2412_v13  ;;  %v2447_v20 = vmul.f32 %v4706_v34, %v2446_v50  ;;  %v1920_v11 = vmul.f32 0.5, %v6587_v3  ;;  %v6887_v56 = vld [vmem:[#allocation7 + $0x3] ss:$0 sm:$0xff]  ;;  %v2652_v22 = vpop.f32.mrf.mxu3  ;;  %v3418_v13 = vld [vmem:[#allocation5 + $0x268] sm:$0xff] }
 0x33f   : > { %v2433_v46 = vmul.f32 %v6826_v23, %v6643_v29  ;;  %v2547_v52 = vmul.f32 %v2546_v5, %v6792_v59  ;;  %v2418_v54 = vmul.f32 %v2417_v63, %v6795_v62  ;;  %vm2449_vm1 = vweird.f32 %v6834_v33 }
 0x340   : > { %v4708_v15 = vpop.eup %4707  ;;  %v2607_v38 = vmul.f32 %v2591_v30, %v6719_v37  ;;  %v2448_v32 = vadd.f32 %v4706_v34, %v2447_v20  ;;  %v2559_v49 = vadd.f32 0.112945676, %v2558_v48  ;;  %v2472_v9 = vadd.f32 1.1283791, %v6829_v8  ;;  %vm2451_vm2 = vmor %vm2449_vm1, %vm2450_vm0 }
 0x341   : > { %v4462_v26 = vclamps-f32 %v2418_v54, 1.0  ;;  %v2456_v3 = vor.u32 1.1754944e-38, %v2455_v47  ;;  %v2485_v1 = vmul.f32 %v4708_v15, %v6851_v42  ;;  %v2510_v29 = vadd.f32 0.18741608, %v6838_v24 }
 0x342   : > { %2681 = vmatmul.f32.gmra.mxu3 %v2607_v38  ;;  %v2452_v23 = vsel %vm2451_vm2, %v4706_v34, %v2448_v32  ;;  %vm2454_vm3 = vcmp.eq.f32.partialorder %v2453_v27, 8.507059e+37  ;;  %v2560_v62 = vmul.f32 %v2559_v49, %v6792_v59  ;;  %v2548_v37 = vadd.f32 0.05243302, %v2547_v52 }
 0x343   : > { %v2592_v35 = vadd.f32 1.0, %v4462_v26  ;;  %v2457_v36 = vsel %vm2454_vm3, %v2456_v3, %v2452_v23  ;;  %v2486_v33 = vsub.f32 1.0, %v2485_v1  ;;  %v4710_v28 = vpop.eup %4709  ;;  %v2493_v8 = vand.u32 2147483647, %v6851_v42 }
 0x344   : > { %v2458_v4 = vmul.f32 %v2457_v36, %v2433_v46  ;;  %v2495_v41 = vand.u32 2147483648, %v6851_v42  ;;  %v2561_v10 = vadd.f32 0.4994258, %v2560_v62  ;;  %vm2490_vm4 = vweird.f32 %v4708_v15 }
 0x345   : > { %v2487_v12 = vmul.f32 %v4708_v15, %v2486_v33  ;;  %v2525_v24 = vmul.f32 %v4710_v28, %v6858_v58  ;;  %v2473_v44 = vmul.f32 %v2472_v9, %v6684_v45  ;;  %v2608_v39 = vmul.f32 %v2592_v35, %v1920_v11 }
 0x346   : > { %v4463_v31 = vclamps-f32 %v2458_v4, 1.0  ;;  %v2562_v51 = vmul.f32 %v2561_v10, %v6792_v59  ;;  %v2511_v55 = vmul.f32 %v2510_v29, %v6739_v6  ;;  %vm2489_vm5 = vweird.f32 %v6851_v42  ;;  %v3419_v42 = vld [vmem:[#allocation5 + $0x270] sm:$0xff] }
 0x347   : > { %v2488_v18 = vadd.f32 %v4708_v15, %v2487_v12  ;;  %v2526_v40 = vsub.f32 1.0, %v2525_v24  ;;  %v2549_v2 = vmul.f32 %v2548_v37, %v6792_v59  ;;  %vm2491_vm6 = vmor %vm2489_vm5, %vm2490_vm4  ;;  %vm2494_vm7 = vcmp.eq.f32.partialorder %v2493_v8, 8.507059e+37  ;;  %3427 = vmatpush.msrb.mxu0 %v3419_v42 }
 0x348   : > { %v2496_v43 = vor.u32 1.1754944e-38, %v2495_v41  ;;  %v2563_v34 = vadd.f32 1.0, %v2562_v51  ;;  %vm2530_vm8 = vweird.f32 %v4710_v28  ;;  %v2535_v45 = vand.u32 2147483648, %v6858_v58 }
 0x349   : > { %v2492_v7 = vsel %vm2491_vm6, %v4708_v15, %v2488_v18  ;;  %v2527_v21 = vmul.f32 %v4710_v28, %v2526_v40  ;;  %v2593_v14 = vadd.f32 1.0, %v4463_v31  ;;  %v2533_v6 = vand.u32 2147483647, %v6858_v58  ;;  %3428 = vmatpush.msrb.mxu0 %v3418_v13  ;;  %v3415_v18 = vld [vmem:[#allocation5 + $0x250] sm:$0xff] }
 0x34a   : > { %2684 = vmatmul.f32.gmra.mxu3 %v2608_v39  ;;  %v2497_v5 = vsel %vm2494_vm7, %v2496_v43, %v2492_v7  ;;  %4711 = vrcp.f32 %v2563_v34  ;;  %vm2529_vm9 = vweird.f32 %v6858_v58  ;;  %v1921_v50 = vmul.f32 0.5, %v6635_v61  ;;  %v3416_v39 = vld [vmem:[#allocation5 + $0x258] sm:$0xff]  ;;  %v3414_v7 = vld [vmem:[#allocation5 + $0x248] sm:$0xff] }
 0x34b   : > { %v2498_v0 = vmul.f32 %v2497_v5, %v2473_v44  ;;  %v2528_v60 = vadd.f32 %v4710_v28, %v2527_v21  ;;  %v2512_v48 = vadd.f32 1.1283791, %v2511_v55  ;;  %vm2531_vm10 = vmor %vm2529_vm9, %vm2530_vm8  ;;  %v2550_v27 = vadd.f32 0.18741608, %v2549_v2  ;;  %v3417_v44 = vld [vmem:[#allocation5 + $0x260] sm:$0xff] }
 0x34c   : > { %v2536_v30 = vor.u32 1.1754944e-38, %v2535_v45  ;;  %v2609_v63 = vmul.f32 %v2593_v14, %v1921_v50  ;;  %vm2534_vm11 = vcmp.eq.f32.partialorder %v2533_v6, 8.507059e+37  ;;  %v6892_v11 = vadd.f32 %v6887_v56, %v2652_v22  ;;  %3429 = vmatpush.msrb.mxu0 %v3417_v44  ;;  %v3412_v22 = vld [vmem:[#allocation5 + $0x238] sm:$0xff] }
 0x34d   : > { %v2532_v47 = vsel %vm2531_vm10, %v4710_v28, %v2528_v60  ;;  %v4464_v20 = vclamps-f32 %v2498_v0, 1.0  ;;  %v2513_v52 = vmul.f32 %v2512_v48, %v6713_v25  ;;  %v2551_v54 = vmul.f32 %v2550_v27, %v6792_v59  ;;  %v3413_v60 = vld [vmem:[#allocation5 + $0x240] sm:$0xff] }
 0x34e   : > { %v2537_v58 = vsel %vm2534_vm11, %v2536_v30, %v2532_v47  ;;  %v6896_v61 = vmul.f32 0.70710677, %v6892_v11  ;;  %v1922_v26 = vmul.f32 0.5, %v6677_v19  ;;  %v2575_v3 = vand.u32 2147483648, %v2563_v34  ;;  %3430 = vmatpush.msrb.mxu0 %v3416_v39 }
 0x34f   : > { %v2594_v38 = vadd.f32 1.0, %v4464_v20  ;;  %v2538_v32 = vmul.f32 %v2537_v58, %v2513_v52  ;;  %v2552_v29 = vadd.f32 1.1283791, %v2551_v54  ;;  %v2573_v23 = vand.u32 2147483647, %v2563_v34 }
 0x350   : > { %v4712_v46 = vpop.eup %4711  ;;  %v2732_v49 = vmul.f32 %v6896_v61, %v6896_v61  ;;  %vm2569_vm13 = vweird.f32 %v2563_v34  ;;  %v2576_v33 = vor.u32 1.1754944e-38, %v2575_v3  ;;  %v1923_v31 = vmul.f32 0.5, %v6701_v17  ;;  %3431 = vmatpush.msrb.mxu0 %v3415_v18 }
 0x351   : > { %v2565_v15 = vmul.f32 %v4712_v46, %v2563_v34  ;;  %vm2570_vm12 = vweird.f32 %v4712_v46  ;;  %v2610_v62 = vmul.f32 %v2594_v38, %v1922_v26  ;;  %v4465_v37 = vclamps-f32 %v2538_v32, 1.0 }
 0x352   : > { %2687 = vmatmul.f32.gmra.mxu3 %v2609_v63  ;;  %v6902_v1 = vmin.f32 %v2732_v49, 16.0  ;;  %vm2571_vm14 = vmor %vm2569_vm13, %vm2570_vm12  ;;  %v2553_v19 = vmul.f32 %v2552_v29, %v6773_v57  ;;  %vm2574_vm15 = vcmp.eq.f32.partialorder %v2573_v23, 8.507059e+37  ;;  %3432 = vmatpush.msrb.mxu0 %v3414_v7  ;;  %v1924_v53 = vmul.f32 0.5, %v6758_v16  ;;  %v3411_v29 = vld [vmem:[#allocation5 + $0x230] sm:$0xff] }
 0x353   : > { %v2566_v9 = vsub.f32 1.0, %v2565_v15  ;;  %v2595_v8 = vadd.f32 1.0, %v4465_v37 }
 0x354   : > { %v2745_v59 = vmul.f32 3.8918573e-05, %v6902_v1  ;;  %v2734_v36 = vmul.f32 2.1237322e-06, %v6902_v1  ;;  %3433 = vmatpush.msrb.mxu0 %v3413_v60 }
 0x355   : > { %v2567_v25 = vmul.f32 %v4712_v46, %v2566_v9  ;;  %v2611_v40 = vmul.f32 %v2595_v8, %v1923_v31 }
 0x356   : > { %v2746_v28 = vadd.f32 0.001143296, %v2745_v59  ;;  %v2735_v24 = vadd.f32 0.00028619796, %v2734_v36  ;;  %3434 = vmatpush.msrb.mxu0 %v3412_v22 }
 0x357   : > { %v2568_v35 = vadd.f32 %v4712_v46, %v2567_v25  ;;  %v3410_v25 = vld [vmem:[#allocation5 + $0x228] sm:$0xff] }
 0x358   : > { %v2747_v10 = vmul.f32 %v2746_v28, %v6902_v1  ;;  %v2736_v34 = vmul.f32 %v2735_v24, %v6902_v1  ;;  %3435 = vmatpush.msrb.mxu0 %v3411_v29 }
 0x359   : > { %v2572_v4 = vsel %vm2571_vm14, %v4712_v46, %v2568_v35 }
 0x35a   : > { %2690 = vmatmul.f32.gmra.mxu3 %v2610_v62  ;;  %v2577_v41 = vsel %vm2574_vm15, %v2576_v33, %v2572_v4  ;;  %v2748_v51 = vadd.f32 0.014752088, %v2747_v10  ;;  %v2737_v5 = vadd.f32 0.0036580483, %v2736_v34  ;;  %3436 = vmatpush.msrb.mxu0 %v3410_v25 }
 0x35b   : > { %v2578_v12 = vmul.f32 %v2577_v41, %v2553_v19 }
 0x35c   : > { %v2749_v57 = vmul.f32 %v2748_v51, %v6902_v1  ;;  %v2738_v13 = vmul.f32 %v2737_v5, %v6902_v1 }
 0x35d   : > { %v4466_v2 = vclamps-f32 %v2578_v12, 1.0 }
 0x35e   : > { %v2750_v21 = vadd.f32 0.112945676, %v2749_v57  ;;  %v2739_v46 = vadd.f32 0.05243302, %v2738_v13 }
 0x35f   : > { %v2655_v55 = vpop.f32.mrf.mxu3  ;;  %v2596_v17 = vadd.f32 1.0, %v4466_v2 }
 0x360   : > { %v6911_v43 = vadd.f32 %v6887_v56, %v2655_v55  ;;  %v2751_v14 = vmul.f32 %v2750_v21, %v6902_v1  ;;  %v2740_v9 = vmul.f32 %v2739_v46, %v6902_v1  ;;  %v3409_v46 = vld [vmem:[#allocation5 + $0x220] sm:$0xff] }
 0x361   : > { %v2612_v50 = vmul.f32 %v2596_v17, %v1924_v53  ;;  %3437 = vmatpush.msrb.mxu0 %v3409_v46 }
 0x362   : > { %v6915_v45 = vmul.f32 0.70710677, %v6911_v43  ;;  %2693 = vmatmul.f32.gmra.mxu3 %v2611_v40  ;;  %v2752_v42 = vadd.f32 0.4994258, %v2751_v14  ;;  %v2741_v33 = vadd.f32 0.18741608, %v2740_v9 }
 0x364   : > { %v2772_v6 = vmul.f32 %v6915_v45, %v6915_v45  ;;  %v2753_v48 = vmul.f32 %v2752_v42, %v6902_v1  ;;  %v2742_v55 = vmul.f32 %v2741_v33, %v6902_v1 }
 0x366   : > { %v6921_v0 = vmin.f32 %v2772_v6, 16.0  ;;  %v6927_v63 = vadd.f32 1.0, %v2753_v48  ;;  %v2743_v6 = vadd.f32 1.1283791, %v2742_v55  ;;  %v3406_v55 = vld [vmem:[#allocation5 + $0x208] sm:$0xff] }
 0x368   : > { %v2774_v27 = vmul.f32 2.1237322e-06, %v6921_v0  ;;  %v2658_v47 = vpop.f32.mrf.mxu3  ;;  %v2785_v30 = vmul.f32 3.8918573e-05, %v6921_v0  ;;  %4713 = vrcp.f32 %v6927_v63  ;;  %v2766_v21 = vand.u32 2147483648, %v6927_v63 }
 0x369   : > { %v6930_v16 = vadd.f32 %v6887_v56, %v2658_v47  ;;  %vm2760_vm1 = vweird.f32 %v6927_v63  ;;  %v2764_v1 = vand.u32 2147483647, %v6927_v63 }
 0x36a   : > { %v2775_v20 = vadd.f32 0.00028619796, %v2774_v27  ;;  %v2786_v58 = vadd.f32 0.001143296, %v2785_v30  ;;  %2696 = vmatmul.f32.gmra.mxu3 %v2612_v50  ;;  %v2767_v13 = vor.u32 1.1754944e-38, %v2766_v21 }
 0x36b   : > { %v6935_v54 = vmul.f32 0.70710677, %v6930_v16  ;;  %vm2765_vm3 = vcmp.eq.f32.partialorder %v2764_v1, 8.507059e+37 }
 0x36c   : > { %v2776_v52 = vmul.f32 %v2775_v20, %v6921_v0  ;;  %v2787_v15 = vmul.f32 %v2786_v58, %v6921_v0 }
 0x36d   : > { %v2812_v32 = vmul.f32 %v6935_v54, %v6935_v54 }
 0x36e   : > { %v2777_v38 = vadd.f32 0.0036580483, %v2776_v52  ;;  %v2788_v49 = vadd.f32 0.014752088, %v2787_v15  ;;  %v4714_v3 = vpop.eup %4713  ;;  %v3408_v52 = vld [vmem:[#allocation5 + $0x218] sm:$0xff]  ;;  %v2744_v15 = vmul.f32 %v2743_v6, %v6896_v61 }
 0x36f   : > { %v6941_v26 = vmin.f32 %v2812_v32, 16.0  ;;  %v2756_v62 = vmul.f32 %v4714_v3, %v6927_v63  ;;  %vm2761_vm0 = vweird.f32 %v4714_v3  ;;  %3438 = vmatpush.msrb.mxu0 %v3408_v52 }
 0x370   : > { %v2789_v23 = vmul.f32 %v2788_v49, %v6921_v0  ;;  %v2778_v37 = vmul.f32 %v2777_v38, %v6921_v0  ;;  %vm2762_vm2 = vmor %vm2760_vm1, %vm2761_vm0 }
 0x371   : > { %v2814_v59 = vmul.f32 2.1237322e-06, %v6941_v26  ;;  %v2825_v36 = vmul.f32 3.8918573e-05, %v6941_v26  ;;  %v2757_v28 = vsub.f32 1.0, %v2756_v62 }
 0x372   : > { %v2790_v35 = vadd.f32 0.112945676, %v2789_v23  ;;  %v2779_v24 = vadd.f32 0.05243302, %v2778_v37 }
 0x373   : > { %v2815_v19 = vadd.f32 0.00028619796, %v2814_v59  ;;  %v2826_v10 = vadd.f32 0.001143296, %v2825_v36  ;;  %v2758_v12 = vmul.f32 %v4714_v3, %v2757_v28 }
 0x374   : > { %v2791_v41 = vmul.f32 %v2790_v35, %v6921_v0  ;;  %v2780_v7 = vmul.f32 %v2779_v24, %v6921_v0 }
 0x375   : > { %v2816_v44 = vmul.f32 %v2815_v19, %v6941_v26  ;;  %v2827_v51 = vmul.f32 %v2826_v10, %v6941_v26  ;;  %v2759_v34 = vadd.f32 %v4714_v3, %v2758_v12  ;;  %v3407_v19 = vld [vmem:[#allocation5 + $0x210] sm:$0xff] }
 0x376   : > { %v2661_v4 = vpop.f32.mrf.mxu3  ;;  %v2792_v31 = vadd.f32 0.4994258, %v2791_v41  ;;  %v2781_v22 = vadd.f32 0.18741608, %v2780_v7  ;;  %3439 = vmatpush.msrb.mxu0 %v3407_v19  ;;  %v3405_v7 = vld [vmem:[#allocation5 + $0x200] sm:$0xff] }
 0x377   : > { %v6949_v8 = vadd.f32 %v6887_v56, %v2661_v4  ;;  %v2817_v18 = vadd.f32 0.0036580483, %v2816_v44  ;;  %v2828_v57 = vadd.f32 0.014752088, %v2827_v51  ;;  %v2763_v60 = vsel %vm2762_vm2, %v4714_v3, %v2759_v34 }
 0x378   : > { %v2793_v2 = vmul.f32 %v2792_v31, %v6921_v0  ;;  %v2768_v63 = vsel %vm2765_vm3, %v2767_v13, %v2763_v60  ;;  %v2782_v38 = vmul.f32 %v2781_v22, %v6921_v0  ;;  %v2700_v44 = vmul.f32 0.5, %v6892_v11  ;;  %3440 = vmatpush.msrb.mxu0 %v3406_v55 }
 0x379   : > { %v6954_v39 = vmul.f32 0.70710677, %v6949_v8  ;;  %v2829_v5 = vmul.f32 %v2828_v57, %v6941_v26  ;;  %v2818_v53 = vmul.f32 %v2817_v18, %v6941_v26  ;;  %v2769_v3 = vmul.f32 %v2768_v63, %v2744_v15 }
 0x37a   : > { %v6965_v14 = vadd.f32 1.0, %v2793_v2  ;;  %v2783_v0 = vadd.f32 1.1283791, %v2782_v38  ;;  %3441 = vmatpush.msrb.mxu0 %v3405_v7 }
 0x37b   : > { %v2852_v40 = vmul.f32 %v6954_v39, %v6954_v39  ;;  %v2830_v50 = vadd.f32 0.112945676, %v2829_v5  ;;  %v2819_v20 = vadd.f32 0.05243302, %v2818_v53  ;;  %v4467_v12 = vclamps-f32 %v2769_v3, 1.0 }
 0x37c   : > { %4715 = vrcp.f32 %v6965_v14  ;;  %v2804_v36 = vand.u32 2147483647, %v6965_v14  ;;  %v2806_v4 = vand.u32 2147483648, %v6965_v14  ;;  %vm2800_vm5 = vweird.f32 %v6965_v14 }
 0x37d   : > { %v6963_v17 = vmin.f32 %v2852_v40, 16.0  ;;  %v2831_v47 = vmul.f32 %v2830_v50, %v6941_v26  ;;  %v2820_v37 = vmul.f32 %v2819_v20, %v6941_v26  ;;  %v3372_v18 = vadd.f32 1.0, %v4467_v12 }
 0x37e   : > { %v2784_v57 = vmul.f32 %v2783_v0, %v6915_v45  ;;  %vm2805_vm7 = vcmp.eq.f32.partialorder %v2804_v36, 8.507059e+37  ;;  %v2807_v11 = vor.u32 1.1754944e-38, %v2806_v4 }
 0x37f   : > { %v2854_v42 = vmul.f32 2.1237322e-06, %v6963_v17  ;;  %v2865_v48 = vmul.f32 3.8918573e-05, %v6963_v17  ;;  %v2832_v32 = vadd.f32 0.4994258, %v2831_v47  ;;  %v3388_v5 = vmul.f32 %v3372_v18, %v2700_v44 }
 0x380   : > { %v2821_v31 = vadd.f32 0.18741608, %v2820_v37  ;;  %v2702_v18 = vmul.f32 0.5, %v6930_v16 }
 0x381   : > { %v2855_v27 = vadd.f32 0.00028619796, %v2854_v42  ;;  %v2866_v30 = vadd.f32 0.001143296, %v2865_v48  ;;  %v2833_v62 = vmul.f32 %v2832_v32, %v6941_v26  ;;  %3442 = vmatmul.f32.vlgmr.msrb.gmra.mxu0 %v3388_v5 }
 0x382   : > { %v4716_v9 = vpop.eup %4715  ;;  %v2664_v25 = vpop.f32.mrf.mxu3  ;;  %v2822_v53 = vmul.f32 %v2821_v31, %v6941_v26  ;;  %v2701_v26 = vmul.f32 0.5, %v6911_v43 }
 0x383   : > { %v2856_v58 = vmul.f32 %v2855_v27, %v6963_v17  ;;  %v2867_v49 = vmul.f32 %v2866_v30, %v6963_v17  ;;  %v2796_v23 = vmul.f32 %v4716_v9, %v6965_v14  ;;  %v6983_v59 = vadd.f32 %v6887_v56, %v2664_v25 }
 0x384   : > { %v6986_v33 = vadd.f32 1.0, %v2833_v62  ;;  %vm2801_vm4 = vweird.f32 %v4716_v9  ;;  %v2823_v20 = vadd.f32 1.1283791, %v2822_v53 }
 0x385   : > { %v2857_v29 = vadd.f32 0.0036580483, %v2856_v58  ;;  %v2868_v61 = vadd.f32 0.014752088, %v2867_v49  ;;  %v2797_v35 = vsub.f32 1.0, %v2796_v23  ;;  %vm2802_vm6 = vmor %vm2800_vm5, %vm2801_vm4 }
 0x386   : > { %v6989_v28 = vmul.f32 0.70710677, %v6983_v59  ;;  %4717 = vrcp.f32 %v6986_v33  ;;  %v2846_v38 = vand.u32 2147483648, %v6986_v33  ;;  %vm2840_vm9 = vweird.f32 %v6986_v33 }
 0x387   : > { %v2869_v41 = vmul.f32 %v2868_v61, %v6963_v17  ;;  %v2858_v10 = vmul.f32 %v2857_v29, %v6963_v17  ;;  %v2798_v24 = vmul.f32 %v4716_v9, %v2797_v35  ;;  %v2844_v29 = vand.u32 2147483647, %v6986_v33 }
 0x388   : > { %v2892_v51 = vmul.f32 %v6989_v28, %v6989_v28  ;;  %v2847_v61 = vor.u32 1.1754944e-38, %v2846_v38  ;;  %v2824_v35 = vmul.f32 %v2823_v20, %v6935_v54 }
 0x389   : > { %v2799_v40 = vadd.f32 %v4716_v9, %v2798_v24  ;;  %v2870_v2 = vadd.f32 0.112945676, %v2869_v41  ;;  %v2859_v21 = vadd.f32 0.05243302, %v2858_v10  ;;  %vm2845_vm11 = vcmp.eq.f32.partialorder %v2844_v29, 8.507059e+37 }
 0x38a   : > { %v7000_v34 = vmin.f32 %v2892_v51, 16.0 }
 0x38b   : > { %v2803_v1 = vsel %vm2802_vm6, %v4716_v9, %v2799_v40  ;;  %v2871_v6 = vmul.f32 %v2870_v2, %v6963_v17  ;;  %v2860_v27 = vmul.f32 %v2859_v21, %v6963_v17 }
 0x38c   : > { %v2894_v14 = vmul.f32 2.1237322e-06, %v7000_v34  ;;  %v2808_v42 = vsel %vm2805_vm7, %v2807_v11, %v2803_v1  ;;  %v2905_v45 = vmul.f32 3.8918573e-05, %v7000_v34  ;;  %v4718_v60 = vpop.eup %4717 }
 0x38d   : > { %v2809_v22 = vmul.f32 %v2808_v42, %v2784_v57  ;;  %v2872_v50 = vadd.f32 0.4994258, %v2871_v6  ;;  %v2836_v13 = vmul.f32 %v4718_v60, %v6986_v33  ;;  %vm2841_vm8 = vweird.f32 %v4718_v60 }
 0x38e   : > { %v2895_v48 = vadd.f32 0.00028619796, %v2894_v14  ;;  %v2906_v63 = vadd.f32 0.001143296, %v2905_v45  ;;  %v2861_v43 = vadd.f32 0.18741608, %v2860_v27  ;;  %vm2842_vm10 = vmor %vm2840_vm9, %vm2841_vm8 }
 0x38f   : > { %v4468_v47 = vclamps-f32 %v2809_v22, 1.0  ;;  %v2873_v30 = vmul.f32 %v2872_v50, %v6963_v17  ;;  %v2837_v46 = vsub.f32 1.0, %v2836_v13 }
 0x390   : > { %v2896_v58 = vmul.f32 %v2895_v48, %v7000_v34  ;;  %v2907_v49 = vmul.f32 %v2906_v63, %v7000_v34  ;;  %v2862_v4 = vmul.f32 %v2861_v43, %v6963_v17 }
 0x391   : > { %v2667_v52 = vpop.f32.mrf.mxu3  ;;  %v3373_v15 = vadd.f32 1.0, %v4468_v47  ;;  %v7013_v32 = vadd.f32 1.0, %v2873_v30  ;;  %v2838_v3 = vmul.f32 %v4718_v60, %v2837_v46 }
 0x392   : > { %v7017_v9 = vadd.f32 %v6887_v56, %v2667_v52  ;;  %v2897_v23 = vadd.f32 0.0036580483, %v2896_v58  ;;  %v2908_v0 = vadd.f32 0.014752088, %v2907_v49  ;;  %v2863_v40 = vadd.f32 1.1283791, %v2862_v4 }
 0x393   : > { %v3389_v25 = vmul.f32 %v3373_v15, %v2701_v26  ;;  %4719 = vrcp.f32 %v7013_v32  ;;  %v2839_v37 = vadd.f32 %v4718_v60, %v2838_v3  ;;  %v2884_v1 = vand.u32 2147483647, %v7013_v32 }
 0x394   : > { %v7022_v62 = vmul.f32 0.70710677, %v7017_v9  ;;  %v2909_v10 = vmul.f32 %v2908_v0, %v7000_v34  ;;  %v2898_v12 = vmul.f32 %v2897_v23, %v7000_v34  ;;  %v2886_v45 = vand.u32 2147483648, %v7013_v32 }
 0x395   : > { %3445 = vmatmul.f32.gmra.mxu0 %v3389_v25  ;;  %v2843_v19 = vsel %vm2842_vm10, %v4718_v60, %v2839_v37  ;;  %vm2880_vm13 = vweird.f32 %v7013_v32  ;;  %v2864_v58 = vmul.f32 %v2863_v40, %v6954_v39  ;;  %vm2885_vm15 = vcmp.eq.f32.partialorder %v2884_v1, 8.507059e+37 }
 0x396   : > { %v2932_v36 = vmul.f32 %v7022_v62, %v7022_v62  ;;  %v2848_v41 = vsel %vm2845_vm11, %v2847_v61, %v2843_v19  ;;  %v2910_v31 = vadd.f32 0.112945676, %v2909_v10  ;;  %v2899_v57 = vadd.f32 0.05243302, %v2898_v12 }
 0x397   : > { %v2849_v33 = vmul.f32 %v2848_v41, %v2824_v35  ;;  %v2887_v20 = vor.u32 1.1754944e-38, %v2886_v45  ;;  %v2703_v61 = vmul.f32 0.5, %v6949_v8 }
 0x398   : > { %v7031_v24 = vmin.f32 %v2932_v36, 16.0  ;;  %v2911_v17 = vmul.f32 %v2910_v31, %v7000_v34  ;;  %v2900_v48 = vmul.f32 %v2899_v57, %v7000_v34 }
 0x399   : > { %v4720_v44 = vpop.eup %4719  ;;  %v4469_v54 = vclamps-f32 %v2849_v33, 1.0 }
 0x39a   : > { %v2934_v51 = vmul.f32 2.1237322e-06, %v7031_v24  ;;  %v2876_v55 = vmul.f32 %v4720_v44, %v7013_v32  ;;  %v2945_v2 = vmul.f32 3.8918573e-05, %v7031_v24  ;;  %v2912_v6 = vadd.f32 0.4994258, %v2911_v17 }
 0x39b   : > { %v3374_v11 = vadd.f32 1.0, %v4469_v54  ;;  %vm2881_vm12 = vweird.f32 %v4720_v44  ;;  %v2901_v52 = vadd.f32 0.18741608, %v2900_v48 }
 0x39c   : > { %v2935_v7 = vadd.f32 0.00028619796, %v2934_v51  ;;  %v2877_v21 = vsub.f32 1.0, %v2876_v55  ;;  %v2946_v53 = vadd.f32 0.001143296, %v2945_v2  ;;  %v2913_v22 = vmul.f32 %v2912_v6, %v7000_v34  ;;  %vm2882_vm14 = vmor %vm2880_vm13, %vm2881_vm12 }
 0x39d   : > { %v2670_v5 = vpop.f32.mrf.mxu3  ;;  %v3390_v16 = vmul.f32 %v3374_v11, %v2702_v18  ;;  %v2902_v0 = vmul.f32 %v2901_v52, %v7000_v34 }
 0x39e   : > { %v2936_v14 = vmul.f32 %v2935_v7, %v7031_v24  ;;  %v7041_v42 = vadd.f32 %v6887_v56, %v2670_v5  ;;  %v2878_v60 = vmul.f32 %v4720_v44, %v2877_v21  ;;  %v2947_v50 = vmul.f32 %v2946_v53, %v7031_v24 }
 0x39f   : > { %3448 = vmatmul.f32.gmra.mxu0 %v3390_v16  ;;  %v7051_v30 = vadd.f32 1.0, %v2913_v22  ;;  %v2903_v17 = vadd.f32 1.1283791, %v2902_v0 }
 0x3a0   : > { %v2937_v13 = vadd.f32 0.0036580483, %v2936_v14  ;;  %v7048_v27 = vmul.f32 0.70710677, %v7041_v42  ;;  %v2879_v47 = vadd.f32 %v4720_v44, %v2878_v60  ;;  %v2948_v63 = vadd.f32 0.014752088, %v2947_v50 }
 0x3a1   : > { %4721 = vrcp.f32 %v7051_v30  ;;  %v2926_v31 = vand.u32 2147483648, %v7051_v30  ;;  %vm2920_vm0 = vweird.f32 %v7051_v30  ;;  %v2924_v5 = vand.u32 2147483647, %v7051_v30 }
 0x3a2   : > { %v2972_v26 = vmul.f32 %v7048_v27, %v7048_v27  ;;  %v2883_v46 = vsel %vm2882_vm14, %v4720_v44, %v2879_v47  ;;  %v2938_v15 = vmul.f32 %v2937_v13, %v7031_v24  ;;  %v2949_v29 = vmul.f32 %v2948_v63, %v7031_v24 }
 0x3a3   : > { %v2888_v32 = vsel %vm2885_vm15, %v2887_v20, %v2883_v46  ;;  %v2927_v53 = vor.u32 1.1754944e-38, %v2926_v31  ;;  %v2904_v47 = vmul.f32 %v2903_v17, %v6989_v28  ;;  %vm2925_vm3 = vcmp.eq.f32.partialorder %v2924_v5, 8.507059e+37 }
 0x3a4   : > { %v7058_v38 = vmin.f32 %v2972_v26, 16.0  ;;  %v2889_v3 = vmul.f32 %v2888_v32, %v2864_v58  ;;  %v2950_v23 = vadd.f32 0.112945676, %v2949_v29  ;;  %v2939_v35 = vadd.f32 0.05243302, %v2938_v15 }
 0x3a5   : > { %v2673_v49 = vpop.f32.mrf.mxu3 }
 0x3a6   : > { %v2974_v43 = vmul.f32 2.1237322e-06, %v7058_v38  ;;  %v7063_v25 = vadd.f32 %v6887_v56, %v2673_v49  ;;  %v4470_v39 = vclamps-f32 %v2889_v3, 1.0  ;;  %v2985_v37 = vmul.f32 3.8918573e-05, %v7058_v38 }
 0x3a7   : > { %v4722_v19 = vpop.eup %4721  ;;  %v2951_v10 = vmul.f32 %v2950_v23, %v7031_v24  ;;  %v2940_v55 = vmul.f32 %v2939_v35, %v7031_v24 }
 0x3a8   : > { %v2975_v36 = vadd.f32 0.00028619796, %v2974_v43  ;;  %v7069_v4 = vmul.f32 0.70710677, %v7063_v25  ;;  %v3375_v41 = vadd.f32 1.0, %v4470_v39  ;;  %v2916_v44 = vmul.f32 %v4722_v19, %v7051_v30 }
 0x3a9   : > { %v2986_v12 = vadd.f32 0.001143296, %v2985_v37  ;;  %v2952_v51 = vadd.f32 0.4994258, %v2951_v10  ;;  %vm2921_vm1 = vweird.f32 %v4722_v19  ;;  %v2941_v16 = vadd.f32 0.18741608, %v2940_v55 }
 0x3aa   : > { %v2976_v33 = vmul.f32 %v2975_v36, %v7058_v38  ;;  %v3012_v8 = vmul.f32 %v7069_v4, %v7069_v4  ;;  %v3391_v34 = vmul.f32 %v3375_v41, %v2703_v61  ;;  %v2917_v40 = vsub.f32 1.0, %v2916_v44  ;;  %vm2922_vm2 = vmor %vm2920_vm0, %vm2921_vm1 }
 0x3ab   : > { %v2987_v54 = vmul.f32 %v2986_v12, %v7058_v38  ;;  %v2953_v57 = vmul.f32 %v2952_v51, %v7031_v24  ;;  %v2942_v52 = vmul.f32 %v2941_v16, %v7031_v24  ;;  %v2704_v61 = vmul.f32 0.5, %v6983_v59 }
 0x3ac   : > { %v2977_v18 = vadd.f32 0.0036580483, %v2976_v33  ;;  %v7079_v2 = vmin.f32 %v3012_v8, 16.0  ;;  %3451 = vmatmul.f32.gmra.mxu0 %v3391_v34  ;;  %v2918_v21 = vmul.f32 %v4722_v19, %v2917_v40 }
 0x3ad   : > { %v2988_v7 = vadd.f32 0.014752088, %v2987_v54  ;;  %v7088_v14 = vadd.f32 1.0, %v2953_v57  ;;  %v2943_v35 = vadd.f32 1.1283791, %v2942_v52 }
 0x3ae   : > { %v2676_v11 = vpop.f32.mrf.mxu3  ;;  %v3014_v1 = vmul.f32 2.1237322e-06, %v7079_v2  ;;  %v2978_v45 = vmul.f32 %v2977_v18, %v7058_v38  ;;  %v2919_v60 = vadd.f32 %v4722_v19, %v2918_v21  ;;  %v3025_v13 = vmul.f32 3.8918573e-05, %v7079_v2 }
 0x3af   : > { %v7086_v6 = vadd.f32 %v6887_v56, %v2676_v11  ;;  %v2989_v22 = vmul.f32 %v2988_v7, %v7058_v38  ;;  %4723 = vrcp.f32 %v7088_v14  ;;  %v2966_v12 = vand.u32 2147483648, %v7088_v14 }
 0x3b0   : > { %v3015_v50 = vadd.f32 0.00028619796, %v3014_v1  ;;  %v2923_v30 = vsel %vm2922_vm2, %v4722_v19, %v2919_v60  ;;  %v2979_v15 = vadd.f32 0.05243302, %v2978_v45  ;;  %v3026_v49 = vadd.f32 0.001143296, %v3025_v13 }
 0x3b1   : > { %v7093_v48 = vmul.f32 0.70710677, %v7086_v6  ;;  %v2928_v20 = vsel %vm2925_vm3, %v2927_v53, %v2923_v30  ;;  %v2990_v46 = vadd.f32 0.112945676, %v2989_v22  ;;  %v2964_v54 = vand.u32 2147483647, %v7088_v14 }
 0x3b2   : > { %v3016_v63 = vmul.f32 %v3015_v50, %v7079_v2  ;;  %v2929_v58 = vmul.f32 %v2928_v20, %v2904_v47  ;;  %v3027_v23 = vmul.f32 %v3026_v49, %v7079_v2  ;;  %v2980_v36 = vmul.f32 %v2979_v15, %v7058_v38 }
 0x3b3   : > { %v3052_v26 = vmul.f32 %v7093_v48, %v7093_v48  ;;  %v2991_v29 = vmul.f32 %v2990_v46, %v7058_v38  ;;  %vm2960_vm5 = vweird.f32 %v7088_v14  ;;  %v2967_v7 = vor.u32 1.1754944e-38, %v2966_v12 }
 0x3b4   : > { %v4471_v3 = vclamps-f32 %v2929_v58, 1.0  ;;  %v3017_v43 = vadd.f32 0.0036580483, %v3016_v63  ;;  %v3028_v33 = vadd.f32 0.014752088, %v3027_v23  ;;  %v2944_v16 = vmul.f32 %v2943_v35, %v7022_v62 }
 0x3b5   : > { %v7102_v32 = vmin.f32 %v3052_v26, 16.0  ;;  %v4724_v28 = vpop.eup %4723  ;;  %v2992_v19 = vadd.f32 0.4994258, %v2991_v29  ;;  %v2981_v17 = vadd.f32 0.18741608, %v2980_v36  ;;  %vm2965_vm7 = vcmp.eq.f32.partialorder %v2964_v54, 8.507059e+37 }
 0x3b6   : > { %v3376_v0 = vadd.f32 1.0, %v4471_v3  ;;  %v2956_v24 = vmul.f32 %v4724_v28, %v7088_v14  ;;  %v3018_v44 = vmul.f32 %v3017_v43, %v7079_v2  ;;  %vm2961_vm4 = vweird.f32 %v4724_v28 }
 0x3b7   : > { %v3054_v39 = vmul.f32 2.1237322e-06, %v7102_v32  ;;  %v3065_v37 = vmul.f32 3.8918573e-05, %v7102_v32  ;;  %v2993_v8 = vmul.f32 %v2992_v19, %v7058_v38  ;;  %v3029_v55 = vmul.f32 %v3028_v33, %v7079_v2  ;;  %vm2962_vm6 = vmor %vm2960_vm5, %vm2961_vm4 }
 0x3b8   : > { %v3392_v41 = vmul.f32 %v3376_v0, %v2704_v61  ;;  %v2957_v10 = vsub.f32 1.0, %v2956_v24  ;;  %v3019_v21 = vadd.f32 0.05243302, %v3018_v44  ;;  %v2982_v22 = vmul.f32 %v2981_v17, %v7058_v38 }
 0x3b9   : > { %v3055_v31 = vadd.f32 0.00028619796, %v3054_v39  ;;  %v3066_v34 = vadd.f32 0.001143296, %v3065_v37  ;;  %v7120_v40 = vadd.f32 1.0, %v2993_v8  ;;  %v2705_v58 = vmul.f32 0.5, %v7017_v9 }
 0x3ba   : > { %3454 = vmatmul.f32.gmra.mxu0 %v3392_v41  ;;  %v2958_v59 = vmul.f32 %v4724_v28, %v2957_v10  ;;  %v3030_v11 = vadd.f32 0.112945676, %v3029_v55  ;;  %v3020_v47 = vmul.f32 %v3019_v21, %v7079_v2  ;;  %v2983_v49 = vadd.f32 1.1283791, %v2982_v22 }
 0x3bb   : > { %v3056_v5 = vmul.f32 %v3055_v31, %v7102_v32  ;;  %v3067_v53 = vmul.f32 %v3066_v34, %v7102_v32  ;;  %4725 = vrcp.f32 %v7120_v40  ;;  %v3004_v35 = vand.u32 2147483647, %v7120_v40 }
 0x3bc   : > { %v2679_v51 = vpop.f32.mrf.mxu3  ;;  %v2959_v57 = vadd.f32 %v4724_v28, %v2958_v59  ;;  %v3031_v13 = vmul.f32 %v3030_v11, %v7079_v2  ;;  %v3006_v41 = vand.u32 2147483648, %v7120_v40  ;;  %v2984_v44 = vmul.f32 %v2983_v49, %v7048_v27 }
 0x3bd   : > { %v7117_v18 = vadd.f32 %v6887_v56, %v2679_v51  ;;  %v3057_v30 = vadd.f32 0.0036580483, %v3056_v5  ;;  %v3068_v26 = vadd.f32 0.014752088, %v3067_v53  ;;  %vm3000_vm9 = vweird.f32 %v7120_v40 }
 0x3be   : > { %v2963_v45 = vsel %vm2962_vm6, %v4724_v28, %v2959_v57  ;;  %v3032_v20 = vadd.f32 0.4994258, %v3031_v13  ;;  %v3021_v28 = vadd.f32 0.18741608, %v3020_v47  ;;  %vm3005_vm10 = vcmp.eq.f32.partialorder %v3004_v35, 8.507059e+37 }
 0x3bf   : > { %v7124_v1 = vmul.f32 0.70710677, %v7117_v18  ;;  %v2968_v60 = vsel %vm2965_vm7, %v2967_v7, %v2963_v45  ;;  %v3069_v52 = vmul.f32 %v3068_v26, %v7102_v32  ;;  %v3058_v43 = vmul.f32 %v3057_v30, %v7102_v32 }
 0x3c0   : > { %v2969_v50 = vmul.f32 %v2968_v60, %v2944_v16  ;;  %v3033_v29 = vmul.f32 %v3032_v20, %v7079_v2  ;;  %v3022_v51 = vmul.f32 %v3021_v28, %v7079_v2  ;;  %v3007_v57 = vor.u32 1.1754944e-38, %v3006_v41 }
 0x3c1   : > { %v3092_v14 = vmul.f32 %v7124_v1, %v7124_v1  ;;  %v4726_v15 = vpop.eup %4725  ;;  %v3070_v36 = vadd.f32 0.112945676, %v3069_v52  ;;  %v3059_v10 = vadd.f32 0.05243302, %v3058_v43 }
 0x3c2   : > { %v4472_v62 = vclamps-f32 %v2969_v50, 1.0  ;;  %v2996_v23 = vmul.f32 %v4726_v15, %v7120_v40  ;;  %v7148_v61 = vadd.f32 1.0, %v3033_v29  ;;  %vm3001_vm8 = vweird.f32 %v4726_v15 }
 0x3c3   : > { %v7134_v63 = vmin.f32 %v3092_v14, 16.0  ;;  %v3071_v8 = vmul.f32 %v3070_v36, %v7102_v32  ;;  %vm3002_vm11 = vmor %vm3000_vm9, %vm3001_vm8  ;;  %v3060_v7 = vmul.f32 %v3059_v10, %v7102_v32  ;;  %v2706_v14 = vmul.f32 0.5, %v7041_v42 }
 0x3c4   : > { %v3377_v3 = vadd.f32 1.0, %v4472_v62  ;;  %v2997_v24 = vsub.f32 1.0, %v2996_v23  ;;  %4727 = vrcp.f32 %v7148_v61  ;;  %v3023_v50 = vadd.f32 1.1283791, %v3022_v51 }
 0x3c5   : > { %v2682_v46 = vpop.f32.mrf.mxu3  ;;  %v3094_v39 = vmul.f32 2.1237322e-06, %v7134_v63  ;;  %v3105_v0 = vmul.f32 3.8918573e-05, %v7134_v63  ;;  %v3072_v27 = vadd.f32 0.4994258, %v3071_v8  ;;  %vm3040_vm13 = vweird.f32 %v7148_v61 }
 0x3c6   : > { %v7139_v38 = vadd.f32 %v6887_v56, %v2682_v46  ;;  %v3393_v37 = vmul.f32 %v3377_v3, %v2705_v58  ;;  %v2998_v33 = vmul.f32 %v4726_v15, %v2997_v24  ;;  %v3061_v26 = vadd.f32 0.18741608, %v3060_v7 }
 0x3c7   : > { %v3095_v12 = vadd.f32 0.00028619796, %v3094_v39  ;;  %v3106_v34 = vadd.f32 0.001143296, %v3105_v0  ;;  %v3073_v30 = vmul.f32 %v3072_v27, %v7102_v32  ;;  %v3046_v52 = vand.u32 2147483648, %v7148_v61 }
 0x3c8   : > { %v7146_v9 = vmul.f32 0.70710677, %v7139_v38  ;;  %3457 = vmatmul.f32.gmra.mxu0 %v3393_v37  ;;  %v2999_v54 = vadd.f32 %v4726_v15, %v2998_v33  ;;  %v3044_v28 = vand.u32 2147483647, %v7148_v61  ;;  %v3062_v35 = vmul.f32 %v3061_v26, %v7102_v32 }
 0x3c9   : > { %v3096_v11 = vmul.f32 %v3095_v12, %v7134_v63  ;;  %v3107_v2 = vmul.f32 %v3106_v34, %v7134_v63  ;;  %v3024_v10 = vmul.f32 %v3023_v50, %v7069_v4 }
 0x3ca   : > { %v3132_v19 = vmul.f32 %v7146_v9, %v7146_v9  ;;  %v3003_v21 = vsel %vm3002_vm11, %v4726_v15, %v2999_v54  ;;  %v4728_v5 = vpop.eup %4727  ;;  %v7180_v15 = vadd.f32 1.0, %v3073_v30  ;;  %vm3045_vm15 = vcmp.eq.f32.partialorder %v3044_v28, 8.507059e+37 }
 0x3cb   : > { %v3008_v16 = vsel %vm3005_vm10, %v3007_v57, %v3003_v21  ;;  %v3036_v22 = vmul.f32 %v4728_v5, %v7148_v61  ;;  %v3108_v58 = vadd.f32 0.014752088, %v3107_v2  ;;  %v3097_v46 = vadd.f32 0.0036580483, %v3096_v11 }
 0x3cc   : > { %v7157_v31 = vmin.f32 %v3132_v19, 16.0  ;;  %v3009_v60 = vmul.f32 %v3008_v16, %v2984_v44  ;;  %vm3041_vm12 = vweird.f32 %v4728_v5  ;;  %4729 = vrcp.f32 %v7180_v15 }
 0x3cd   : > { %v2685_v59 = vpop.f32.mrf.mxu3  ;;  %v3037_v20 = vsub.f32 1.0, %v3036_v22  ;;  %v3109_v24 = vmul.f32 %v3108_v58, %v7134_v63  ;;  %v3098_v36 = vmul.f32 %v3097_v46, %v7134_v63  ;;  %vm3042_vm14 = vmor %vm3040_vm13, %vm3041_vm12  ;;  %v3047_v19 = vor.u32 1.1754944e-38, %v3046_v52 }
 0x3ce   : > { %v3134_v55 = vmul.f32 2.1237322e-06, %v7157_v31  ;;  %v7164_v17 = vadd.f32 %v6887_v56, %v2685_v59  ;;  %v3145_v45 = vmul.f32 3.8918573e-05, %v7157_v31  ;;  %v4473_v62 = vclamps-f32 %v3009_v60, 1.0 }
 0x3cf   : > { %v3038_v29 = vmul.f32 %v4728_v5, %v3037_v20  ;;  %v3110_v34 = vadd.f32 0.112945676, %v3109_v24  ;;  %v3063_v59 = vadd.f32 1.1283791, %v3062_v35  ;;  %v3099_v54 = vadd.f32 0.05243302, %v3098_v36 }
 0x3d0   : > { %v3135_v53 = vadd.f32 0.00028619796, %v3134_v55  ;;  %v7170_v40 = vmul.f32 0.70710677, %v7164_v17  ;;  %v3146_v42 = vadd.f32 0.001143296, %v3145_v45  ;;  %vm3080_vm1 = vweird.f32 %v7180_v15 }
 0x3d1   : > { %v3378_v3 = vadd.f32 1.0, %v4473_v62  ;;  %v3039_v0 = vadd.f32 %v4728_v5, %v3038_v29  ;;  %v2707_v55 = vmul.f32 0.5, %v7063_v25  ;;  %v3111_v16 = vmul.f32 %v3110_v34, %v7134_v63 }
 0x3d2   : > { %v3136_v13 = vmul.f32 %v3135_v53, %v7157_v31  ;;  %v3172_v47 = vmul.f32 %v7170_v40, %v7170_v40  ;;  %v3147_v41 = vmul.f32 %v3146_v42, %v7157_v31  ;;  %v4730_v51 = vpop.eup %4729  ;;  %v3086_v60 = vand.u32 2147483648, %v7180_v15 }
 0x3d3   : > { %v3394_v37 = vmul.f32 %v3378_v3, %v2706_v14  ;;  %v3043_v12 = vsel %vm3042_vm14, %v4728_v5, %v3039_v0  ;;  %v3076_v11 = vmul.f32 %v4730_v51, %v7180_v15  ;;  %v7206_v5 = vld [vmem:[#allocation7 + $0x3] ss:$0 sm:$0xff]  ;;  %v3064_v22 = vmul.f32 %v3063_v59, %v7093_v48 }
 0x3d4   : > { %v3137_v43 = vadd.f32 0.0036580483, %v3136_v13  ;;  %v7183_v39 = vmin.f32 %v3172_v47, 16.0  ;;  %v3048_v44 = vsel %vm3045_vm15, %v3047_v19, %v3043_v12  ;;  %v3148_v4 = vadd.f32 0.014752088, %v3147_v41 }
 0x3d5   : > { %v2688_v49 = vpop.f32.mrf.mxu3  ;;  %3460 = vmatmul.f32.gmra.mxu0 %v3394_v37  ;;  %v3049_v8 = vmul.f32 %v3048_v44, %v3024_v10  ;;  %v3077_v14 = vsub.f32 1.0, %v3076_v11  ;;  %v3100_v50 = vmul.f32 %v3099_v54, %v7134_v63  ;;  %v3084_v47 = vand.u32 2147483647, %v7180_v15 }
 0x3d6   : > { %v7186_v23 = vadd.f32 %v6887_v56, %v2688_v49  ;;  %v3138_v61 = vmul.f32 %v3137_v43, %v7157_v31  ;;  %v3174_v33 = vmul.f32 2.1237322e-06, %v7183_v39  ;;  %v3149_v25 = vmul.f32 %v3148_v4, %v7157_v31 }
 0x3d7   : > { %v4474_v7 = vclamps-f32 %v3049_v8, 1.0  ;;  %v3078_v62 = vmul.f32 %v4730_v51, %v3077_v14  ;;  %vm3081_vm0 = vweird.f32 %v4730_v51  ;;  %v3112_v58 = vadd.f32 0.4994258, %v3111_v16 }
 0x3d8   : > { %v7196_v56 = vmul.f32 0.70710677, %v7186_v23  ;;  %v3139_v21 = vadd.f32 0.05243302, %v3138_v61  ;;  %v3175_v2 = vadd.f32 0.00028619796, %v3174_v33  ;;  %vm3082_vm2 = vmor %vm3080_vm1, %vm3081_vm0 }
 0x3d9   : > { %v3379_v45 = vadd.f32 1.0, %v4474_v7  ;;  %v3150_v46 = vadd.f32 0.112945676, %v3149_v25  ;;  %v3079_v42 = vadd.f32 %v4730_v51, %v3078_v62  ;;  %v3087_v49 = vor.u32 1.1754944e-38, %v3086_v60 }
 0x3da   : > { %v3212_v32 = vmul.f32 %v7196_v56, %v7196_v56  ;;  %v3140_v20 = vmul.f32 %v3139_v21, %v7157_v31  ;;  %v3176_v48 = vmul.f32 %v3175_v2, %v7183_v39  ;;  %v3113_v29 = vmul.f32 %v3112_v58, %v7134_v63 }
 0x3db   : > { %v3395_v26 = vmul.f32 %v3379_v45, %v2707_v55  ;;  %v3151_v28 = vmul.f32 %v3150_v46, %v7157_v31  ;;  %v3185_v43 = vmul.f32 3.8918573e-05, %v7183_v39  ;;  %v3101_v37 = vadd.f32 0.18741608, %v3100_v50 }
 0x3dc   : > { %v7203_v57 = vmin.f32 %v3212_v32, 16.0  ;;  %v3083_v24 = vsel %vm3082_vm2, %v4730_v51, %v3079_v42  ;;  %vm3085_vm3 = vcmp.eq.f32.partialorder %v3084_v47, 8.507059e+37  ;;  %v3141_v35 = vadd.f32 0.18741608, %v3140_v20 }
 0x3dd   : > { %v2691_v27 = vpop.f32.mrf.mxu3  ;;  %3463 = vmatmul.f32.gmra.mxu0 %v3395_v26  ;;  %v3088_v19 = vsel %vm3085_vm3, %v3087_v49, %v3083_v24  ;;  %v3114_v41 = vadd.f32 1.0, %v3113_v29  ;;  %v3177_v10 = vadd.f32 0.0036580483, %v3176_v48  ;;  %v3152_v33 = vadd.f32 0.4994258, %v3151_v28 }
 0x3de   : > { %v7209_v53 = vadd.f32 %v7206_v5, %v2691_v27  ;;  %v3214_v13 = vmul.f32 2.1237322e-06, %v7203_v57  ;;  %v3089_v61 = vmul.f32 %v3088_v19, %v3064_v22  ;;  %v3186_v8 = vadd.f32 0.001143296, %v3185_v43 }
 0x3df   : > { %4731 = vrcp.f32 %v3114_v41  ;;  %v2708_v51 = vmul.f32 0.5, %v7086_v6  ;;  %v3102_v54 = vmul.f32 %v3101_v37, %v7134_v63  ;;  %v3153_v27 = vmul.f32 %v3152_v33, %v7157_v31 }
 0x3e0   : > { %v7219_v30 = vmul.f32 0.70710677, %v7209_v53  ;;  %v3215_v3 = vadd.f32 0.00028619796, %v3214_v13  ;;  %v4475_v34 = vclamps-f32 %v3089_v61, 1.0  ;;  %v3142_v7 = vmul.f32 %v3141_v35, %v7157_v31 }
 0x3e1   : > { %v3178_v11 = vmul.f32 %v3177_v10, %v7183_v39  ;;  %v3187_v2 = vmul.f32 %v3186_v8, %v7183_v39  ;;  %v7247_v14 = vadd.f32 1.0, %v3153_v27  ;;  %v3225_v6 = vmul.f32 3.8918573e-05, %v7203_v57 }
 0x3e2   : > { %v3252_v52 = vmul.f32 %v7219_v30, %v7219_v30  ;;  %v3216_v44 = vmul.f32 %v3215_v3, %v7203_v57  ;;  %v3380_v55 = vadd.f32 1.0, %v4475_v34  ;;  %v3103_v22 = vadd.f32 1.1283791, %v3102_v54 }
 0x3e3   : > { %v3188_v13 = vadd.f32 0.014752088, %v3187_v2  ;;  %v3143_v47 = vadd.f32 1.1283791, %v3142_v7  ;;  %v3179_v26 = vadd.f32 0.05243302, %v3178_v11  ;;  %4733 = vrcp.f32 %v7247_v14 }
 0x3e4   : > { %v7229_v15 = vmin.f32 %v3252_v52, 16.0  ;;  %v3217_v21 = vadd.f32 0.0036580483, %v3216_v44  ;;  %v3396_v16 = vmul.f32 %v3380_v55, %v2708_v51  ;;  %v3124_v58 = vand.u32 2147483647, %v3114_v41 }
 0x3e5   : > { %v2694_v0 = vpop.f32.mrf.mxu3  ;;  %v4732_v63 = vpop.eup %4731  ;;  %v3226_v46 = vadd.f32 0.001143296, %v3225_v6  ;;  %v2709_v48 = vmul.f32 0.5, %v7117_v18  ;;  %v3126_v42 = vand.u32 2147483648, %v3114_v41  ;;  %v3189_v29 = vmul.f32 %v3188_v13, %v7183_v39 }
 0x3e6   : > { %v7232_v36 = vadd.f32 %v7206_v5, %v2694_v0  ;;  %v3254_v12 = vmul.f32 2.1237322e-06, %v7229_v15  ;;  %3466 = vmatmul.f32.gmra.mxu0 %v3396_v16  ;;  %v3116_v31 = vmul.f32 %v4732_v63, %v3114_v41  ;;  %v3218_v62 = vmul.f32 %v3217_v21, %v7203_v57 }
 0x3e7   : > { %vm3121_vm4 = vweird.f32 %v4732_v63  ;;  %v3104_v28 = vmul.f32 %v3103_v22, %v7124_v1  ;;  %v3144_v43 = vmul.f32 %v3143_v47, %v7146_v9  ;;  %v3180_v37 = vmul.f32 %v3179_v26, %v7183_v39 }
 0x3e8   : > { %v7237_v32 = vmul.f32 0.70710677, %v7232_v36  ;;  %v3255_v59 = vadd.f32 0.00028619796, %v3254_v12  ;;  %v3117_v20 = vsub.f32 1.0, %v3116_v31  ;;  %vm3120_vm5 = vweird.f32 %v3114_v41 }
 0x3e9   : > { %v3219_v0 = vadd.f32 0.05243302, %v3218_v62  ;;  %v3190_v18 = vadd.f32 0.112945676, %v3189_v29  ;;  %v3227_v35 = vmul.f32 %v3226_v46, %v7203_v57  ;;  %v4734_v19 = vpop.eup %4733  ;;  %vm3122_vm6 = vmor %vm3120_vm5, %vm3121_vm4  ;;  %vm3125_vm7 = vcmp.eq.f32.partialorder %v3124_v58, 8.507059e+37 }
 0x3ea   : > { %v3292_v4 = vmul.f32 %v7237_v32, %v7237_v32  ;;  %v3256_v60 = vmul.f32 %v3255_v59, %v7229_v15  ;;  %v3118_v3 = vmul.f32 %v4732_v63, %v3117_v20  ;;  %v3127_v12 = vor.u32 1.1754944e-38, %v3126_v42 }
 0x3eb   : > { %v3265_v61 = vmul.f32 3.8918573e-05, %v7229_v15  ;;  %v3156_v44 = vmul.f32 %v4734_v19, %v7247_v14  ;;  %vm3160_vm8 = vweird.f32 %v7247_v14  ;;  %v3164_v41 = vand.u32 2147483647, %v7247_v14 }
 0x3ec   : > { %v7254_v50 = vmin.f32 %v3292_v4, 16.0  ;;  %v3257_v52 = vadd.f32 0.0036580483, %v3256_v60  ;;  %v3119_v24 = vadd.f32 %v4732_v63, %v3118_v3  ;;  %v3191_v34 = vmul.f32 %v3190_v18, %v7183_v39 }
 0x3ed   : > { %v2697_v45 = vpop.f32.mrf.mxu3  ;;  %v3157_v59 = vsub.f32 1.0, %v3156_v44  ;;  %v3228_v54 = vadd.f32 0.014752088, %v3227_v35  ;;  %v3166_v27 = vand.u32 2147483648, %v7247_v14  ;;  %v3266_v11 = vadd.f32 0.001143296, %v3265_v61 }
 0x3ee   : > { %v7252_v25 = vadd.f32 %v7206_v5, %v2697_v45  ;;  %v3294_v49 = vmul.f32 2.1237322e-06, %v7254_v50  ;;  %v3258_v1 = vmul.f32 %v3257_v52, %v7229_v15  ;;  %v3123_v33 = vsel %vm3122_vm6, %v4732_v63, %v3119_v24 }
 0x3ef   : > { %v3128_v8 = vsel %vm3125_vm7, %v3127_v12, %v3123_v33  ;;  %v3305_v4 = vmul.f32 3.8918573e-05, %v7254_v50  ;;  %v3192_v7 = vadd.f32 0.4994258, %v3191_v34  ;;  %v3158_v2 = vmul.f32 %v4734_v19, %v3157_v59 }
 0x3f0   : > { %v7260_v5 = vmul.f32 0.70710677, %v7252_v25  ;;  %v3295_v9 = vadd.f32 0.00028619796, %v3294_v49  ;;  %v3129_v51 = vmul.f32 %v3128_v8, %v3104_v28  ;;  %vm3161_vm9 = vweird.f32 %v4734_v19 }
 0x3f1   : > { %v3229_v16 = vmul.f32 %v3228_v54, %v7203_v57  ;;  %vm7282_vm10 = vcmp.eq.f32.partialorder %v3164_v41, 8.507059e+37  ;;  %v3193_v63 = vmul.f32 %v3192_v7, %v7183_v39  ;;  %v3267_v60 = vmul.f32 %v3266_v11, %v7229_v15  ;;  %vm3162_vm11 = vmor %vm3160_vm8, %vm3161_vm9 }
 0x3f2   : > { %v3332_v10 = vmul.f32 %v7260_v5, %v7260_v5  ;;  %v4476_v21 = vclamps-f32 %v3129_v51, 1.0  ;;  %v3296_v45 = vmul.f32 %v3295_v9, %v7254_v50  ;;  %v3159_v31 = vadd.f32 %v4734_v19, %v3158_v2 }
 0x3f3   : > { %v3230_v13 = vadd.f32 0.112945676, %v3229_v16  ;;  %v3306_v47 = vadd.f32 0.001143296, %v3305_v4  ;;  %v3167_v62 = vor.u32 1.1754944e-38, %v3166_v27  ;;  %v7291_v20 = vadd.f32 1.0, %v3193_v63 }
 0x3f4   : > { %v7277_v55 = vmin.f32 %v3332_v10, 16.0  ;;  %v3381_v22 = vadd.f32 1.0, %v4476_v21  ;;  %v3268_v58 = vadd.f32 0.014752088, %v3267_v60  ;;  %v3163_v52 = vsel %vm3162_vm11, %v4734_v19, %v3159_v31 }
 0x3f5   : > { %v3231_v42 = vmul.f32 %v3230_v13, %v7203_v57  ;;  %v3307_v49 = vmul.f32 %v3306_v47, %v7254_v50  ;;  %v3297_v3 = vadd.f32 0.0036580483, %v3296_v45  ;;  %v3168_v29 = vsel %vm7282_vm10, %v3167_v62, %v3163_v52 }
 0x3f6   : > { %v3334_v26 = vmul.f32 2.1237322e-06, %v7277_v55  ;;  %v3397_v46 = vmul.f32 %v3381_v22, %v2709_v48  ;;  %4735 = vrcp.f32 %v7291_v20  ;;  %v3181_v28 = vadd.f32 0.18741608, %v3180_v37 }
 0x3f7   : > { %v3169_v14 = vmul.f32 %v3168_v29, %v3144_v43  ;;  %v3232_v18 = vadd.f32 0.4994258, %v3231_v42  ;;  %v3269_v35 = vmul.f32 %v3268_v58, %v7229_v15  ;;  %v3220_v48 = vmul.f32 %v3219_v0, %v7203_v57 }
 0x3f8   : > { %3469 = vmatmul.f32.gmra.mxu0 %v3397_v46  ;;  %v3335_v24 = vadd.f32 0.00028619796, %v3334_v26  ;;  %v3259_v19 = vadd.f32 0.05243302, %v3258_v1  ;;  %v3308_v12 = vadd.f32 0.014752088, %v3307_v49  ;;  %v3298_v61 = vmul.f32 %v3297_v3, %v7254_v50 }
 0x3f9   : > { %v4477_v10 = vclamps-f32 %v3169_v14, 1.0  ;;  %v3233_v9 = vmul.f32 %v3232_v18, %v7203_v57  ;;  %v3270_v33 = vadd.f32 0.112945676, %v3269_v35  ;;  %v3345_v44 = vmul.f32 3.8918573e-05, %v7277_v55 }
 0x3fa   : > { %v2710_v37 = vmul.f32 0.5, %v7139_v38  ;;  %v3182_v43 = vmul.f32 %v3181_v28, %v7183_v39  ;;  %v3309_v41 = vmul.f32 %v3308_v12, %v7254_v50  ;;  %v3336_v0 = vmul.f32 %v3335_v24, %v7277_v55  ;;  %v4211_v12 = vld [vmem:[#allocation5 + $0x2f8] sm:$0xff] }
 0x3fb   : > { %v3382_v8 = vadd.f32 1.0, %v4477_v10  ;;  %v7307_v1 = vadd.f32 1.0, %v3233_v9  ;;  %v3271_v51 = vmul.f32 %v3270_v33, %v7229_v15  ;;  %v3346_v59 = vadd.f32 0.001143296, %v3345_v44  ;;  %4217 = vmatpush.msrb.mxu1 %v4211_v12 }
 0x3fc   : > { %v4736_v34 = vpop.eup %4735  ;;  %v3310_v27 = vadd.f32 0.112945676, %v3309_v41  ;;  %v3221_v7 = vadd.f32 0.18741608, %v3220_v48  ;;  %v3260_v38 = vmul.f32 %v3259_v19, %v7229_v15  ;;  %v3299_v11 = vadd.f32 0.05243302, %v3298_v61 }
 0x3fd   : > { %v3398_v54 = vmul.f32 %v3382_v8, %v2710_v37  ;;  %v3196_v4 = vmul.f32 %v4736_v34, %v7291_v20  ;;  %4737 = vrcp.f32 %v7307_v1  ;;  %v3183_v39 = vadd.f32 1.1283791, %v3182_v43  ;;  %v4210_v61 = vld [vmem:[#allocation5 + $0x2f0] sm:$0xff] }
 0x3fe   : > { %v3272_v2 = vadd.f32 0.4994258, %v3271_v51  ;;  %v3311_v16 = vmul.f32 %v3310_v27, %v7254_v50  ;;  %v3337_v45 = vadd.f32 0.0036580483, %v3336_v0  ;;  %v3204_v6 = vand.u32 2147483647, %v7291_v20  ;;  %4218 = vmatpush.msrb.mxu1 %v4210_v61 }
 0x3ff   : > { %v3197_v21 = vsub.f32 1.0, %v3196_v4  ;;  %v3206_v63 = vand.u32 2147483648, %v7291_v20  ;;  %v3347_v60 = vmul.f32 %v3346_v59, %v7277_v55  ;;  %vm3201_vm12 = vweird.f32 %v4736_v34 }
 0x400   : > { %3472 = vmatmul.f32.gmra.mxu0 %v3398_v54  ;;  %v3273_v31 = vmul.f32 %v3272_v2, %v7229_v15  ;;  %v3312_v13 = vadd.f32 0.4994258, %v3311_v16  ;;  %v3222_v47 = vmul.f32 %v3221_v7, %v7203_v57  ;;  %v3261_v26 = vadd.f32 0.18741608, %v3260_v38 }
 0x401   : > { %v3198_v22 = vmul.f32 %v4736_v34, %v3197_v21  ;;  %v3300_v62 = vmul.f32 %v3299_v11, %v7254_v50  ;;  %v3348_v58 = vadd.f32 0.014752088, %v3347_v60  ;;  %vm3200_vm13 = vweird.f32 %v7291_v20  ;;  %v4209_v60 = vld [vmem:[#allocation5 + $0x2e8] sm:$0xff] }
 0x402   : > { %v7321_v52 = vadd.f32 1.0, %v3273_v31  ;;  %v3313_v42 = vmul.f32 %v3312_v13, %v7254_v50  ;;  %v3184_v3 = vmul.f32 %v3183_v39, %v7170_v40  ;;  %v3338_v29 = vmul.f32 %v3337_v45, %v7277_v55  ;;  %vm3202_vm14 = vmor %vm3200_vm13, %vm3201_vm12  ;;  %v3443_v31 = vpop.f32.mrf.mxu0  ;;  %4219 = vmatpush.msrb.mxu1 %v4209_v60 }
 0x403   : > { %v3199_v46 = vadd.f32 %v4736_v34, %v3198_v22  ;;  %v4738_v49 = vpop.eup %4737  ;;  %v3207_v28 = vor.u32 1.1754944e-38, %v3206_v63  ;;  %v3349_v57 = vmul.f32 %v3348_v58, %v7277_v55  ;;  %vm3205_vm15 = vcmp.eq.f32.partialorder %v3204_v6, 8.507059e+37  ;;  %v7347_v22 = vld [vmem:[#allocation7 + $0x4] ss:$0 sm:$0xff] }
 0x404   : > { %v3236_v24 = vmul.f32 %v4738_v49, %v7307_v1  ;;  %4739 = vrcp.f32 %v7321_v52  ;;  %v3223_v20 = vadd.f32 1.1283791, %v3222_v47  ;;  %v3262_v18 = vmul.f32 %v3261_v26, %v7229_v15 }
 0x405   : > { %v3203_v14 = vsel %vm3202_vm14, %v4736_v34, %v3199_v46  ;;  %v3301_v35 = vadd.f32 0.18741608, %v3300_v62  ;;  %v7330_v40 = vadd.f32 1.0, %v3313_v42  ;;  %v3350_v9 = vadd.f32 0.112945676, %v3349_v57 }
 0x406   : > { %v3208_v48 = vsel %vm3205_vm15, %v3207_v28, %v3203_v14  ;;  %v3237_v10 = vsub.f32 1.0, %v3236_v24  ;;  %v3339_v33 = vadd.f32 0.05243302, %v3338_v29  ;;  %v3244_v44 = vand.u32 2147483647, %v7307_v1 }
 0x407   : > { %v3209_v19 = vmul.f32 %v3208_v48, %v3184_v3  ;;  %v3246_v37 = vand.u32 2147483648, %v7307_v1  ;;  %vm3241_vm0 = vweird.f32 %v4738_v49  ;;  %4741 = vrcp.f32 %v7330_v40 }
 0x408   : > { %v3238_v8 = vmul.f32 %v4738_v49, %v3237_v10  ;;  %v2711_v15 = vmul.f32 0.5, %v7164_v17  ;;  %v3224_v41 = vmul.f32 %v3223_v20, %v7196_v56  ;;  %v3351_v34 = vmul.f32 %v3350_v9, %v7277_v55 }
 0x409   : > { %v4478_v43 = vclamps-f32 %v3209_v19, 1.0  ;;  %v3263_v51 = vadd.f32 1.1283791, %v3262_v18  ;;  %vm3240_vm1 = vweird.f32 %v7307_v1  ;;  %v3302_v4 = vmul.f32 %v3301_v35, %v7254_v50 }
 0x40a   : > { %v4740_v0 = vpop.eup %4739  ;;  %v3239_v54 = vadd.f32 %v4738_v49, %v3238_v8  ;;  %v3340_v27 = vmul.f32 %v3339_v33, %v7277_v55  ;;  %vm3242_vm2 = vmor %vm3240_vm1, %vm3241_vm0  ;;  %v3247_v7 = vor.u32 1.1754944e-38, %v3246_v37  ;;  %vm3245_vm3 = vcmp.eq.f32.partialorder %v3244_v44, 8.507059e+37 }
 0x40b   : > { %v3383_v59 = vadd.f32 1.0, %v4478_v43  ;;  %v3276_v38 = vmul.f32 %v4740_v0, %v7321_v52  ;;  %v3352_v56 = vadd.f32 0.4994258, %v3351_v34  ;;  %v2712_v39 = vmul.f32 0.5, %v7186_v23 }
 0x40c   : > { %v3243_v11 = vsel %vm3242_vm2, %v4738_v49, %v3239_v54  ;;  %v3284_v16 = vand.u32 2147483647, %v7321_v52  ;;  %v3264_v1 = vmul.f32 %v3263_v51, %v7219_v30  ;;  %v3286_v6 = vand.u32 2147483648, %v7321_v52 }
 0x40d   : > { %v3399_v17 = vmul.f32 %v3383_v59, %v2711_v15  ;;  %v3248_v21 = vsel %vm3245_vm3, %v3247_v7, %v3243_v11  ;;  %v3277_v2 = vsub.f32 1.0, %v3276_v38  ;;  %v4742_v45 = vpop.eup %4741  ;;  %v3353_v63 = vmul.f32 %v3352_v56, %v7277_v55 }
 0x40e   : > { %v3249_v50 = vmul.f32 %v3248_v21, %v3224_v41  ;;  %v3303_v13 = vadd.f32 1.1283791, %v3302_v4  ;;  %vm3281_vm4 = vweird.f32 %v4740_v0  ;;  %v3316_v23 = vmul.f32 %v4742_v45, %v7330_v40  ;;  %v4208_v21 = vld [vmem:[#allocation5 + $0x2e0] sm:$0xff] }
 0x40f   : > { %3475 = vmatmul.f32.gmra.mxu0 %v3399_v17  ;;  %v3278_v47 = vmul.f32 %v4740_v0, %v3277_v2  ;;  %v3341_v26 = vadd.f32 0.18741608, %v3340_v27  ;;  %v7350_v58 = vadd.f32 1.0, %v3353_v63  ;;  %v7353_v30 = vadd.f32 %v7347_v22, %v3443_v31  ;;  %v4207_v2 = vld [vmem:[#allocation5 + $0x2d8] sm:$0xff]  ;;  %4220 = vmatpush.msrb.mxu1 %v4208_v21 }
 0x410   : > { %v4479_v62 = vclamps-f32 %v3249_v50, 1.0  ;;  %vm3280_vm5 = vweird.f32 %v7321_v52  ;;  %vm3285_vm6 = vcmp.eq.f32.partialorder %v3284_v16, 8.507059e+37  ;;  %v3317_v42 = vsub.f32 1.0, %v3316_v23  ;;  %v4199_v21 = vld [vmem:[#allocation5 + $0x298] sm:$0xff] }
 0x411   : > { %v3279_v46 = vadd.f32 %v4740_v0, %v3278_v47  ;;  %vm3282_vm7 = vmor %vm3280_vm5, %vm3281_vm4  ;;  %v3287_v3 = vor.u32 1.1754944e-38, %v3286_v6  ;;  %v3326_v29 = vand.u32 2147483648, %v7330_v40  ;;  %4743 = vrcp.f32 %v7350_v58  ;;  %4221 = vmatpush.msrb.mxu1 %v4207_v2 }
 0x412   : > { %v3384_v49 = vadd.f32 1.0, %v4479_v62  ;;  %v3318_v57 = vmul.f32 %v4742_v45, %v3317_v42  ;;  %vm3321_vm8 = vweird.f32 %v4742_v45  ;;  %v3324_v14 = vand.u32 2147483647, %v7330_v40  ;;  %v3446_v27 = vpop.f32.mrf.mxu0 }
 0x413   : > { %v3283_v28 = vsel %vm3282_vm7, %v4740_v0, %v3279_v46  ;;  %v7360_v18 = vmul.f32 0.70710677, %v7353_v30  ;;  %vm3320_vm9 = vweird.f32 %v7330_v40  ;;  %v3304_v48 = vmul.f32 %v3303_v13, %v7237_v32  ;;  %v4206_v13 = vld [vmem:[#allocation5 + $0x2d0] sm:$0xff] }
 0x414   : > { %v3400_v24 = vmul.f32 %v3384_v49, %v2712_v39  ;;  %v3288_v20 = vsel %vm3285_vm6, %v3287_v3, %v3283_v28  ;;  %v3319_v35 = vadd.f32 %v4742_v45, %v3318_v57  ;;  %vm3322_vm10 = vmor %vm3320_vm9, %vm3321_vm8  ;;  %v3327_v19 = vor.u32 1.1754944e-38, %v3326_v29  ;;  %4222 = vmatpush.msrb.mxu1 %v4206_v13  ;;  %v4204_v28 = vld [vmem:[#allocation5 + $0x2c0] sm:$0xff] }
 0x415   : > { %v3289_v52 = vmul.f32 %v3288_v20, %v3264_v1  ;;  %v3523_v10 = vmul.f32 %v7360_v18, %v7360_v18  ;;  %v3342_v12 = vmul.f32 %v3341_v26, %v7277_v55  ;;  %vm3325_vm11 = vcmp.eq.f32.partialorder %v3324_v14, 8.507059e+37 }
 0x416   : > { %v3323_v9 = vsel %vm3322_vm10, %v4742_v45, %v3319_v35  ;;  %v2713_v43 = vmul.f32 0.5, %v7209_v53  ;;  %v3366_v59 = vand.u32 2147483648, %v7350_v58  ;;  %v3364_v53 = vand.u32 2147483647, %v7350_v58  ;;  %v4203_v35 = vld [vmem:[#allocation5 + $0x2b8] sm:$0xff] }
 0x417   : > { %3478 = vmatmul.f32.gmra.mxu0 %v3400_v24  ;;  %v4480_v61 = vclamps-f32 %v3289_v52, 1.0  ;;  %v4744_v33 = vpop.eup %4743  ;;  %v3328_v44 = vsel %vm3325_vm11, %v3327_v19, %v3323_v9  ;;  %v7367_v37 = vmin.f32 %v3523_v10, 16.0  ;;  %v3343_v34 = vadd.f32 1.1283791, %v3342_v12 }
 0x418   : > { %v3329_v8 = vmul.f32 %v3328_v44, %v3304_v48  ;;  %v3356_v32 = vmul.f32 %v4744_v33, %v7350_v58  ;;  %vm3361_vm12 = vweird.f32 %v4744_v33  ;;  %v7376_v38 = vadd.f32 %v7347_v22, %v3446_v27 }
 0x419   : > { %v3385_v40 = vadd.f32 1.0, %v4480_v61  ;;  %v3525_v15 = vmul.f32 2.1237322e-06, %v7367_v37  ;;  %v3536_v41 = vmul.f32 3.8918573e-05, %v7367_v37  ;;  %vm3360_vm13 = vweird.f32 %v7350_v58  ;;  %v4205_v58 = vld [vmem:[#allocation5 + $0x2c8] sm:$0xff] }
 0x41a   : > { %v4481_v55 = vclamps-f32 %v3329_v8, 1.0  ;;  %v3357_v51 = vsub.f32 1.0, %v3356_v32  ;;  %v7382_v16 = vmul.f32 0.70710677, %v7376_v38  ;;  %v2714_v45 = vmul.f32 0.5, %v7232_v36  ;;  %vm3362_vm14 = vmor %vm3360_vm13, %vm3361_vm12  ;;  %4223 = vmatpush.msrb.mxu1 %v4205_v58 }
 0x41b   : > { %v3401_v0 = vmul.f32 %v3385_v40, %v2713_v43  ;;  %v3526_v54 = vadd.f32 0.00028619796, %v3525_v15  ;;  %v3537_v4 = vadd.f32 0.001143296, %v3536_v41  ;;  %v3367_v1 = vor.u32 1.1754944e-38, %v3366_v59  ;;  %v4202_v43 = vld [vmem:[#allocation5 + $0x2b0] sm:$0xff] }
 0x41c   : > { %v3358_v7 = vmul.f32 %v4744_v33, %v3357_v51  ;;  %v3386_v17 = vadd.f32 1.0, %v4481_v55  ;;  %v3344_v63 = vmul.f32 %v3343_v34, %v7260_v5  ;;  %vm3365_vm15 = vcmp.eq.f32.partialorder %v3364_v53, 8.507059e+37  ;;  %v3449_v5 = vpop.f32.mrf.mxu0  ;;  %4224 = vmatpush.msrb.mxu1 %v4204_v28 }
 0x41d   : > { %v3527_v11 = vmul.f32 %v3526_v54, %v7367_v37  ;;  %v3538_v56 = vmul.f32 %v3537_v4, %v7367_v37  ;;  %v3563_v31 = vmul.f32 %v7382_v16, %v7382_v16  ;;  %v7394_v29 = vadd.f32 %v7347_v22, %v3449_v5 }
 0x41e   : > { %v3359_v39 = vadd.f32 %v4744_v33, %v3358_v7  ;;  %v3402_v47 = vmul.f32 %v3386_v17, %v2714_v45  ;;  %v2715_v48 = vmul.f32 0.5, %v7252_v25  ;;  %4225 = vmatpush.msrb.mxu1 %v4203_v35  ;;  %v4201_v25 = vld [vmem:[#allocation5 + $0x2a8] sm:$0xff] }
 0x41f   : > { %3481 = vmatmul.f32.gmra.mxu0 %v3401_v0  ;;  %v3528_v50 = vadd.f32 0.0036580483, %v3527_v11  ;;  %v3539_v6 = vadd.f32 0.014752088, %v3538_v56  ;;  %v7389_v36 = vmin.f32 %v3563_v31, 16.0 }
 0x420   : > { %v3363_v60 = vsel %vm3362_vm14, %v4744_v33, %v3359_v39  ;;  %v7399_v52 = vmul.f32 0.70710677, %v7394_v29  ;;  %4226 = vmatpush.msrb.mxu1 %v4202_v43  ;;  %v4200_v39 = vld [vmem:[#allocation5 + $0x2a0] sm:$0xff] }
 0x421   : > { %v3368_v23 = vsel %vm3365_vm15, %v3367_v1, %v3363_v60  ;;  %v3540_v26 = vmul.f32 %v3539_v6, %v7367_v37  ;;  %v3529_v46 = vmul.f32 %v3528_v50, %v7367_v37  ;;  %v3565_v3 = vmul.f32 2.1237322e-06, %v7389_v36 }
 0x422   : > { %v3369_v62 = vmul.f32 %v3368_v23, %v3344_v63  ;;  %v3576_v57 = vmul.f32 3.8918573e-05, %v7389_v36  ;;  %v3603_v9 = vmul.f32 %v7399_v52, %v7399_v52  ;;  %4227 = vmatpush.msrb.mxu1 %v4201_v25 }
 0x423   : > { %v3541_v42 = vadd.f32 0.112945676, %v3540_v26  ;;  %v3566_v20 = vadd.f32 0.00028619796, %v3565_v3  ;;  %v3530_v12 = vadd.f32 0.05243302, %v3529_v46 }
 0x424   : > { %v4482_v49 = vclamps-f32 %v3369_v62, 1.0  ;;  %v3577_v10 = vadd.f32 0.001143296, %v3576_v57  ;;  %v7407_v32 = vmin.f32 %v3603_v9, 16.0  ;;  %4228 = vmatpush.msrb.mxu1 %v4200_v39 }
 0x425   : > { %v3542_v14 = vmul.f32 %v3541_v42, %v7367_v37  ;;  %v3567_v61 = vmul.f32 %v3566_v20, %v7389_v36  ;;  %v3531_v0 = vmul.f32 %v3530_v12, %v7367_v37 }
 0x426   : > { %v3387_v24 = vadd.f32 1.0, %v4482_v49  ;;  %v3578_v40 = vmul.f32 %v3577_v10, %v7389_v36  ;;  %v3605_v55 = vmul.f32 2.1237322e-06, %v7407_v32  ;;  %v3616_v59 = vmul.f32 3.8918573e-05, %v7407_v32  ;;  %4229 = vmatpush.msrb.mxu1 %v4199_v21 }
 0x427   : > { %3484 = vmatmul.f32.gmra.mxu0 %v3402_v47  ;;  %v3543_v19 = vadd.f32 0.4994258, %v3542_v14  ;;  %v3568_v8 = vadd.f32 0.0036580483, %v3567_v61  ;;  %v3532_v17 = vadd.f32 0.18741608, %v3531_v0 }
 0x428   : > { %v3403_v33 = vmul.f32 %v3387_v24, %v2715_v48  ;;  %v3579_v34 = vadd.f32 0.014752088, %v3578_v40  ;;  %v3606_v4 = vadd.f32 0.00028619796, %v3605_v55  ;;  %v3617_v53 = vadd.f32 0.001143296, %v3616_v59 }
 0x429   : > { %v3544_v44 = vmul.f32 %v3543_v19, %v7367_v37  ;;  %v3452_v41 = vpop.f32.mrf.mxu0  ;;  %v3569_v54 = vmul.f32 %v3568_v8, %v7389_v36  ;;  %v3533_v47 = vmul.f32 %v3532_v17, %v7367_v37  ;;  %v4198_v48 = vld [vmem:[#allocation5 + $0x290] sm:$0xff]  ;;  %v4197_v19 = vld [vmem:[#allocation5 + $0x288] sm:$0xff] }
 0x42a   : > { %v7412_v51 = vadd.f32 %v7347_v22, %v3452_v41  ;;  %v3580_v7 = vmul.f32 %v3579_v34, %v7389_v36  ;;  %v3607_v11 = vmul.f32 %v3606_v4, %v7407_v32  ;;  %v3618_v45 = vmul.f32 %v3617_v53, %v7407_v32  ;;  %4230 = vmatpush.msrb.mxu1 %v4198_v48 }
 0x42b   : > { %v3545_v15 = vadd.f32 1.0, %v3544_v44  ;;  %v3570_v1 = vadd.f32 0.05243302, %v3569_v54  ;;  %v3534_v20 = vadd.f32 1.1283791, %v3533_v47 }
 0x42c   : > { %v7417_v27 = vmul.f32 0.70710677, %v7412_v51  ;;  %v3581_v2 = vadd.f32 0.112945676, %v3580_v7  ;;  %v3608_v50 = vadd.f32 0.0036580483, %v3607_v11  ;;  %4231 = vmatpush.msrb.mxu1 %v4197_v19 }
 0x42d   : > { %4745 = vrcp.f32 %v3545_v15  ;;  %v3619_v13 = vadd.f32 0.014752088, %v3618_v45  ;;  %v3555_v49 = vand.u32 2147483647, %v3545_v15  ;;  %v3557_v3 = vand.u32 2147483648, %v3545_v15 }
 0x42e   : > { %v3643_v56 = vmul.f32 %v7417_v27, %v7417_v27  ;;  %v3582_v31 = vmul.f32 %v3581_v2, %v7389_v36  ;;  %v3609_v26 = vmul.f32 %v3608_v50, %v7407_v32  ;;  %v3571_v28 = vmul.f32 %v3570_v1, %v7389_v36 }
 0x42f   : > { %3487 = vmatmul.f32.gmra.mxu0 %v3403_v33  ;;  %v3620_v42 = vmul.f32 %v3619_v13, %v7407_v32  ;;  %vm3551_vm1 = vweird.f32 %v3545_v15  ;;  %vm3556_vm2 = vcmp.eq.f32.partialorder %v3555_v49, 8.507059e+37  ;;  %v3558_v44 = vor.u32 1.1754944e-38, %v3557_v3 }
 0x430   : > { %v7424_v63 = vmin.f32 %v3643_v56, 16.0  ;;  %v3583_v46 = vadd.f32 0.4994258, %v3582_v31  ;;  %v3610_v57 = vadd.f32 0.05243302, %v3609_v26  ;;  %v3535_v59 = vmul.f32 %v3534_v20, %v7360_v18 }
 0x431   : > { %v3621_v10 = vadd.f32 0.112945676, %v3620_v42  ;;  %v3572_v43 = vadd.f32 0.18741608, %v3571_v28  ;;  %v3491_v1 = vmul.f32 0.5, %v7353_v30 }
 0x432   : > { %v3645_v62 = vmul.f32 2.1237322e-06, %v7424_v63  ;;  %v3584_v24 = vmul.f32 %v3583_v46, %v7389_v36  ;;  %v3611_v40 = vmul.f32 %v3610_v57, %v7407_v32 }
 0x433   : > { %v4746_v6 = vpop.eup %4745  ;;  %v3622_v55 = vmul.f32 %v3621_v10, %v7407_v32  ;;  %v3573_v7 = vmul.f32 %v3572_v43, %v7389_v36 }
 0x434   : > { %v3547_v23 = vmul.f32 %v4746_v6, %v3545_v15  ;;  %v3646_v14 = vadd.f32 0.00028619796, %v3645_v62  ;;  %vm3552_vm0 = vweird.f32 %v4746_v6  ;;  %v7442_v9 = vadd.f32 1.0, %v3584_v24  ;;  %v4196_v24 = vld [vmem:[#allocation5 + $0x280] sm:$0xff] }
 0x435   : > { %vm3553_vm3 = vmor %vm3551_vm1, %vm3552_vm0  ;;  %v3656_v15 = vmul.f32 3.8918573e-05, %v7424_v63  ;;  %v3612_v11 = vadd.f32 0.18741608, %v3611_v40  ;;  %v3623_v21 = vadd.f32 0.4994258, %v3622_v55  ;;  %4232 = vmatpush.msrb.mxu1 %v4196_v24 }
 0x436   : > { %v3548_v5 = vsub.f32 1.0, %v3547_v23  ;;  %v3647_v12 = vmul.f32 %v3646_v14, %v7424_v63  ;;  %4747 = vrcp.f32 %v7442_v9  ;;  %v3595_v23 = vand.u32 2147483647, %v7442_v9 }
 0x437   : > { %v3455_v60 = vpop.f32.mrf.mxu0  ;;  %v3657_v2 = vadd.f32 0.001143296, %v3656_v15  ;;  %v3624_v31 = vmul.f32 %v3623_v21, %v7407_v32  ;;  %v3613_v13 = vmul.f32 %v3612_v11, %v7407_v32  ;;  %v3597_v46 = vand.u32 2147483648, %v7442_v9 }
 0x438   : > { %v7431_v58 = vadd.f32 %v7347_v22, %v3455_v60  ;;  %v3549_v35 = vmul.f32 %v4746_v6, %v3548_v5  ;;  %v3648_v34 = vadd.f32 0.0036580483, %v3647_v12  ;;  %vm3591_vm5 = vweird.f32 %v7442_v9 }
 0x439   : > { %v3658_v26 = vmul.f32 %v3657_v2, %v7424_v63  ;;  %v7471_v42 = vadd.f32 1.0, %v3624_v31  ;;  %vm3596_vm7 = vcmp.eq.f32.partialorder %v3595_v23, 8.507059e+37 }
 0x43a   : > { %v7436_v37 = vmul.f32 0.70710677, %v7431_v58  ;;  %v3550_v33 = vadd.f32 %v4746_v6, %v3549_v35  ;;  %v3649_v39 = vmul.f32 %v3648_v34, %v7424_v63  ;;  %v3614_v35 = vadd.f32 1.1283791, %v3613_v13 }
 0x43b   : > { %v3659_v3 = vadd.f32 0.014752088, %v3658_v26  ;;  %4749 = vrcp.f32 %v7471_v42  ;;  %v3492_v34 = vmul.f32 0.5, %v7376_v38  ;;  %vm3631_vm9 = vweird.f32 %v7471_v42 }
 0x43c   : > { %v3683_v61 = vmul.f32 %v7436_v37, %v7436_v37  ;;  %v3554_v41 = vsel %vm3553_vm3, %v4746_v6, %v3550_v33  ;;  %v4748_v45 = vpop.eup %4747  ;;  %v3574_v6 = vadd.f32 1.1283791, %v3573_v7  ;;  %v3650_v30 = vadd.f32 0.05243302, %v3649_v39 }
 0x43d   : > { %v3559_v54 = vsel %vm3556_vm2, %v3558_v44, %v3554_v41  ;;  %v3587_v60 = vmul.f32 %v4748_v45, %v7442_v9  ;;  %vm3592_vm4 = vweird.f32 %v4748_v45  ;;  %v3660_v19 = vmul.f32 %v3659_v3, %v7424_v63 }
 0x43e   : > { %v7445_v8 = vmin.f32 %v3683_v61, 16.0  ;;  %v3560_v17 = vmul.f32 %v3559_v54, %v3535_v59  ;;  %v3575_v32 = vmul.f32 %v3574_v6, %v7382_v16  ;;  %v3651_v10 = vmul.f32 %v3650_v30, %v7424_v63  ;;  %vm3593_vm6 = vmor %vm3591_vm5, %vm3592_vm4 }
 0x43f   : > { %v3588_v62 = vsub.f32 1.0, %v3587_v60  ;;  %v3598_v61 = vor.u32 1.1754944e-38, %v3597_v46  ;;  %v3661_v40 = vadd.f32 0.112945676, %v3660_v19  ;;  %v3635_v6 = vand.u32 2147483647, %v7471_v42 }
 0x440   : > { %v3685_v4 = vmul.f32 2.1237322e-06, %v7445_v8  ;;  %v3696_v50 = vmul.f32 3.8918573e-05, %v7445_v8  ;;  %v4483_v47 = vclamps-f32 %v3560_v17, 1.0 }
 0x441   : > { %v3589_v14 = vmul.f32 %v4748_v45, %v3588_v62  ;;  %v4750_v41 = vpop.eup %4749  ;;  %v3662_v59 = vmul.f32 %v3661_v40, %v7424_v63  ;;  %vm3636_vm11 = vcmp.eq.f32.partialorder %v3635_v6, 8.507059e+37 }
 0x442   : > { %v3686_v56 = vadd.f32 0.00028619796, %v3685_v4  ;;  %v4163_v49 = vadd.f32 1.0, %v4483_v47  ;;  %v3697_v28 = vadd.f32 0.001143296, %v3696_v50  ;;  %v3627_v11 = vmul.f32 %v4750_v41, %v7471_v42 }
 0x443   : > { %v3590_v48 = vadd.f32 %v4748_v45, %v3589_v14  ;;  %v3652_v4 = vadd.f32 0.18741608, %v3651_v10  ;;  %v3663_v2 = vadd.f32 0.4994258, %v3662_v59  ;;  %vm3632_vm8 = vweird.f32 %v4750_v41 }
 0x444   : > { %v3687_v36 = vmul.f32 %v3686_v56, %v7445_v8  ;;  %v4179_v20 = vmul.f32 %v4163_v49, %v3491_v1  ;;  %v3698_v33 = vmul.f32 %v3697_v28, %v7445_v8  ;;  %v3615_v56 = vmul.f32 %v3614_v35, %v7399_v52  ;;  %vm3633_vm10 = vmor %vm3631_vm9, %vm3632_vm8 }
 0x445   : > { %v3458_v25 = vpop.f32.mrf.mxu0  ;;  %v3594_v43 = vsel %vm3593_vm6, %v4748_v45, %v3590_v48  ;;  %v3628_v45 = vsub.f32 1.0, %v3627_v11  ;;  %v3637_v1 = vand.u32 2147483648, %v7471_v42  ;;  %v3653_v3 = vmul.f32 %v3652_v4, %v7424_v63 }
 0x446   : > { %v7450_v0 = vadd.f32 %v7347_v22, %v3458_v25  ;;  %v3688_v57 = vadd.f32 0.0036580483, %v3687_v36  ;;  %4233 = vmatmul.f32.vlgmr.msrb.gmra.mxu1 %v4179_v20  ;;  %v3599_v9 = vsel %vm3596_vm7, %v3598_v61, %v3594_v43  ;;  %v3699_v15 = vadd.f32 0.014752088, %v3698_v33 }
 0x447   : > { %v3600_v55 = vmul.f32 %v3599_v9, %v3575_v32  ;;  %v3664_v36 = vmul.f32 %v3663_v2, %v7424_v63  ;;  %v3629_v52 = vmul.f32 %v4750_v41, %v3628_v45  ;;  %v3654_v61 = vadd.f32 1.1283791, %v3653_v3 }
 0x448   : > { %v7457_v53 = vmul.f32 0.70710677, %v7450_v0  ;;  %v3689_v16 = vmul.f32 %v3688_v57, %v7445_v8  ;;  %v3638_v57 = vor.u32 1.1754944e-38, %v3637_v1  ;;  %v7533_v11 = vmul.f32 0.5, %v7412_v51 }
 0x449   : > { %v4484_v21 = vclamps-f32 %v3600_v55, 1.0  ;;  %v7504_v26 = vadd.f32 1.0, %v3664_v36  ;;  %v3630_v46 = vadd.f32 %v4750_v41, %v3629_v52 }
 0x44a   : > { %v3723_v18 = vmul.f32 %v7457_v53, %v7457_v53  ;;  %v3690_v39 = vadd.f32 0.05243302, %v3689_v16 }
 0x44b   : > { %v4164_v50 = vadd.f32 1.0, %v4484_v21  ;;  %4751 = vrcp.f32 %v7504_v26  ;;  %v3634_v24 = vsel %vm3633_vm10, %v4750_v41, %v3630_v46  ;;  %vm3671_vm13 = vweird.f32 %v7504_v26 }
 0x44c   : > { %v7473_v5 = vmin.f32 %v3723_v18, 16.0  ;;  %v3700_v18 = vmul.f32 %v3699_v15, %v7445_v8  ;;  %v3691_v30 = vmul.f32 %v3690_v39, %v7445_v8  ;;  %v3639_v35 = vsel %vm3636_vm11, %v3638_v57, %v3634_v24 }
 0x44d   : > { %v4180_v23 = vmul.f32 %v4164_v50, %v3492_v34 }
 0x44e   : > { %v3725_v12 = vmul.f32 2.1237322e-06, %v7473_v5  ;;  %v3736_v54 = vmul.f32 3.8918573e-05, %v7473_v5  ;;  %v3701_v13 = vadd.f32 0.112945676, %v3700_v18 }
 0x44f   : > { %4236 = vmatmul.f32.gmra.mxu1 %v4180_v23  ;;  %v3692_v63 = vadd.f32 0.18741608, %v3691_v30 }
 0x450   : > { %v3726_v7 = vadd.f32 0.00028619796, %v3725_v12  ;;  %v3737_v60 = vadd.f32 0.001143296, %v3736_v54  ;;  %v3702_v49 = vmul.f32 %v3701_v13, %v7445_v8  ;;  %v3640_v12 = vmul.f32 %v3639_v35, %v3615_v56 }
 0x451   : > { %v4752_v15 = vpop.eup %4751  ;;  %v3693_v54 = vmul.f32 %v3692_v63, %v7445_v8  ;;  %v3655_v56 = vmul.f32 %v3654_v61, %v7417_v27 }
 0x452   : > { %v3461_v44 = vpop.f32.mrf.mxu0  ;;  %v3727_v47 = vmul.f32 %v3726_v7, %v7473_v5  ;;  %v3738_v14 = vmul.f32 %v3737_v60, %v7473_v5  ;;  %v3703_v48 = vadd.f32 0.4994258, %v3702_v49  ;;  %v4485_v9 = vclamps-f32 %v3640_v12, 1.0 }
 0x453   : > { %v7484_v25 = vadd.f32 %v7347_v22, %v3461_v44  ;;  %v3493_v44 = vmul.f32 0.5, %v7394_v29  ;;  %v3667_v29 = vmul.f32 %v4752_v15, %v7504_v26  ;;  %v3694_v50 = vadd.f32 1.1283791, %v3693_v54 }
 0x454   : > { %v3728_v20 = vadd.f32 0.0036580483, %v3727_v47  ;;  %v3704_v33 = vmul.f32 %v3703_v48, %v7445_v8  ;;  %v3739_v16 = vadd.f32 0.014752088, %v3738_v14  ;;  %v4165_v7 = vadd.f32 1.0, %v4485_v9 }
 0x455   : > { %v7490_v17 = vmul.f32 0.70710677, %v7484_v25  ;;  %v3677_v8 = vand.u32 2147483648, %v7504_v26  ;;  %vm3672_vm12 = vweird.f32 %v4752_v15  ;;  %v3675_v60 = vand.u32 2147483647, %v7504_v26 }
 0x456   : > { %v3729_v41 = vmul.f32 %v3728_v20, %v7473_v5  ;;  %v7525_v34 = vadd.f32 1.0, %v3704_v33  ;;  %v3740_v55 = vmul.f32 %v3739_v16, %v7473_v5  ;;  %v4181_v2 = vmul.f32 %v4165_v7, %v3493_v44  ;;  %vm3673_vm14 = vmor %vm3671_vm13, %vm3672_vm12 }
 0x457   : > { %v3763_v38 = vmul.f32 %v7490_v17, %v7490_v17  ;;  %v3678_v49 = vor.u32 1.1754944e-38, %v3677_v8  ;;  %vm3676_vm15 = vcmp.eq.f32.partialorder %v3675_v60, 8.507059e+37 }
 0x458   : > { %4753 = vrcp.f32 %v7525_v34  ;;  %v3730_v45 = vadd.f32 0.05243302, %v3729_v41  ;;  %v3741_v1 = vadd.f32 0.112945676, %v3740_v55  ;;  %4239 = vmatmul.f32.gmra.mxu1 %v4181_v2  ;;  %v3715_v12 = vand.u32 2147483647, %v7525_v34 }
 0x459   : > { %v7500_v31 = vmin.f32 %v3763_v38, 16.0  ;;  %v3668_v38 = vsub.f32 1.0, %v3667_v29  ;;  %v3717_v9 = vand.u32 2147483648, %v7525_v34  ;;  %vm3711_vm1 = vweird.f32 %v7525_v34 }
 0x45a   : > { %v3464_v28 = vpop.f32.mrf.mxu0  ;;  %v3742_v52 = vmul.f32 %v3741_v1, %v7473_v5  ;;  %v3731_v57 = vmul.f32 %v3730_v45, %v7473_v5  ;;  %vm3716_vm3 = vcmp.eq.f32.partialorder %v3715_v12, 8.507059e+37 }
 0x45b   : > { %v3765_v62 = vmul.f32 2.1237322e-06, %v7500_v31  ;;  %v7513_v32 = vadd.f32 %v7347_v22, %v3464_v28  ;;  %v3776_v19 = vmul.f32 3.8918573e-05, %v7500_v31  ;;  %v3669_v51 = vmul.f32 %v4752_v15, %v3668_v38 }
 0x45c   : > { %v3743_v3 = vadd.f32 0.4994258, %v3742_v52  ;;  %v3732_v54 = vadd.f32 0.18741608, %v3731_v57  ;;  %v3718_v45 = vor.u32 1.1754944e-38, %v3717_v9 }
 0x45d   : > { %v3766_v42 = vadd.f32 0.00028619796, %v3765_v62  ;;  %v7517_v10 = vmul.f32 0.70710677, %v7513_v32  ;;  %v3777_v59 = vadd.f32 0.001143296, %v3776_v19  ;;  %v3670_v62 = vadd.f32 %v4752_v15, %v3669_v51 }
 0x45e   : > { %v4754_v46 = vpop.eup %4753  ;;  %v3744_v48 = vmul.f32 %v3743_v3, %v7473_v5 }
 0x45f   : > { %v3767_v43 = vmul.f32 %v3766_v42, %v7500_v31  ;;  %v3803_v40 = vmul.f32 %v7517_v10, %v7517_v10  ;;  %v3778_v18 = vmul.f32 %v3777_v59, %v7500_v31  ;;  %v3674_v20 = vsel %vm3673_vm14, %v4752_v15, %v3670_v62 }
 0x460   : > { %v3707_v35 = vmul.f32 %v4754_v46, %v7525_v34  ;;  %v3679_v63 = vsel %vm3676_vm15, %v3678_v49, %v3674_v20  ;;  %v7560_v16 = vadd.f32 1.0, %v3744_v48  ;;  %vm3712_vm0 = vweird.f32 %v4754_v46 }
 0x461   : > { %v7529_v4 = vmin.f32 %v3803_v40, 16.0  ;;  %v3768_v39 = vadd.f32 0.0036580483, %v3767_v43  ;;  %v3779_v13 = vadd.f32 0.014752088, %v3778_v18  ;;  %v3680_v61 = vmul.f32 %v3679_v63, %v3655_v56  ;;  %vm3713_vm2 = vmor %vm3711_vm1, %vm3712_vm0 }
 0x462   : > { %v3708_v33 = vsub.f32 1.0, %v3707_v35  ;;  %4755 = vrcp.f32 %v7560_v16  ;;  %v3695_v59 = vmul.f32 %v3694_v50, %v7436_v37  ;;  %v3733_v50 = vmul.f32 %v3732_v54, %v7473_v5 }
 0x463   : > { %v3805_v21 = vmul.f32 2.1237322e-06, %v7529_v4  ;;  %v3816_v36 = vmul.f32 3.8918573e-05, %v7529_v4  ;;  %v3467_v27 = vpop.f32.mrf.mxu0  ;;  %v3769_v47 = vmul.f32 %v3768_v39, %v7500_v31  ;;  %v3780_v28 = vmul.f32 %v3779_v13, %v7500_v31 }
 0x464   : > { %v7546_v30 = vadd.f32 %v7347_v22, %v3467_v27  ;;  %v4486_v41 = vclamps-f32 %v3680_v61, 1.0  ;;  %v3709_v55 = vmul.f32 %v4754_v46, %v3708_v33  ;;  %v3495_v49 = vmul.f32 0.5, %v7431_v58 }
 0x465   : > { %v3806_v6 = vadd.f32 0.00028619796, %v3805_v21  ;;  %v3817_v24 = vadd.f32 0.001143296, %v3816_v36  ;;  %v3770_v26 = vadd.f32 0.05243302, %v3769_v47  ;;  %vm3751_vm5 = vweird.f32 %v7560_v16 }
 0x466   : > { %v7552_v42 = vmul.f32 0.70710677, %v7546_v30  ;;  %v3781_v44 = vadd.f32 0.112945676, %v3780_v28  ;;  %v4166_v29 = vadd.f32 1.0, %v4486_v41  ;;  %v3710_v56 = vadd.f32 %v4754_v46, %v3709_v55 }
 0x467   : > { %v3807_v23 = vmul.f32 %v3806_v6, %v7529_v4  ;;  %v3818_v15 = vmul.f32 %v3817_v24, %v7529_v4  ;;  %v3771_v2 = vmul.f32 %v3770_v26, %v7500_v31  ;;  %v3734_v3 = vadd.f32 1.1283791, %v3733_v50 }
 0x468   : > { %v3843_v19 = vmul.f32 %v7552_v42, %v7552_v42  ;;  %v3782_v39 = vmul.f32 %v3781_v44, %v7500_v31  ;;  %v4182_v8 = vmul.f32 %v4166_v29, %v7533_v11  ;;  %v3714_v1 = vsel %vm3713_vm2, %v4754_v46, %v3710_v56  ;;  %v4756_v36 = vpop.eup %4755 }
 0x469   : > { %v3808_v14 = vadd.f32 0.0036580483, %v3807_v23  ;;  %v3819_v21 = vadd.f32 0.014752088, %v3818_v15  ;;  %v3719_v6 = vsel %vm3716_vm3, %v3718_v45, %v3714_v1  ;;  %v3772_v13 = vadd.f32 0.18741608, %v3771_v2 }
 0x46a   : > { %v7563_v40 = vmin.f32 %v3843_v19, 16.0  ;;  %v3783_v37 = vadd.f32 0.4994258, %v3782_v39  ;;  %4242 = vmatmul.f32.gmra.mxu1 %v4182_v8  ;;  %v3720_v27 = vmul.f32 %v3719_v6, %v3695_v59  ;;  %v3747_v11 = vmul.f32 %v4756_v36, %v7560_v16 }
 0x46b   : > { %v3809_v43 = vmul.f32 %v3808_v14, %v7529_v4  ;;  %v3820_v18 = vmul.f32 %v3819_v21, %v7529_v4  ;;  %v3755_v20 = vand.u32 2147483647, %v7560_v16  ;;  %v3757_v35 = vand.u32 2147483648, %v7560_v16 }
 0x46c   : > { %v3845_v7 = vmul.f32 2.1237322e-06, %v7563_v40  ;;  %v3856_v51 = vmul.f32 3.8918573e-05, %v7563_v40  ;;  %v3784_v60 = vmul.f32 %v3783_v37, %v7500_v31  ;;  %v4487_v23 = vclamps-f32 %v3720_v27, 1.0 }
 0x46d   : > { %v3810_v38 = vadd.f32 0.05243302, %v3809_v43  ;;  %v3821_v52 = vadd.f32 0.112945676, %v3820_v18  ;;  %v3748_v57 = vsub.f32 1.0, %v3747_v11  ;;  %vm3752_vm4 = vweird.f32 %v4756_v36 }
 0x46e   : > { %v3846_v34 = vadd.f32 0.00028619796, %v3845_v7  ;;  %v7580_v62 = vadd.f32 1.0, %v3784_v60  ;;  %v3857_v46 = vadd.f32 0.001143296, %v3856_v51  ;;  %v4167_v24 = vadd.f32 1.0, %v4487_v23  ;;  %vm3753_vm6 = vmor %vm3751_vm5, %vm3752_vm4 }
 0x46f   : > { %v3811_v47 = vmul.f32 %v3810_v38, %v7529_v4  ;;  %v3822_v5 = vmul.f32 %v3821_v52, %v7529_v4  ;;  %v3749_v19 = vmul.f32 %v4756_v36, %v3748_v57  ;;  %v3773_v58 = vmul.f32 %v3772_v13, %v7500_v31 }
 0x470   : > { %v3847_v28 = vmul.f32 %v3846_v34, %v7563_v40  ;;  %4757 = vrcp.f32 %v7580_v62  ;;  %v4183_v63 = vmul.f32 %v4167_v24, %v3495_v49  ;;  %v3858_v61 = vmul.f32 %v3857_v46, %v7563_v40 }
 0x471   : > { %v3812_v48 = vadd.f32 0.18741608, %v3811_v47  ;;  %v3823_v12 = vadd.f32 0.4994258, %v3822_v5  ;;  %v3750_v43 = vadd.f32 %v4756_v36, %v3749_v19  ;;  %v3735_v9 = vmul.f32 %v3734_v3, %v7457_v53 }
 0x472   : > { %v3848_v33 = vadd.f32 0.0036580483, %v3847_v28  ;;  %4245 = vmatmul.f32.gmra.mxu1 %v4183_v63  ;;  %v3758_v15 = vor.u32 1.1754944e-38, %v3757_v35  ;;  %v3859_v55 = vadd.f32 0.014752088, %v3858_v61  ;;  %vm3756_vm7 = vcmp.eq.f32.partialorder %v3755_v20, 8.507059e+37 }
 0x473   : > { %v3824_v41 = vmul.f32 %v3823_v12, %v7529_v4  ;;  %v3813_v31 = vmul.f32 %v3812_v48, %v7529_v4  ;;  %v3754_v54 = vsel %vm3753_vm6, %v4756_v36, %v3750_v43  ;;  %v3774_v29 = vadd.f32 1.1283791, %v3773_v58 }
 0x474   : > { %v3759_v56 = vsel %vm3756_vm7, %v3758_v15, %v3754_v54  ;;  %v3860_v53 = vmul.f32 %v3859_v55, %v7563_v40  ;;  %v3849_v16 = vmul.f32 %v3848_v33, %v7563_v40  ;;  %v3496_v18 = vmul.f32 0.5, %v7450_v0 }
 0x475   : > { %v3470_v14 = vpop.f32.mrf.mxu0  ;;  %v7602_v39 = vadd.f32 1.0, %v3824_v41  ;;  %v3760_v2 = vmul.f32 %v3759_v56, %v3735_v9  ;;  %v3814_v45 = vadd.f32 1.1283791, %v3813_v31  ;;  %v3795_v34 = vand.u32 2147483647, %v7580_v62 }
 0x476   : > { %v7589_v26 = vadd.f32 %v7347_v22, %v3470_v14  ;;  %v4758_v7 = vpop.eup %4757  ;;  %v3861_v6 = vadd.f32 0.112945676, %v3860_v53  ;;  %v3775_v51 = vmul.f32 %v3774_v29, %v7490_v17  ;;  %v3850_v36 = vadd.f32 0.05243302, %v3849_v16 }
 0x477   : > { %v3787_v38 = vmul.f32 %v4758_v7, %v7580_v62  ;;  %4759 = vrcp.f32 %v7602_v39  ;;  %v4488_v37 = vclamps-f32 %v3760_v2, 1.0  ;;  %v3797_v60 = vand.u32 2147483648, %v7580_v62 }
 0x478   : > { %v7594_v44 = vmul.f32 0.70710677, %v7589_v26  ;;  %vm3792_vm8 = vweird.f32 %v4758_v7  ;;  %vm3791_vm9 = vweird.f32 %v7580_v62  ;;  %vm3796_vm10 = vcmp.eq.f32.partialorder %v3795_v34, 8.507059e+37 }
 0x479   : > { %v3788_v50 = vsub.f32 1.0, %v3787_v38  ;;  %v4168_v52 = vadd.f32 1.0, %v4488_v37  ;;  %v3851_v49 = vmul.f32 %v3850_v36, %v7563_v40  ;;  %vm3793_vm11 = vmor %vm3791_vm9, %vm3792_vm8  ;;  %v3798_v28 = vor.u32 1.1754944e-38, %v3797_v60 }
 0x47a   : > { %v3883_v59 = vmul.f32 %v7594_v44, %v7594_v44  ;;  %v3837_v24 = vand.u32 2147483648, %v7602_v39  ;;  %v3835_v15 = vand.u32 2147483647, %v7602_v39  ;;  %v3497_v41 = vmul.f32 0.5, %v7484_v25 }
 0x47b   : > { %v3789_v13 = vmul.f32 %v4758_v7, %v3788_v50  ;;  %v4184_v23 = vmul.f32 %v4168_v52, %v3496_v18  ;;  %v3852_v55 = vadd.f32 0.18741608, %v3851_v49  ;;  %vm3831_vm13 = vweird.f32 %v7602_v39 }
 0x47c   : > { %v7606_v21 = vmin.f32 %v3883_v59, 16.0  ;;  %v3838_v56 = vor.u32 1.1754944e-38, %v3837_v24  ;;  %v3815_v2 = vmul.f32 %v3814_v45, %v7517_v10  ;;  %vm3836_vm15 = vcmp.eq.f32.partialorder %v3835_v15, 8.507059e+37 }
 0x47d   : > { %v3473_v4 = vpop.f32.mrf.mxu0  ;;  %v4760_v17 = vpop.eup %4759  ;;  %v3790_v5 = vadd.f32 %v4758_v7, %v3789_v13  ;;  %4248 = vmatmul.f32.gmra.mxu1 %v4184_v23  ;;  %v3853_v34 = vmul.f32 %v3852_v55, %v7563_v40 }
 0x47e   : > { %v3885_v8 = vmul.f32 2.1237322e-06, %v7606_v21  ;;  %v7612_v1 = vadd.f32 %v7347_v22, %v3473_v4  ;;  %v3862_v22 = vmul.f32 %v3861_v6, %v7563_v40  ;;  %v3896_v11 = vmul.f32 3.8918573e-05, %v7606_v21  ;;  %v7648_v6 = vld [vmem:[#allocation7 + $0x4] ss:$0 sm:$0xff] }
 0x47f   : > { %v3827_v57 = vmul.f32 %v4760_v17, %v7602_v39  ;;  %v3794_v14 = vsel %vm3793_vm11, %v4758_v7, %v3790_v5  ;;  %vm3832_vm12 = vweird.f32 %v4760_v17 }
 0x480   : > { %v7618_v27 = vmul.f32 0.70710677, %v7612_v1  ;;  %v3886_v47 = vadd.f32 0.00028619796, %v3885_v8  ;;  %v3863_v46 = vadd.f32 0.4994258, %v3862_v22  ;;  %v3799_v19 = vsel %vm3796_vm10, %v3798_v28, %v3794_v14  ;;  %vm3833_vm14 = vmor %vm3831_vm13, %vm3832_vm12 }
 0x481   : > { %v3897_v20 = vadd.f32 0.001143296, %v3896_v11  ;;  %v3828_v58 = vsub.f32 1.0, %v3827_v57  ;;  %v3800_v63 = vmul.f32 %v3799_v19, %v3775_v51  ;;  %v3498_v22 = vmul.f32 0.5, %v7513_v32 }
 0x482   : > { %v3923_v0 = vmul.f32 %v7618_v27, %v7618_v27  ;;  %v3864_v62 = vmul.f32 %v3863_v46, %v7563_v40  ;;  %v3887_v35 = vmul.f32 %v3886_v47, %v7606_v21  ;;  %v3854_v11 = vadd.f32 1.1283791, %v3853_v34 }
 0x483   : > { %v3898_v61 = vmul.f32 %v3897_v20, %v7606_v21  ;;  %v3829_v9 = vmul.f32 %v4760_v17, %v3828_v58  ;;  %v4489_v31 = vclamps-f32 %v3800_v63, 1.0 }
 0x484   : > { %v7627_v3 = vmin.f32 %v3923_v0, 16.0  ;;  %v7634_v12 = vadd.f32 1.0, %v3864_v62  ;;  %v3888_v59 = vadd.f32 0.0036580483, %v3887_v35  ;;  %v3855_v15 = vmul.f32 %v3854_v11, %v7552_v42 }
 0x485   : > { %v3830_v7 = vadd.f32 %v4760_v17, %v3829_v9  ;;  %v4169_v29 = vadd.f32 1.0, %v4489_v31  ;;  %v3899_v53 = vadd.f32 0.014752088, %v3898_v61 }
 0x486   : > { %v3925_v48 = vmul.f32 2.1237322e-06, %v7627_v3  ;;  %v3936_v33 = vmul.f32 3.8918573e-05, %v7627_v3  ;;  %4761 = vrcp.f32 %v7634_v12  ;;  %v3889_v39 = vmul.f32 %v3888_v59, %v7606_v21 }
 0x487   : > { %v3834_v4 = vsel %vm3833_vm14, %v4760_v17, %v3830_v7  ;;  %v4185_v8 = vmul.f32 %v4169_v29, %v3497_v41  ;;  %v3900_v18 = vmul.f32 %v3899_v53, %v7606_v21  ;;  %v3875_v28 = vand.u32 2147483647, %v7634_v12 }
 0x488   : > { %v3926_v43 = vadd.f32 0.00028619796, %v3925_v48  ;;  %v3937_v16 = vadd.f32 0.001143296, %v3936_v33  ;;  %v3839_v37 = vsel %vm3836_vm15, %v3838_v56, %v3834_v4  ;;  %v3890_v17 = vadd.f32 0.05243302, %v3889_v39 }
 0x489   : > { %v3840_v10 = vmul.f32 %v3839_v37, %v3815_v2  ;;  %4251 = vmatmul.f32.gmra.mxu1 %v4185_v8  ;;  %v3901_v36 = vadd.f32 0.112945676, %v3900_v18  ;;  %v3877_v24 = vand.u32 2147483648, %v7634_v12  ;;  %vm3871_vm1 = vweird.f32 %v7634_v12 }
 0x48a   : > { %v3927_v54 = vmul.f32 %v3926_v43, %v7627_v3  ;;  %v3938_v50 = vmul.f32 %v3937_v16, %v7627_v3  ;;  %v3891_v58 = vmul.f32 %v3890_v17, %v7606_v21  ;;  %vm3876_vm3 = vcmp.eq.f32.partialorder %v3875_v28, 8.507059e+37 }
 0x48b   : > { %v4490_v13 = vclamps-f32 %v3840_v10, 1.0  ;;  %v3902_v0 = vmul.f32 %v3901_v36, %v7606_v21  ;;  %v3878_v55 = vor.u32 1.1754944e-38, %v3877_v24  ;;  %v3499_v37 = vmul.f32 0.5, %v7546_v30 }
 0x48c   : > { %v3928_v38 = vadd.f32 0.0036580483, %v3927_v54  ;;  %v3476_v25 = vpop.f32.mrf.mxu0  ;;  %v4762_v45 = vpop.eup %4761  ;;  %v3939_v60 = vadd.f32 0.014752088, %v3938_v50  ;;  %v3892_v54 = vadd.f32 0.18741608, %v3891_v58 }
 0x48d   : > { %v7651_v51 = vadd.f32 %v7648_v6, %v3476_v25  ;;  %v3867_v40 = vmul.f32 %v4762_v45, %v7634_v12  ;;  %v4170_v23 = vadd.f32 1.0, %v4490_v13  ;;  %v3903_v57 = vadd.f32 0.4994258, %v3902_v0 }
 0x48e   : > { %v3929_v52 = vmul.f32 %v3928_v38, %v7627_v3  ;;  %v3940_v5 = vmul.f32 %v3939_v60, %v7627_v3  ;;  %vm3872_vm0 = vweird.f32 %v4762_v45  ;;  %v3893_v18 = vmul.f32 %v3892_v54, %v7606_v21 }
 0x48f   : > { %v7656_v47 = vmul.f32 0.70710677, %v7651_v51  ;;  %v3868_v49 = vsub.f32 1.0, %v3867_v40  ;;  %v4186_v14 = vmul.f32 %v4170_v23, %v3498_v22  ;;  %v3904_v19 = vmul.f32 %v3903_v57, %v7606_v21  ;;  %vm3873_vm2 = vmor %vm3871_vm1, %vm3872_vm0 }
 0x490   : > { %v3930_v32 = vadd.f32 0.05243302, %v3929_v52  ;;  %v3941_v62 = vadd.f32 0.112945676, %v3940_v5  ;;  %v3894_v40 = vadd.f32 1.1283791, %v3893_v18 }
 0x491   : > { %v3963_v46 = vmul.f32 %v7656_v47, %v7656_v47  ;;  %v3869_v48 = vmul.f32 %v4762_v45, %v3868_v49  ;;  %4254 = vmatmul.f32.gmra.mxu1 %v4186_v14  ;;  %v7674_v43 = vadd.f32 1.0, %v3904_v19 }
 0x492   : > { %v3942_v9 = vmul.f32 %v3941_v62, %v7627_v3  ;;  %v3931_v59 = vmul.f32 %v3930_v32, %v7627_v3 }
 0x493   : > { %v7665_v20 = vmin.f32 %v3963_v46, 16.0  ;;  %v3870_v33 = vadd.f32 %v4762_v45, %v3869_v48  ;;  %4763 = vrcp.f32 %v7674_v43  ;;  %v3917_v23 = vand.u32 2147483648, %v7674_v43 }
 0x494   : > { %v3479_v35 = vpop.f32.mrf.mxu0  ;;  %v3943_v53 = vadd.f32 0.4994258, %v3942_v9  ;;  %v3932_v38 = vadd.f32 0.18741608, %v3931_v59  ;;  %vm3911_vm5 = vweird.f32 %v7674_v43 }
 0x495   : > { %v7670_v63 = vadd.f32 %v7648_v6, %v3479_v35  ;;  %v3965_v61 = vmul.f32 2.1237322e-06, %v7665_v20  ;;  %v3976_v31 = vmul.f32 3.8918573e-05, %v7665_v20  ;;  %v3874_v12 = vsel %vm3873_vm2, %v4762_v45, %v3870_v33 }
 0x496   : > { %v3879_v29 = vsel %vm3876_vm3, %v3878_v55, %v3874_v12  ;;  %v3944_v8 = vmul.f32 %v3943_v53, %v7627_v3  ;;  %v3933_v21 = vmul.f32 %v3932_v38, %v7627_v3  ;;  %v3915_v3 = vand.u32 2147483647, %v7674_v43 }
 0x497   : > { %v7679_v41 = vmul.f32 0.70710677, %v7670_v63  ;;  %v3966_v56 = vadd.f32 0.00028619796, %v3965_v61  ;;  %v3880_v42 = vmul.f32 %v3879_v29, %v3855_v15  ;;  %v3977_v2 = vadd.f32 0.001143296, %v3976_v31 }
 0x498   : > { %v7696_v36 = vadd.f32 1.0, %v3944_v8  ;;  %v3934_v28 = vadd.f32 1.1283791, %v3933_v21  ;;  %v3918_v58 = vor.u32 1.1754944e-38, %v3917_v23  ;;  %v3895_v33 = vmul.f32 %v3894_v40, %v7594_v44 }
 0x499   : > { %v4003_v7 = vmul.f32 %v7679_v41, %v7679_v41  ;;  %v4491_v25 = vclamps-f32 %v3880_v42, 1.0  ;;  %v4764_v39 = vpop.eup %4763  ;;  %v3967_v10 = vmul.f32 %v3966_v56, %v7665_v20  ;;  %v3978_v60 = vmul.f32 %v3977_v2, %v7665_v20 }
 0x49a   : > { %v3907_v30 = vmul.f32 %v4764_v39, %v7674_v43  ;;  %4765 = vrcp.f32 %v7696_v36  ;;  %vm3912_vm4 = vweird.f32 %v4764_v39  ;;  %vm3916_vm7 = vcmp.eq.f32.partialorder %v3915_v3, 8.507059e+37 }
 0x49b   : > { %v7686_v16 = vmin.f32 %v4003_v7, 16.0  ;;  %v4171_v45 = vadd.f32 1.0, %v4491_v25  ;;  %v3968_v17 = vadd.f32 0.0036580483, %v3967_v10  ;;  %v3979_v5 = vadd.f32 0.014752088, %v3978_v60  ;;  %vm3913_vm6 = vmor %vm3911_vm5, %vm3912_vm4 }
 0x49c   : > { %v3482_v4 = vpop.f32.mrf.mxu0  ;;  %v3908_v11 = vsub.f32 1.0, %v3907_v30  ;;  %v3500_v12 = vmul.f32 0.5, %v7589_v26  ;;  %v3935_v54 = vmul.f32 %v3934_v28, %v7618_v27  ;;  %v3955_v42 = vand.u32 2147483647, %v7696_v36 }
 0x49d   : > { %v4005_v50 = vmul.f32 2.1237322e-06, %v7686_v16  ;;  %v7693_v34 = vadd.f32 %v7648_v6, %v3482_v4  ;;  %v4187_v13 = vmul.f32 %v4171_v45, %v3499_v37  ;;  %v4016_v22 = vmul.f32 3.8918573e-05, %v7686_v16 }
 0x49e   : > { %v3909_v49 = vmul.f32 %v4764_v39, %v3908_v11  ;;  %v3980_v32 = vmul.f32 %v3979_v5, %v7665_v20  ;;  %v3969_v19 = vmul.f32 %v3968_v17, %v7665_v20  ;;  %v3957_v4 = vand.u32 2147483648, %v7696_v36 }
 0x49f   : > { %v7700_v52 = vmul.f32 0.70710677, %v7693_v34  ;;  %v4006_v0 = vadd.f32 0.00028619796, %v4005_v50  ;;  %4257 = vmatmul.f32.gmra.mxu1 %v4187_v13  ;;  %v4017_v14 = vadd.f32 0.001143296, %v4016_v22  ;;  %vm3951_vm9 = vweird.f32 %v7696_v36 }
 0x4a0   : > { %v3910_v35 = vadd.f32 %v4764_v39, %v3909_v49  ;;  %v4766_v48 = vpop.eup %4765  ;;  %v3981_v61 = vadd.f32 0.112945676, %v3980_v32  ;;  %v3970_v56 = vadd.f32 0.05243302, %v3969_v19  ;;  %vm3956_vm11 = vcmp.eq.f32.partialorder %v3955_v42, 8.507059e+37 }
 0x4a1   : > { %v4043_v46 = vmul.f32 %v7700_v52, %v7700_v52  ;;  %v4007_v24 = vmul.f32 %v4006_v0, %v7686_v16  ;;  %v3947_v59 = vmul.f32 %v4766_v48, %v7696_v36  ;;  %v4018_v43 = vmul.f32 %v4017_v14, %v7686_v16 }
 0x4a2   : > { %v3914_v15 = vsel %vm3913_vm6, %v4764_v39, %v3910_v35  ;;  %v3982_v53 = vmul.f32 %v3981_v61, %v7665_v20  ;;  %vm3952_vm8 = vweird.f32 %v4766_v48  ;;  %v3971_v10 = vmul.f32 %v3970_v56, %v7665_v20 }
 0x4a3   : > { %v7718_v9 = vmin.f32 %v4043_v46, 16.0  ;;  %v3919_v31 = vsel %vm3916_vm7, %v3918_v58, %v3914_v15  ;;  %v4008_v7 = vadd.f32 0.0036580483, %v4007_v24  ;;  %v3948_v44 = vsub.f32 1.0, %v3947_v59  ;;  %vm3953_vm10 = vmor %vm3951_vm9, %vm3952_vm8 }
 0x4a4   : > { %v3485_v57 = vpop.f32.mrf.mxu0  ;;  %v3920_v29 = vmul.f32 %v3919_v31, %v3895_v33  ;;  %v3983_v27 = vadd.f32 0.4994258, %v3982_v53  ;;  %v4019_v37 = vadd.f32 0.014752088, %v4018_v43  ;;  %v3958_v22 = vor.u32 1.1754944e-38, %v3957_v4 }
 0x4a5   : > { %v7713_v62 = vadd.f32 %v7648_v6, %v3485_v57  ;;  %v4045_v2 = vmul.f32 2.1237322e-06, %v7718_v9  ;;  %v3949_v8 = vmul.f32 %v4766_v48, %v3948_v44  ;;  %v4009_v18 = vmul.f32 %v4008_v7, %v7686_v16 }
 0x4a6   : > { %v4492_v38 = vclamps-f32 %v3920_v29, 1.0  ;;  %v3984_v60 = vmul.f32 %v3983_v27, %v7665_v20  ;;  %v4020_v30 = vmul.f32 %v4019_v37, %v7686_v16  ;;  %v4056_v5 = vmul.f32 3.8918573e-05, %v7718_v9 }
 0x4a7   : > { %v7721_v55 = vmul.f32 0.70710677, %v7713_v62  ;;  %v3950_v45 = vadd.f32 %v4766_v48, %v3949_v8  ;;  %v4046_v21 = vadd.f32 0.00028619796, %v4045_v2  ;;  %v4010_v11 = vadd.f32 0.05243302, %v4009_v18 }
 0x4a8   : > { %v4172_v39 = vadd.f32 1.0, %v4492_v38  ;;  %v7747_v36 = vadd.f32 1.0, %v3984_v60  ;;  %v4021_v23 = vadd.f32 0.112945676, %v4020_v30  ;;  %v3972_v3 = vadd.f32 0.18741608, %v3971_v10 }
 0x4a9   : > { %v4083_v25 = vmul.f32 %v7721_v55, %v7721_v55  ;;  %v3954_v0 = vsel %vm3953_vm10, %v4766_v48, %v3950_v45  ;;  %v4047_v28 = vmul.f32 %v4046_v21, %v7718_v9  ;;  %v4011_v35 = vmul.f32 %v4010_v11, %v7686_v16 }
 0x4aa   : > { %v4188_v13 = vmul.f32 %v4172_v39, %v3500_v12  ;;  %v3959_v17 = vsel %vm3956_vm11, %v3958_v22, %v3954_v0  ;;  %4767 = vrcp.f32 %v7747_v36  ;;  %v4022_v24 = vmul.f32 %v4021_v23, %v7686_v16 }
 0x4ab   : > { %v7742_v40 = vmin.f32 %v4083_v25, 16.0  ;;  %v3960_v49 = vmul.f32 %v3959_v17, %v3935_v54  ;;  %v4057_v48 = vadd.f32 0.001143296, %v4056_v5  ;;  %v3501_v19 = vmul.f32 0.5, %v7612_v1 }
 0x4ac   : > { %v3488_v26 = vpop.f32.mrf.mxu0  ;;  %4260 = vmatmul.f32.gmra.mxu1 %v4188_v13  ;;  %v4023_v33 = vadd.f32 0.4994258, %v4022_v24  ;;  %v4048_v15 = vadd.f32 0.0036580483, %v4047_v28  ;;  %v3973_v54 = vmul.f32 %v3972_v3, %v7665_v20  ;;  %v4012_v44 = vadd.f32 0.18741608, %v4011_v35 }
 0x4ad   : > { %v7735_v50 = vadd.f32 %v7648_v6, %v3488_v26  ;;  %v4085_v57 = vmul.f32 2.1237322e-06, %v7742_v40  ;;  %v4493_v14 = vclamps-f32 %v3960_v49, 1.0  ;;  %v4058_v31 = vmul.f32 %v4057_v48, %v7718_v9 }
 0x4ae   : > { %v4096_v59 = vmul.f32 3.8918573e-05, %v7742_v40  ;;  %v4024_v56 = vmul.f32 %v4023_v33, %v7686_v16  ;;  %v4049_v4 = vmul.f32 %v4048_v15, %v7718_v9  ;;  %v3974_v20 = vadd.f32 1.1283791, %v3973_v54 }
 0x4af   : > { %v7745_v6 = vmul.f32 0.70710677, %v7735_v50  ;;  %v4173_v61 = vadd.f32 1.0, %v4493_v14  ;;  %v4086_v7 = vadd.f32 0.00028619796, %v4085_v57  ;;  %v3997_v37 = vand.u32 2147483648, %v7747_v36 }
 0x4b0   : > { %v4768_v12 = vpop.eup %4767  ;;  %v4059_v42 = vadd.f32 0.014752088, %v4058_v31  ;;  %v7767_v2 = vadd.f32 1.0, %v4024_v56  ;;  %v4097_v38 = vadd.f32 0.001143296, %v4096_v59  ;;  %v4013_v45 = vmul.f32 %v4012_v44, %v7686_v16 }
 0x4b1   : > { %v4123_v46 = vmul.f32 %v7745_v6, %v7745_v6  ;;  %v4189_v29 = vmul.f32 %v4173_v61, %v3501_v19  ;;  %v3987_v1 = vmul.f32 %v4768_v12, %v7747_v36  ;;  %v4087_v27 = vmul.f32 %v4086_v7, %v7742_v40 }
 0x4b2   : > { %v4060_v26 = vmul.f32 %v4059_v42, %v7718_v9  ;;  %4769 = vrcp.f32 %v7767_v2  ;;  %vm3992_vm12 = vweird.f32 %v4768_v12  ;;  %v3995_v39 = vand.u32 2147483647, %v7747_v36 }
 0x4b3   : > { %v7755_v32 = vmin.f32 %v4123_v46, 16.0  ;;  %v3988_v25 = vsub.f32 1.0, %v3987_v1  ;;  %v4098_v30 = vmul.f32 %v4097_v38, %v7742_v40  ;;  %v4050_v13 = vadd.f32 0.05243302, %v4049_v4 }
 0x4b4   : > { %4263 = vmatmul.f32.gmra.mxu1 %v4189_v29  ;;  %v4061_v10 = vadd.f32 0.112945676, %v4060_v26  ;;  %vm3991_vm13 = vweird.f32 %v7747_v36  ;;  %v3975_v11 = vmul.f32 %v3974_v20, %v7656_v47  ;;  %v4088_v17 = vadd.f32 0.0036580483, %v4087_v27 }
 0x4b5   : > { %v4125_v58 = vmul.f32 2.1237322e-06, %v7755_v32  ;;  %v4136_v43 = vmul.f32 3.8918573e-05, %v7755_v32  ;;  %v3989_v18 = vmul.f32 %v4768_v12, %v3988_v25  ;;  %vm3993_vm14 = vmor %vm3991_vm13, %vm3992_vm12  ;;  %v3998_v23 = vor.u32 1.1754944e-38, %v3997_v37 }
 0x4b6   : > { %v4062_v0 = vmul.f32 %v4061_v10, %v7718_v9  ;;  %v4099_v5 = vadd.f32 0.014752088, %v4098_v30  ;;  %vm3996_vm15 = vcmp.eq.f32.partialorder %v3995_v39, 8.507059e+37  ;;  %v3502_v28 = vmul.f32 0.5, %v7651_v51 }
 0x4b7   : > { %v4126_v53 = vadd.f32 0.00028619796, %v4125_v58  ;;  %v4137_v8 = vadd.f32 0.001143296, %v4136_v43  ;;  %v3990_v22 = vadd.f32 %v4768_v12, %v3989_v18  ;;  %v4014_v36 = vadd.f32 1.1283791, %v4013_v45 }
 0x4b8   : > { %v4063_v16 = vadd.f32 0.4994258, %v4062_v0  ;;  %v4770_v3 = vpop.eup %4769  ;;  %v4100_v24 = vmul.f32 %v4099_v5, %v7742_v40  ;;  %v4051_v19 = vmul.f32 %v4050_v13, %v7718_v9  ;;  %v4089_v58 = vmul.f32 %v4088_v17, %v7742_v40  ;;  %v7811_v17 = vld [vmem:[#allocation7 + $0x5] ss:$0 sm:$0xff] }
 0x4b9   : > { %v4127_v60 = vmul.f32 %v4126_v53, %v7755_v32  ;;  %v4138_v21 = vmul.f32 %v4137_v8, %v7755_v32  ;;  %v3994_v46 = vsel %vm3993_vm14, %v4768_v12, %v3990_v22  ;;  %v4027_v48 = vmul.f32 %v4770_v3, %v7767_v2 }
 0x4ba   : > { %v3999_v14 = vsel %vm3996_vm15, %v3998_v23, %v3994_v46  ;;  %v4064_v47 = vmul.f32 %v4063_v16, %v7718_v9  ;;  %v4101_v61 = vadd.f32 0.112945676, %v4100_v24  ;;  %v4035_v51 = vand.u32 2147483647, %v7767_v2 }
 0x4bb   : > { %v4139_v49 = vadd.f32 0.014752088, %v4138_v21  ;;  %v4128_v57 = vadd.f32 0.0036580483, %v4127_v60  ;;  %v4000_v35 = vmul.f32 %v3999_v14, %v3975_v11  ;;  %v4028_v31 = vsub.f32 1.0, %v4027_v48 }
 0x4bc   : > { %v7790_v59 = vadd.f32 1.0, %v4064_v47  ;;  %v4037_v12 = vand.u32 2147483648, %v7767_v2  ;;  %v4102_v54 = vmul.f32 %v4101_v61, %v7742_v40  ;;  %vm4032_vm0 = vweird.f32 %v4770_v3 }
 0x4bd   : > { %v4140_v33 = vmul.f32 %v4139_v49, %v7755_v32  ;;  %v4494_v15 = vclamps-f32 %v4000_v35, 1.0  ;;  %v4129_v43 = vmul.f32 %v4128_v57, %v7755_v32  ;;  %v4029_v56 = vmul.f32 %v4770_v3, %v4028_v31 }
 0x4be   : > { %4771 = vrcp.f32 %v7790_v59  ;;  %v4052_v44 = vadd.f32 0.18741608, %v4051_v19  ;;  %v4090_v1 = vadd.f32 0.05243302, %v4089_v58  ;;  %vm4031_vm1 = vweird.f32 %v7767_v2 }
 0x4bf   : > { %v4141_v7 = vadd.f32 0.112945676, %v4140_v33  ;;  %v4174_v29 = vadd.f32 1.0, %v4494_v15  ;;  %v4030_v38 = vadd.f32 %v4770_v3, %v4029_v56  ;;  %v4103_v4 = vadd.f32 0.4994258, %v4102_v54  ;;  %vm4033_vm2 = vmor %vm4031_vm1, %vm4032_vm0 }
 0x4c0   : > { %v4015_v25 = vmul.f32 %v4014_v36, %v7679_v41  ;;  %v4038_v26 = vor.u32 1.1754944e-38, %v4037_v12  ;;  %v4130_v20 = vadd.f32 0.05243302, %v4129_v43  ;;  %vm4036_vm3 = vcmp.eq.f32.partialorder %v4035_v51, 8.507059e+37 }
 0x4c1   : > { %v4142_v42 = vmul.f32 %v4141_v7, %v7755_v32  ;;  %v4190_v53 = vmul.f32 %v4174_v29, %v3502_v28  ;;  %v4034_v27 = vsel %vm4033_vm2, %v4770_v3, %v4030_v38  ;;  %v4104_v37 = vmul.f32 %v4103_v4, %v7742_v40 }
 0x4c2   : > { %v4091_v18 = vmul.f32 %v4090_v1, %v7742_v40  ;;  %v4039_v39 = vsel %vm4036_vm3, %v4038_v26, %v4034_v27  ;;  %v4053_v2 = vmul.f32 %v4052_v44, %v7718_v9  ;;  %v4131_v13 = vmul.f32 %v4130_v20, %v7755_v32 }
 0x4c3   : > { %v4143_v8 = vadd.f32 0.4994258, %v4142_v42  ;;  %4266 = vmatmul.f32.gmra.mxu1 %v4190_v53  ;;  %v4040_v60 = vmul.f32 %v4039_v39, %v4015_v25  ;;  %v7803_v30 = vadd.f32 1.0, %v4104_v37  ;;  %v4234_v9 = vpop.f32.mrf.mxu1  ;;  %v3503_v23 = vmul.f32 0.5, %v7670_v63 }
 0x4c4   : > { %v4772_v45 = vpop.eup %4771  ;;  %v4092_v0 = vadd.f32 0.18741608, %v4091_v18  ;;  %v4054_v5 = vadd.f32 1.1283791, %v4053_v2  ;;  %v4077_v16 = vand.u32 2147483648, %v7790_v59  ;;  %v4235_v28 = vadd.f32 %v7811_v17, %v4234_v9 }
 0x4c5   : > { %v4144_v10 = vmul.f32 %v4143_v8, %v7755_v32  ;;  %v4067_v41 = vmul.f32 %v4772_v45, %v7790_v59  ;;  %v4495_v22 = vclamps-f32 %v4040_v60, 1.0  ;;  %4773 = vrcp.f32 %v7803_v30 }
 0x4c6   : > { %vm4072_vm4 = vweird.f32 %v4772_v45  ;;  %v4075_v3 = vand.u32 2147483647, %v7790_v59  ;;  %v4132_v57 = vadd.f32 0.18741608, %v4131_v13  ;;  %v4093_v24 = vmul.f32 %v4092_v0, %v7742_v40  ;;  %4282 = vst [vmem:[%s7821_s18] sm:$0xff] %v4235_v28 }
 0x4c7   : > { %v7806_v21 = vadd.f32 1.0, %v4144_v10  ;;  %v4068_v11 = vsub.f32 1.0, %v4067_v41  ;;  %v4175_v46 = vadd.f32 1.0, %v4495_v22  ;;  %vm4071_vm5 = vweird.f32 %v7790_v59 }
 0x4c8   : > { %vm4073_vm6 = vmor %vm4071_vm5, %vm4072_vm4  ;;  %v4078_v35 = vor.u32 1.1754944e-38, %v4077_v16  ;;  %v4055_v47 = vmul.f32 %v4054_v5, %v7700_v52  ;;  %vm4076_vm7 = vcmp.eq.f32.partialorder %v4075_v3, 8.507059e+37  ;;  %v4133_v40 = vmul.f32 %v4132_v57, %v7755_v32 }
 0x4c9   : > { %4775 = vrcp.f32 %v7806_v21  ;;  %v4069_v49 = vmul.f32 %v4772_v45, %v4068_v11  ;;  %v4191_v14 = vmul.f32 %v4175_v46, %v3503_v23  ;;  %v4094_v15 = vadd.f32 1.1283791, %v4093_v24 }
 0x4ca   : > { %v4115_v43 = vand.u32 2147483647, %v7803_v30  ;;  %v4117_v12 = vand.u32 2147483648, %v7803_v30  ;;  %v4157_v32 = vand.u32 2147483648, %v7806_v21  ;;  %v4134_v56 = vadd.f32 1.1283791, %v4133_v40 }
 0x4cb   : > { %v4070_v36 = vadd.f32 %v4772_v45, %v4069_v49  ;;  %v4774_v63 = vpop.eup %4773  ;;  %4269 = vmatmul.f32.gmra.mxu1 %v4191_v14  ;;  %v4155_v1 = vand.u32 2147483647, %v7806_v21  ;;  %v3504_v42 = vmul.f32 0.5, %v7693_v34  ;;  %vm4111_vm10 = vweird.f32 %v7803_v30 }
 0x4cc   : > { %v4107_v58 = vmul.f32 %v4774_v63, %v7803_v30  ;;  %v4237_v59 = vpop.f32.mrf.mxu1  ;;  %vm4112_vm8 = vweird.f32 %v4774_v63  ;;  %v4095_v4 = vmul.f32 %v4094_v15, %v7721_v55  ;;  %v4118_v25 = vor.u32 1.1754944e-38, %v4117_v12 }
 0x4cd   : > { %v4074_v19 = vsel %vm4073_vm6, %v4772_v45, %v4070_v36  ;;  %v4238_v52 = vadd.f32 %v7811_v17, %v4237_v59  ;;  %vm4113_vm11 = vmor %vm4111_vm10, %vm4112_vm8  ;;  %vm4151_vm12 = vweird.f32 %v7806_v21  ;;  %vm4116_vm13 = vcmp.eq.f32.partialorder %v4115_v43, 8.507059e+37 }
 0x4ce   : > { %v4079_v61 = vsel %vm4076_vm7, %v4078_v35, %v4074_v19  ;;  %v4108_v51 = vsub.f32 1.0, %v4107_v58  ;;  %v4158_v27 = vor.u32 1.1754944e-38, %v4157_v32  ;;  %v4135_v34 = vmul.f32 %v4134_v56, %v7745_v6 }
 0x4cf   : > { %v4776_v48 = vpop.eup %4775  ;;  %v4080_v31 = vmul.f32 %v4079_v61, %v4055_v47  ;;  %4283 = vst [vmem:[%s7821_s18 + $0x8] sm:$0xff] %v4238_v52  ;;  %vm4156_vm15 = vcmp.eq.f32.partialorder %v4155_v1, 8.507059e+37  ;;  %v3505_v30 = vmul.f32 0.5, %v7713_v62  ;;  %v3506_v22 = vmul.f32 0.5, %v7735_v50 }
 0x4d0   : > { %v4147_v33 = vmul.f32 %v4776_v48, %v7806_v21  ;;  %v4109_v29 = vmul.f32 %v4774_v63, %v4108_v51  ;;  %vm4152_vm9 = vweird.f32 %v4776_v48 }
 0x4d1   : > { %v4496_v7 = vclamps-f32 %v4080_v31, 1.0  ;;  %vm4153_vm14 = vmor %vm4151_vm12, %vm4152_vm9 }
 0x4d2   : > { %v4148_v54 = vsub.f32 1.0, %v4147_v33  ;;  %v4110_v38 = vadd.f32 %v4774_v63, %v4109_v29 }
 0x4d3   : > { %v4176_v53 = vadd.f32 1.0, %v4496_v7 }
 0x4d4   : > { %v4149_v44 = vmul.f32 %v4776_v48, %v4148_v54  ;;  %v4114_v20 = vsel %vm4113_vm11, %v4774_v63, %v4110_v38 }
 0x4d5   : > { %v4192_v8 = vmul.f32 %v4176_v53, %v3504_v42  ;;  %v4119_v37 = vsel %vm4116_vm13, %v4118_v25, %v4114_v20  ;;  %v4240_v10 = vpop.f32.mrf.mxu1 }
 0x4d6   : > { %v4150_v26 = vadd.f32 %v4776_v48, %v4149_v44  ;;  %v4120_v39 = vmul.f32 %v4119_v37, %v4095_v4  ;;  %v4241_v2 = vadd.f32 %v7811_v17, %v4240_v10 }
 0x4d7   : > { %4272 = vmatmul.f32.gmra.mxu1 %v4192_v8 }
 0x4d8   : > { %v4154_v18 = vsel %vm4153_vm14, %v4776_v48, %v4150_v26  ;;  %v4497_v60 = vclamps-f32 %v4120_v39, 1.0  ;;  %4284 = vst [vmem:[%s7821_s18 + $0x10] sm:$0xff] %v4241_v2 }
 0x4d9   : > { %v4159_v55 = vsel %vm4156_vm15, %v4158_v27, %v4154_v18 }
 0x4da   : > { %v4160_v45 = vmul.f32 %v4159_v55, %v4135_v34  ;;  %v4177_v41 = vadd.f32 1.0, %v4497_v60 }
 0x4dc   : > { %v4498_v21 = vclamps-f32 %v4160_v45, 1.0  ;;  %v4193_v6 = vmul.f32 %v4177_v41, %v3505_v30 }
 0x4de   : > { %v4178_v13 = vadd.f32 1.0, %v4498_v21 }
 0x4df   : > { %4275 = vmatmul.f32.gmra.mxu1 %v4193_v6 }
 0x4e0   : > { %v4194_v0 = vmul.f32 %v4178_v13, %v3506_v22 }
 0x4e7   : > { %v4243_v11 = vpop.f32.mrf.mxu1  ;;  %4278 = vmatmul.f32.gmra.mxu1 %v4194_v0 }
 0x4e8   : > { %v4244_v9 = vadd.f32 %v7811_v17, %v4243_v11 }
 0x4ea   : > { %4285 = vst [vmem:[%s7821_s18 + $0x18] sm:$0xff] %v4244_v9 }
 0x4ef   : > { %v4246_v23 = vpop.f32.mrf.mxu1 }
 0x4f0   : > { %v4247_v62 = vadd.f32 %v7811_v17, %v4246_v23 }
 0x4f2   : > { %4286 = vst [vmem:[%s7821_s18 + $0x20] sm:$0xff] %v4247_v62 }
 0x4fa   : > { %v4249_v5 = vpop.f32.mrf.mxu1 }
 0x4fb   : > { %v4250_v46 = vadd.f32 %v7811_v17, %v4249_v5 }
 0x4fd   : > { %4287 = vst [vmem:[%s7821_s18 + $0x28] sm:$0xff] %v4250_v46 }
 0x506   : > { %v4252_v16 = vpop.f32.mrf.mxu1 }
 0x507   : > { %v4253_v50 = vadd.f32 %v7811_v17, %v4252_v16 }
 0x509   : > { %4288 = vst [vmem:[%s7821_s18 + $0x30] sm:$0xff] %v4253_v50 }
 0x50e   : > { %v4255_v49 = vpop.f32.mrf.mxu1 }
 0x50f   : > { %v4256_v3 = vadd.f32 %v7811_v17, %v4255_v49 }
 0x511   : > { %4289 = vst [vmem:[%s7821_s18 + $0x38] sm:$0xff] %v4256_v3 }
 0x51c   : > { %v4258_v28 = vpop.f32.mrf.mxu1 }
 0x51d   : > { %v4259_v57 = vadd.f32 %v7811_v17, %v4258_v28 }
 0x51f   : > { %4290 = vst [vmem:[%s7821_s18 + $0x40] sm:$0xff] %v4259_v57 }
 0x529   : > { %v4261_v14 = vpop.f32.mrf.mxu1 }
 0x52a   : > { %v4262_v24 = vadd.f32 %v7811_v17, %v4261_v14 }
 0x52c   : > { %4291 = vst [vmem:[%s7821_s18 + $0x48] sm:$0xff] %v4262_v24 }
 0x531   : > { %v4264_v36 = vpop.f32.mrf.mxu1 }
 0x532   : > { %v4265_v63 = vadd.f32 %v7811_v17, %v4264_v36 }
 0x534   : > { %4292 = vst [vmem:[%s7821_s18 + $0x50] sm:$0xff] %v4265_v63 }
 0x540   : > { %v4267_v35 = vpop.f32.mrf.mxu1 }
 0x541   : > { %v4268_v48 = vadd.f32 %v7811_v17, %v4267_v35 }
 0x543   : > { %4293 = vst [vmem:[%s7821_s18 + $0x58] sm:$0xff] %v4268_v48 }
 0x548   : > { %v4270_v47 = vpop.f32.mrf.mxu1 }
 0x549   : > { %v4271_v19 = vadd.f32 %v7811_v17, %v4270_v47 }
 0x54b   : > { %4294 = vst [vmem:[%s7821_s18 + $0x60] sm:$0xff] %v4271_v19 }
 0x554   : > { %v4273_v58 = vpop.f32.mrf.mxu1 }
 0x555   : > { %v4274_v40 = vadd.f32 %v7811_v17, %v4273_v58 }
 0x557   : > { %4295 = vst [vmem:[%s7821_s18 + $0x68] sm:$0xff] %v4274_v40 }
 0x55c   : > { %v4276_v61 = vpop.f32.mrf.mxu1 }
 0x55d   : > { %v4277_v33 = vadd.f32 %v7811_v17, %v4276_v61 }
 0x55f   : > { %4296 = vst [vmem:[%s7821_s18 + $0x70] sm:$0xff] %v4277_v33 }
 0x564   : > { %v4279_v15 = vpop.f32.mrf.mxu1 }
 0x565   : > { %v4280_v31 = vadd.f32 %v7811_v17, %v4279_v15 }
 0x567   : > { %4297 = vst [vmem:[%s7821_s18 + $0x78] sm:$0xff] %v4280_v31 }
 0x568   : > { %4897 = shalt.err (!%p4894_p10)
}
 0x569   : > { %s4948_s20 = smov 128   ;;  %s4949_s26 = smov 8  }
 0x56a   : > { %4548 = dma.vmem_to_hbm [thread:$0]  (%p5042_p5), %s4312_s4, 2048, %s4314_s5, %s4299_s6, %s4948_s20, %s4948_s20, %s4949_s26  }
 0x56b PF: > { %s4328_s27 = sand.u32 1, %s4928_s12   ;;  %p7990_p12 = scmp.ge.s32.totalorder %s4940_s15, 2 }
 0x56c   : > { %s4329_s7 = scalar_lea.sflag [#allocation4], %s4328_s27 }
 0x56d   : > { %p4562_p13 = pnand %p7990_p12, %p5005_p6 }
 0x56f   : > { %p4563_p0 = pneg %p4562_p13 }
 0x571   : > { %4923 = dma.done.wait (%p4563_p0), %s4329_s7, 2048  }
 0x572   : > { %4925 = vsyncadd (%p4563_p0), %s4329_s7, 4294965248  ;;  %p17_p3 = scmp.ge.s32.totalorder %s5029_s8, 4   ;;  %s7991_s12 = smov %s4932_s13 }
 0x573   : > { %s7992_s13 = smov %s4936_s14  ;;  %s7993_s14 = smov %s5038_s11 }
 0x574   : > { %s7994_s15 = smov %s5029_s8  ;;  %19 = sbr.rel (!%p17_p3) target bundleno = 6 (0x6), region = 95 }
 0x579   :  { %4335 = vsyncpa [#allocation3], 1 }
 0x57a   :  { %4337 = vsyncpa [#allocation3 + $0x1], 1 }
 0x57b   :  { %4338 = vsyncpa [#allocation6], 1 }
 0x57c   :  { %4339 = vsyncpa [#allocation4], 1 }
 0x57d   :  { %4341 = vsyncpa [#allocation4 + $0x1], 1 }

</bundles_post_ra>
